<compile_context>
chip_gen: v7x
topology: tpu7x:2x2x1
jax: 0.10.0
libtpu: 0.0.40
codegen_flags: <defaults>
</compile_context>

<pallas_src>
import math

import jax
import jax.numpy as jnp
from jax.experimental import pallas as pl
from jax.experimental.pallas import tpu as pltpu


def _round_up(x, m):
    return ((x + m - 1) // m) * m


def gmu_fusion_kernel(h0_ref, h1_ref, h2_ref, h3_ref, w_ref, b_ref, bg_ref, out_ref):
    # h*_ref : (TB, dp)        matmul dtype (bf16 by default)
    # w_ref  : (4, dp, dp+128) matmul dtype  [view weight | lane-padded gate weight]
    # b_ref  : (4, 1, dp)      f32  (linear bias + per-view bias, zero-padded)
    # bg_ref : (1, 128)        f32  (gate bias in lanes 0..3, -1e30 in padded lanes)
    # out_ref: (TB, dp)
    dp = out_ref.shape[-1]
    h_refs = (h0_ref, h1_ref, h2_ref, h3_ref)
    # f32-operand runs use HIGHEST precision so the exactness check is meaningful;
    # bf16 operands take the native MXU path.
    mm_prec = jax.lax.Precision.HIGHEST if h0_ref.dtype == jnp.float32 else None

    vs = []
    logits = bg_ref[...]                       # (1, 128) f32 -> broadcasts to (TB, 128)
    for i in range(4):
        # One fused MXU matmul per view: transform (dp lanes) + gate logits (128 lanes).
        acc = jnp.dot(h_refs[i][...], w_ref[i],
                      preferred_element_type=jnp.float32, precision=mm_prec)
        # Store the tanh output in the (narrow) matmul dtype to trim live f32 temps.
        vs.append(jnp.tanh(acc[:, :dp] + b_ref[i]).astype(h_refs[i].dtype))
        logits = logits + acc[:, dp:]          # stays f32; padded lanes keep -1e30

    # Softmax over the 4 valid gate lanes.  Exact divide (the approx EUP reciprocal
    # broke the f32 validation).  Everything stays f32 so the -1e30 padded lanes
    # exp to exactly 0 and no masking is needed — do NOT downcast logits/bg.
    m = jnp.max(logits, axis=-1, keepdims=True)
    e = jnp.exp(logits - m)
    alpha = e / jnp.sum(e, axis=-1, keepdims=True)

    fused = alpha[:, 0:1] * vs[0].astype(jnp.float32)
    for i in range(1, 4):
        fused = fused + alpha[:, i:i + 1] * vs[i].astype(jnp.float32)
    out_ref[...] = fused.astype(out_ref.dtype)


def pack_gmu_params(params, *, matmul_dtype=jnp.bfloat16):
    """One-time packing of module params into the fused kernel layout (hoist for inference)."""
    W, b_lin, b_view, Wg, bg = (params["W"], params["b_lin"], params["b_view"],
                                params["Wg"], params["bg"])
    d = W.shape[-1]
    # Lane-dense feature dim; pad to 256 once d is large so the 256-wide v6e/v7x MXU fills.
    dp = _round_up(d, 256 if d >= 1024 else 128)
    dg = dp + 128  # fused [transform | gate-logit] output width

    # W_aug[i] = [ W[i] padded to (dp, dp) | Wg[i] zero-padded to (dp, 128) ]
    w_aug = jnp.zeros((4, dp, dg), jnp.float32)
    w_aug = w_aug.at[:, :d, :d].set(W.astype(jnp.float32))
    w_aug = w_aug.at[:, :d, dp:dp + 4].set(Wg.reshape(4, d, 4).astype(jnp.float32))
    w_aug = w_aug.astype(matmul_dtype)

    b = jnp.zeros((4, 1, dp), jnp.float32).at[:, 0, :d].set(b_lin + b_view)
    # Gate bias in lanes 0..3; padded lanes get -1e30 so they softmax to exactly 0.
    # NOTE: bg_pad / logits must stay f32 end-to-end; downcasting -1e30 to bf16
    # overflows to -inf and makes exp(-inf - m) NaN-prone.
    bg_pad = jnp.full((1, 128), -1e30, jnp.float32).at[0, :4].set(bg.astype(jnp.float32))

    return {"w_aug": w_aug, "b": b, "bg_pad": bg_pad, "d": d, "dp": dp, "dg": dg}


def four_view_gmu_fusion(h_list, params, *, tb=256, matmul_dtype=jnp.bfloat16):
    """h_list: list of 4 arrays, each (B, d). Returns fused (B, d)."""
    if "w_aug" not in params:                   # raw module params -> pack on the fly
        params = pack_gmu_params(params, matmul_dtype=matmul_dtype)
    w_aug, b, bg_pad = params["w_aug"], params["b"], params["bg_pad"]
    d, dp, dg = params["d"], params["dp"], params["dg"]
    matmul_dtype = w_aug.dtype

    B = h_list[0].shape[0]
    out_dtype = h_list[0].dtype
    itemsize = jnp.dtype(matmul_dtype).itemsize
    out_itemsize = jnp.dtype(out_dtype).itemsize

    # ---- batch padding + adaptive tile ----
    sub = 8 * max(1, 4 // itemsize)             # sublane pack: 8 rows f32, 16 rows bf16
    B_pad = _round_up(B, sub)
    TB = max(sub, (min(tb, B_pad) // sub) * sub)
    if pl.cdiv(B_pad, TB) < 8 and B_pad > sub:
        # keep >= 8 grid steps so megacore sharding + double-buffering have work
        TB = max(sub, _round_up(pl.cdiv(B_pad, 8), sub))
    TB = min(TB, B_pad)
    grid = (pl.cdiv(B_pad, TB),)

    def prep(h):
        if B_pad != B or dp != d:
            h = jnp.pad(h, ((0, B_pad - B), (0, dp - d)))
        return h.astype(matmul_dtype)

    hs = [prep(h) for h in h_list]

    # ---- BlockSpecs ----
    h_spec = pl.BlockSpec((TB, dp), lambda i: (i, 0))

    def resident(shape):
        # Constant index_map across the grid -> single-buffer to avoid duplicating
        # the resident weights/biases in VMEM.
        idx = lambda i, _n=len(shape): (0,) * _n
        try:
            return pl.BlockSpec(shape, idx, pipeline_mode=pl.Buffered(1))
        except TypeError:   # older BlockSpec without pipeline_mode
            return pl.BlockSpec(shape, idx)

    # ---- chip-aware VMEM ceiling ----
    try:
        vmem_cap = int(pltpu.get_tpu_info().vmem_capacity_bytes)
    except Exception:
        vmem_cap = 64 * 1024 * 1024             # conservative (v7x per-TensorCore)
    vmem_cap = max(16 * 1024 * 1024, vmem_cap - 8 * 1024 * 1024)  # Mosaic scratch headroom

    vmem_est = (4 * dp * dg * itemsize                  # resident W_aug (single buffer)
                + 4 * dp * 4 + 128 * 4                  # biases
                + 4 * TB * dp * itemsize * 2            # h tiles, double buffered
                + TB * dp * out_itemsize * 2            # out tiles, double buffered
                + TB * dg * 4                           # f32 matmul accumulator
                + 4 * TB * dp * itemsize                # vs (matmul dtype)
                + TB * dp * 4 + 3 * TB * 128 * 4)       # fused + softmax temps
    vmem_limit = min(vmem_cap, max(32 * 1024 * 1024, int(1.25 * vmem_est)))

    flops = 2 * 4 * B_pad * dp * dg + 16 * B_pad * dp
    transcendentals = B_pad * (4 * dp + 128)
    bytes_accessed = (4 * B_pad * dp * itemsize         # h tiles
                      + 4 * dp * dg * itemsize          # resident W_aug
                      + B_pad * dp * out_itemsize)      # output

    out = pl.pallas_call(
        gmu_fusion_kernel,
        out_shape=jax.ShapeDtypeStruct((B_pad, dp), out_dtype),
        grid_spec=pltpu.PrefetchScalarGridSpec(
            num_scalar_prefetch=0,
            grid=grid,
            in_specs=[h_spec, h_spec, h_spec, h_spec,
                      resident((4, dp, dg)),   # fused [W | Wg] weights
                      resident((4, 1, dp)),    # biases
                      resident((1, 128))],     # gate bias / -1e30 lane mask
            out_specs=pl.BlockSpec((TB, dp), lambda i: (i, 0)),
        ),
        compiler_params=pltpu.CompilerParams(
            dimension_semantics=("parallel",),
            vmem_limit_bytes=vmem_limit,
        ),
        cost_estimate=pl.CostEstimate(
            flops=int(flops),
            transcendentals=int(transcendentals),
            bytes_accessed=int(bytes_accessed),
        ),
    )(*hs, w_aug, b, bg_pad)

    return out[:B, :d] if (B_pad != B or dp != d) else out


def init_params(key, d_model):
    """Deterministic synthetic init matching the PyTorch module's shapes."""
    k = jax.random.split(key, 10)
    bound = 1.0 / math.sqrt(d_model)
    gbound = 1.0 / math.sqrt(4 * d_model)
    W = jax.random.uniform(k[0], (4, d_model, d_model), jnp.float32, -bound, bound)
    b_lin = jax.random.uniform(k[1], (4, d_model), jnp.float32, -bound, bound)
    b_view = jnp.zeros((4, d_model), jnp.float32)   # nn.Parameter(torch.zeros(d))
    Wg = jax.random.uniform(k[2], (4 * d_model, 4), jnp.float32, -gbound, gbound)
    bg = jax.random.uniform(k[3], (4,), jnp.float32, -gbound, gbound)
    return {"W": W, "b_lin": b_lin, "b_view": b_view, "Wg": Wg, "bg": bg}


def reference_forward(h_list, params):
    """Pure-JAX transcription of the PyTorch forward (HIGHEST matmul precision)."""
    hp = jax.lax.Precision.HIGHEST
    z = jnp.concatenate(h_list, axis=-1)                              # (B, 4d)
    gate_logits = jnp.dot(z, params["Wg"], precision=hp) + params["bg"]
    alpha = jax.nn.softmax(gate_logits, axis=-1)
    vs = [jnp.tanh(jnp.dot(h_list[i], params["W"][i], precision=hp)
                   + params["b_lin"][i] + params["b_view"][i]) for i in range(4)]
    vs_stack = jnp.stack(vs, axis=1)                                  # (B, 4, d)
    return jnp.sum(alpha[..., None] * vs_stack, axis=1)               # (B, d)


if __name__ == "__main__":
    B, d_model = 8, 32
    key = jax.random.PRNGKey(0)
    kp, k1, k2, k3, k4 = jax.random.split(key, 5)

    params = init_params(kp, d_model)
    h_list = [jax.random.normal(k, (B, d_model), jnp.float32) for k in (k1, k2, k3, k4)]

    ref = reference_forward(h_list, params)

    # f32-operand run: validates the fused [W|Wg] / padded-lane algorithm.  Exact
    # softmax divide + HIGHEST matmul precision; tolerance leaves room only for
    # hardware transcendental (tanh/exp) approximation differences.
    packed_f32 = pack_gmu_params(params, matmul_dtype=jnp.float32)
    out_f32 = jax.block_until_ready(four_view_gmu_fusion(h_list, packed_f32))
    assert out_f32.shape == (B, d_model)
    assert jnp.allclose(out_f32, ref, atol=2e-4, rtol=2e-4), "f32 mismatch vs reference"

    # Default bf16-operand run (MXU-friendly): loose tolerance vs the f32 reference.
    packed_bf16 = pack_gmu_params(params, matmul_dtype=jnp.bfloat16)
    out = jax.block_until_ready(four_view_gmu_fusion(h_list, packed_bf16))
    assert out.shape == (B, d_model)
    assert jnp.allclose(out, ref, atol=5e-2, rtol=5e-2), "bf16 mismatch vs reference"

    print("KERNEL_OK")
</pallas_src>

<mosaic_0001>
module attributes {stable_mosaic.version = 11 : i64} {
  func.func @gmu_fusion_kernel(%arg0: i32, %arg1: memref<8x128xf32, #tpu.memory_space<vmem>>, %arg2: memref<8x128xf32, #tpu.memory_space<vmem>>, %arg3: memref<8x128xf32, #tpu.memory_space<vmem>>, %arg4: memref<8x128xf32, #tpu.memory_space<vmem>>, %arg5: memref<4x128x256xf32, #tpu.memory_space<vmem>>, %arg6: memref<4x1x128xf32, #tpu.memory_space<vmem>>, %arg7: memref<1x128xf32, #tpu.memory_space<vmem>>, %arg8: memref<8x128xf32, #tpu.memory_space<vmem>>) attributes {dimension_semantics = [#tpu.dimension_semantics<parallel>], iteration_bounds = array<i64: 1>, scalar_prefetch = 0 : i64, scratch_operands = 0 : i64, tpu.core_type = #tpu.core_type<tc>, window_params = [{transform_indices = @transform_0, window_bounds = array<i64: 8, 128>}, {transform_indices = @transform_1, window_bounds = array<i64: 8, 128>}, {transform_indices = @transform_2, window_bounds = array<i64: 8, 128>}, {transform_indices = @transform_3, window_bounds = array<i64: 8, 128>}, {pipeline_mode = #tpu.pipeline_mode<synchronous>, transform_indices = @transform_4, window_bounds = array<i64: 4, 128, 256>}, {pipeline_mode = #tpu.pipeline_mode<synchronous>, transform_indices = @transform_5, window_bounds = array<i64: 4, 1, 128>}, {pipeline_mode = #tpu.pipeline_mode<synchronous>, transform_indices = @transform_6, window_bounds = array<i64: 1, 128>}, {transform_indices = @transform_7, window_bounds = array<i64: 8, 128>}]} {
    %c0 = arith.constant 0 : index
    %c0_0 = arith.constant 0 : index
    %0 = vector.load %arg7[%c0, %c0_0] : memref<1x128xf32, #tpu.memory_space<vmem>>, vector<1x128xf32>
    %c0_1 = arith.constant 0 : index
    %c0_2 = arith.constant 0 : index
    %1 = vector.load %arg1[%c0_1, %c0_2] : memref<8x128xf32, #tpu.memory_space<vmem>>, vector<8x128xf32>
    %c0_3 = arith.constant 0 : index
    %c0_4 = arith.constant 0 : index
    %c0_5 = arith.constant 0 : index
    %2 = vector.load %arg5[%c0_3, %c0_4, %c0_5] : memref<4x128x256xf32, #tpu.memory_space<vmem>>, vector<1x128x256xf32>
    %3 = vector.shape_cast %2 : vector<1x128x256xf32> to vector<128x256xf32>
    %cst = arith.constant dense<0.000000e+00> : vector<8x256xf32>
    %4 = tpu.matmul %1, %3, %cst {dimension_numbers = #tpu.dot_dimension_numbers<[1], [0], [0], [1], [0, 0, 1, 1], [], []>, precision = #tpu.contract_precision<fp32>} : vector<8x128xf32>, vector<128x256xf32>, vector<8x256xf32> -> vector<8x256xf32>
    %5 = vector.extract_strided_slice %4 {offsets = [0, 0], sizes = [8, 128], strides = [1, 1]} : vector<8x256xf32> to vector<8x128xf32>
    %c0_6 = arith.constant 0 : index
    %c0_7 = arith.constant 0 : index
    %c0_8 = arith.constant 0 : index
    %6 = vector.load %arg6[%c0_6, %c0_7, %c0_8] : memref<4x1x128xf32, #tpu.memory_space<vmem>>, vector<1x1x128xf32>
    %7 = vector.shape_cast %6 : vector<1x1x128xf32> to vector<1x128xf32>
    %8 = vector.broadcast %7 : vector<1x128xf32> to vector<8x128xf32>
    %9 = arith.addf %5, %8 : vector<8x128xf32>
    %10 = math.tanh %9 : vector<8x128xf32>
    %11 = vector.extract_strided_slice %4 {offsets = [0, 128], sizes = [8, 128], strides = [1, 1]} : vector<8x256xf32> to vector<8x128xf32>
    %12 = vector.broadcast %0 : vector<1x128xf32> to vector<8x128xf32>
    %13 = arith.addf %12, %11 : vector<8x128xf32>
    %c0_9 = arith.constant 0 : index
    %c0_10 = arith.constant 0 : index
    %14 = vector.load %arg2[%c0_9, %c0_10] : memref<8x128xf32, #tpu.memory_space<vmem>>, vector<8x128xf32>
    %c1 = arith.constant 1 : index
    %c0_11 = arith.constant 0 : index
    %c0_12 = arith.constant 0 : index
    %15 = vector.load %arg5[%c1, %c0_11, %c0_12] : memref<4x128x256xf32, #tpu.memory_space<vmem>>, vector<1x128x256xf32>
    %16 = vector.shape_cast %15 : vector<1x128x256xf32> to vector<128x256xf32>
    %cst_13 = arith.constant dense<0.000000e+00> : vector<8x256xf32>
    %17 = tpu.matmul %14, %16, %cst_13 {dimension_numbers = #tpu.dot_dimension_numbers<[1], [0], [0], [1], [0, 0, 1, 1], [], []>, precision = #tpu.contract_precision<fp32>} : vector<8x128xf32>, vector<128x256xf32>, vector<8x256xf32> -> vector<8x256xf32>
    %18 = vector.extract_strided_slice %17 {offsets = [0, 0], sizes = [8, 128], strides = [1, 1]} : vector<8x256xf32> to vector<8x128xf32>
    %c1_14 = arith.constant 1 : index
    %c0_15 = arith.constant 0 : index
    %c0_16 = arith.constant 0 : index
    %19 = vector.load %arg6[%c1_14, %c0_15, %c0_16] : memref<4x1x128xf32, #tpu.memory_space<vmem>>, vector<1x1x128xf32>
    %20 = vector.shape_cast %19 : vector<1x1x128xf32> to vector<1x128xf32>
    %21 = vector.broadcast %20 : vector<1x128xf32> to vector<8x128xf32>
    %22 = arith.addf %18, %21 : vector<8x128xf32>
    %23 = math.tanh %22 : vector<8x128xf32>
    %24 = vector.extract_strided_slice %17 {offsets = [0, 128], sizes = [8, 128], strides = [1, 1]} : vector<8x256xf32> to vector<8x128xf32>
    %25 = arith.addf %13, %24 : vector<8x128xf32>
    %c0_17 = arith.constant 0 : index
    %c0_18 = arith.constant 0 : index
    %26 = vector.load %arg3[%c0_17, %c0_18] : memref<8x128xf32, #tpu.memory_space<vmem>>, vector<8x128xf32>
    %c2 = arith.constant 2 : index
    %c0_19 = arith.constant 0 : index
    %c0_20 = arith.constant 0 : index
    %27 = vector.load %arg5[%c2, %c0_19, %c0_20] : memref<4x128x256xf32, #tpu.memory_space<vmem>>, vector<1x128x256xf32>
    %28 = vector.shape_cast %27 : vector<1x128x256xf32> to vector<128x256xf32>
    %cst_21 = arith.constant dense<0.000000e+00> : vector<8x256xf32>
    %29 = tpu.matmul %26, %28, %cst_21 {dimension_numbers = #tpu.dot_dimension_numbers<[1], [0], [0], [1], [0, 0, 1, 1], [], []>, precision = #tpu.contract_precision<fp32>} : vector<8x128xf32>, vector<128x256xf32>, vector<8x256xf32> -> vector<8x256xf32>
    %30 = vector.extract_strided_slice %29 {offsets = [0, 0], sizes = [8, 128], strides = [1, 1]} : vector<8x256xf32> to vector<8x128xf32>
    %c2_22 = arith.constant 2 : index
    %c0_23 = arith.constant 0 : index
    %c0_24 = arith.constant 0 : index
    %31 = vector.load %arg6[%c2_22, %c0_23, %c0_24] : memref<4x1x128xf32, #tpu.memory_space<vmem>>, vector<1x1x128xf32>
    %32 = vector.shape_cast %31 : vector<1x1x128xf32> to vector<1x128xf32>
    %33 = vector.broadcast %32 : vector<1x128xf32> to vector<8x128xf32>
    %34 = arith.addf %30, %33 : vector<8x128xf32>
    %35 = math.tanh %34 : vector<8x128xf32>
    %36 = vector.extract_strided_slice %29 {offsets = [0, 128], sizes = [8, 128], strides = [1, 1]} : vector<8x256xf32> to vector<8x128xf32>
    %37 = arith.addf %25, %36 : vector<8x128xf32>
    %c0_25 = arith.constant 0 : index
    %c0_26 = arith.constant 0 : index
    %38 = vector.load %arg4[%c0_25, %c0_26] : memref<8x128xf32, #tpu.memory_space<vmem>>, vector<8x128xf32>
    %c3 = arith.constant 3 : index
    %c0_27 = arith.constant 0 : index
    %c0_28 = arith.constant 0 : index
    %39 = vector.load %arg5[%c3, %c0_27, %c0_28] : memref<4x128x256xf32, #tpu.memory_space<vmem>>, vector<1x128x256xf32>
    %40 = vector.shape_cast %39 : vector<1x128x256xf32> to vector<128x256xf32>
    %cst_29 = arith.constant dense<0.000000e+00> : vector<8x256xf32>
    %41 = tpu.matmul %38, %40, %cst_29 {dimension_numbers = #tpu.dot_dimension_numbers<[1], [0], [0], [1], [0, 0, 1, 1], [], []>, precision = #tpu.contract_precision<fp32>} : vector<8x128xf32>, vector<128x256xf32>, vector<8x256xf32> -> vector<8x256xf32>
    %42 = vector.extract_strided_slice %41 {offsets = [0, 0], sizes = [8, 128], strides = [1, 1]} : vector<8x256xf32> to vector<8x128xf32>
    %c3_30 = arith.constant 3 : index
    %c0_31 = arith.constant 0 : index
    %c0_32 = arith.constant 0 : index
    %43 = vector.load %arg6[%c3_30, %c0_31, %c0_32] : memref<4x1x128xf32, #tpu.memory_space<vmem>>, vector<1x1x128xf32>
    %44 = vector.shape_cast %43 : vector<1x1x128xf32> to vector<1x128xf32>
    %45 = vector.broadcast %44 : vector<1x128xf32> to vector<8x128xf32>
    %46 = arith.addf %42, %45 : vector<8x128xf32>
    %47 = math.tanh %46 : vector<8x128xf32>
    %48 = vector.extract_strided_slice %41 {offsets = [0, 128], sizes = [8, 128], strides = [1, 1]} : vector<8x256xf32> to vector<8x128xf32>
    %49 = arith.addf %37, %48 : vector<8x128xf32>
    %cst_33 = arith.constant dense<0xFF800000> : vector<8xf32>
    %50 = vector.multi_reduction <maximumf>, %49, %cst_33 [1] : vector<8x128xf32> to vector<8xf32>
    %51 = vector.shape_cast %50 : vector<8xf32> to vector<8x1xf32>
    %52 = vector.broadcast %51 : vector<8x1xf32> to vector<8x128xf32>
    %53 = arith.subf %49, %52 : vector<8x128xf32>
    %54 = math.exp %53 : vector<8x128xf32>
    %cst_34 = arith.constant dense<0.000000e+00> : vector<8xf32>
    %55 = vector.multi_reduction <add>, %54, %cst_34 [1] : vector<8x128xf32> to vector<8xf32>
    %56 = vector.shape_cast %55 : vector<8xf32> to vector<8x1xf32>
    %57 = vector.broadcast %56 : vector<8x1xf32> to vector<8x128xf32>
    %58 = arith.divf %54, %57 : vector<8x128xf32>
    %59 = vector.extract_strided_slice %58 {offsets = [0, 0], sizes = [8, 1], strides = [1, 1]} : vector<8x128xf32> to vector<8x1xf32>
    %60 = vector.broadcast %59 : vector<8x1xf32> to vector<8x128xf32>
    %61 = arith.mulf %60, %10 : vector<8x128xf32>
    %62 = vector.extract_strided_slice %58 {offsets = [0, 1], sizes = [8, 1], strides = [1, 1]} : vector<8x128xf32> to vector<8x1xf32>
    %63 = vector.broadcast %62 : vector<8x1xf32> to vector<8x128xf32>
    %64 = arith.mulf %63, %23 : vector<8x128xf32>
    %65 = arith.addf %61, %64 : vector<8x128xf32>
    %66 = vector.extract_strided_slice %58 {offsets = [0, 2], sizes = [8, 1], strides = [1, 1]} : vector<8x128xf32> to vector<8x1xf32>
    %67 = vector.broadcast %66 : vector<8x1xf32> to vector<8x128xf32>
    %68 = arith.mulf %67, %35 : vector<8x128xf32>
    %69 = arith.addf %65, %68 : vector<8x128xf32>
    %70 = vector.extract_strided_slice %58 {offsets = [0, 3], sizes = [8, 1], strides = [1, 1]} : vector<8x128xf32> to vector<8x1xf32>
    %71 = vector.broadcast %70 : vector<8x1xf32> to vector<8x128xf32>
    %72 = arith.mulf %71, %47 : vector<8x128xf32>
    %73 = arith.addf %69, %72 : vector<8x128xf32>
    %c0_35 = arith.constant 0 : index
    %c0_36 = arith.constant 0 : index
    %74 = vector.load %arg8[%c0_35, %c0_36] : memref<8x128xf32, #tpu.memory_space<vmem>>, vector<8x128xf32>
    tpu.vector_store %arg8[%c0_35, %c0_36], %73 {strides = array<i32>} : memref<8x128xf32, #tpu.memory_space<vmem>>, vector<8x128xf32>,
    return
  }
  func.func @transform_0(%arg0: i32) -> (i32, i32) {
    %c0_i32 = arith.constant 0 : i32
    %c0_i32_0 = arith.constant 0 : i32
    return %arg0, %c0_i32 : i32, i32
  }
  func.func @transform_1(%arg0: i32) -> (i32, i32) {
    %c0_i32 = arith.constant 0 : i32
    %c0_i32_0 = arith.constant 0 : i32
    return %arg0, %c0_i32 : i32, i32
  }
  func.func @transform_2(%arg0: i32) -> (i32, i32) {
    %c0_i32 = arith.constant 0 : i32
    %c0_i32_0 = arith.constant 0 : i32
    return %arg0, %c0_i32 : i32, i32
  }
  func.func @transform_3(%arg0: i32) -> (i32, i32) {
    %c0_i32 = arith.constant 0 : i32
    %c0_i32_0 = arith.constant 0 : i32
    return %arg0, %c0_i32 : i32, i32
  }
  func.func @transform_4(%arg0: i32) -> (i32, i32, i32) {
    %c0_i32 = arith.constant 0 : i32
    %c0_i32_0 = arith.constant 0 : i32
    %c0_i32_1 = arith.constant 0 : i32
    %c0_i32_2 = arith.constant 0 : i32
    return %c0_i32, %c0_i32_0, %c0_i32_1 : i32, i32, i32
  }
  func.func @transform_5(%arg0: i32) -> (i32, i32, i32) {
    %c0_i32 = arith.constant 0 : i32
    %c0_i32_0 = arith.constant 0 : i32
    %c0_i32_1 = arith.constant 0 : i32
    %c0_i32_2 = arith.constant 0 : i32
    return %c0_i32, %c0_i32_0, %c0_i32_1 : i32, i32, i32
  }
  func.func @transform_6(%arg0: i32) -> (i32, i32) {
    %c0_i32 = arith.constant 0 : i32
    %c0_i32_0 = arith.constant 0 : i32
    %c0_i32_1 = arith.constant 0 : i32
    return %c0_i32, %c0_i32_0 : i32, i32
  }
  func.func @transform_7(%arg0: i32) -> (i32, i32) {
    %c0_i32 = arith.constant 0 : i32
    %c0_i32_0 = arith.constant 0 : i32
    return %arg0, %c0_i32 : i32, i32
  }
}

</mosaic_0001>

<bundles_post_ra>
// kernel: tpu_custom_call.1
= control target key start
LH: loop header
LB: loop body
LE: loop exit
PB: predicated region body
PF: predicated region fallthrough
CT: control target
= control target key end

     0   :  { %12 = vsyncpa [#allocation3], 0  ;;  %s6629_s0 = inlined_call_operand.hbm [shape: f32[8,128], index: 0, kind: input, shape index: {}]   ;;  %s6630_s1 = inlined_call_operand.hbm [shape: f32[8,128], index: 1, kind: input, shape index: {}]   ;;  %s6631_s2 = inlined_call_operand.hbm [shape: f32[8,128], index: 2, kind: input, shape index: {}]   ;;  %s6632_s3 = inlined_call_operand.vmem [shape: f32[8,128], index: 3, kind: input, shape index: {}]   ;;  %s6633_s4 = inlined_call_operand.hbm [shape: f32[4,128,256], index: 4, kind: input, shape index: {}]   ;;  %s6634_s5 = inlined_call_operand.vmem [shape: f32[4,1,128], index: 5, kind: input, shape index: {}]   ;;  %s6635_s6 = inlined_call_operand.vmem [shape: f32[1,128], index: 6, kind: input, shape index: {}]   ;;  %s6636_s7 = inlined_call_operand.hbm [shape: f32[8,128], index: 7, kind: output, shape index: {}]  }
   0x1   :  { %13 = vsyncpa [#allocation6], 0 }
   0x2   :  { %14 = vsyncpa [#allocation9], 0 }
   0x3   :  { %15 = vsyncpa [#allocation4], 0  ;;  %s4695_s24 = smov [#allocation5]   ;;  %s4696_s26 = smov [#allocation2]  }
   0x4   :  { %s32_s25 = sshll.u32 %s4695_s24, 4  ;;  %s22_s27 = sshll.u32 %s4696_s26, 4  ;;  %s33_s25 = int_to_ptr.vmem [resolvable:$true] %s32_s25  ;;  %s23_s27 = int_to_ptr.vmem [resolvable:$true] %s22_s27 }
   0x5   :  { %s4577_s30 = scalar_lea.hbm %s6630_s1, 128 }
   0x6   :  { %p4578_p0 = scmp.ne.s32.totalorder %s6630_s1, %s4577_s30  ;;  %p4581_p1 = scmp.lt.u32.totalorder %s4577_s30, %s6630_s1 }
   0x8   :  { %p4583_p2 = pnand %p4581_p1, %p4578_p0 }
   0xa   :  { %4586 = shalt.err (!%p4583_p2)
}
   0xb   :  { %s4587_s12 = scalar_lea.vmem %s33_s25, 128  ;;  %p4592_p4 = scmp.lt.s32.totalorder %s33_s25, %s33_s25 }
   0xc   :  { %p4588_p3 = scmp.ne.s32.totalorder %s33_s25, %s4587_s12  ;;  %p4593_p5 = scmp.lt.s32.totalorder %s4587_s12, %s4587_s12 }
   0xe   :  { %p4594_p6 = por %p4593_p5, %p4592_p4 }
  0x10   :  { %p4595_p7 = pnand %p4594_p6, %p4588_p3 }
  0x12   :  { %4598 = shalt.err (!%p4595_p7)
}
  0x13   :  { %35 = dma.hbm_to_vmem [thread:$0]  %s6630_s1, 128, %s33_s25, [#allocation6]  }
  0x14   :  { %s4599_s17 = scalar_lea.hbm %s6629_s0, 128 }
  0x15   :  { %p4600_p8 = scmp.ne.s32.totalorder %s6629_s0, %s4599_s17  ;;  %p4603_p9 = scmp.lt.u32.totalorder %s4599_s17, %s6629_s0 }
  0x17   :  { %p4605_p10 = pnand %p4603_p9, %p4600_p8 }
  0x19   :  { %4608 = shalt.err (!%p4605_p10)
}
  0x1a   :  { %s4609_s22 = scalar_lea.vmem %s23_s27, 128  ;;  %p4614_p12 = scmp.lt.s32.totalorder %s23_s27, %s23_s27 }
  0x1b   :  { %p4610_p11 = scmp.ne.s32.totalorder %s23_s27, %s4609_s22  ;;  %p4615_p13 = scmp.lt.s32.totalorder %s4609_s22, %s4609_s22 }
  0x1d   :  { %p4616_p0 = por %p4615_p13, %p4614_p12 }
  0x1f   :  { %p4617_p1 = pnand %p4616_p0, %p4610_p11 }
  0x21   :  { %4620 = shalt.err (!%p4617_p1)
}
  0x22   :  { %25 = dma.hbm_to_vmem [thread:$0]  %s6629_s0, 128, %s23_s27, [#allocation3]  }
  0x23   :  { %s4697_s24 = smov [#allocation7]   ;;  %s4698_s26 = smov [#allocation8]  }
  0x24   :  { %s42_s25 = sshll.u32 %s4697_s24, 4  ;;  %s53_s28 = sshll.u32 %s4698_s26, 4  ;;  %s43_s25 = int_to_ptr.vmem [resolvable:$true] %s42_s25  ;;  %s4771_s28 = int_to_ptr.vmem [resolvable:$true] %s53_s28 }
  0x25   :  { %s4621_s8 = scalar_lea.hbm %s6631_s2, 128 }
  0x26   :  { %p4622_p2 = scmp.ne.s32.totalorder %s6631_s2, %s4621_s8  ;;  %p4625_p3 = scmp.lt.u32.totalorder %s4621_s8, %s6631_s2 }
  0x28   :  { %p4627_p4 = pnand %p4625_p3, %p4622_p2 }
  0x2a   :  { %4630 = shalt.err (!%p4627_p4)
}
  0x2b   :  { %s4631_s0 = scalar_lea.vmem %s43_s25, 128  ;;  %p4636_p6 = scmp.lt.s32.totalorder %s43_s25, %s43_s25 }
  0x2c   :  { %p4632_p5 = scmp.ne.s32.totalorder %s43_s25, %s4631_s0  ;;  %p4637_p7 = scmp.lt.s32.totalorder %s4631_s0, %s4631_s0 }
  0x2e   :  { %p4638_p8 = por %p4637_p7, %p4636_p6 }
  0x30   :  { %p4639_p9 = pnand %p4638_p8, %p4632_p5 }
  0x32   :  { %4642 = shalt.err (!%p4639_p9)
}
  0x33   :  { %45 = dma.hbm_to_vmem [thread:$0]  %s6631_s2, 128, %s43_s25, [#allocation6]  }
  0x34   :  { %s4643_s16 = scalar_lea.hbm %s6633_s4, 16384 }
  0x35   :  { %p4644_p10 = scmp.ne.s32.totalorder %s6633_s4, %s4643_s16  ;;  %p4647_p11 = scmp.lt.u32.totalorder %s4643_s16, %s6633_s4 }
  0x37   :  { %p4649_p12 = pnand %p4647_p11, %p4644_p10 }
  0x39   :  { %4652 = shalt.err (!%p4649_p12)
}
  0x3a   :  { %s4653_s21 = scalar_lea.vmem %s4771_s28, 16384  ;;  %p4658_p0 = scmp.lt.s32.totalorder %s4771_s28, %s4771_s28 }
  0x3b   :  { %p4654_p13 = scmp.ne.s32.totalorder %s4771_s28, %s4653_s21  ;;  %p4659_p1 = scmp.lt.s32.totalorder %s4653_s21, %s4653_s21 }
  0x3d   :  { %p4660_p2 = por %p4659_p1, %p4658_p0 }
  0x3f   :  { %p4661_p3 = pnand %p4660_p2, %p4654_p13 }
  0x41   :  { %4664 = shalt.err (!%p4661_p3)
}
  0x42   :  { %s4699_s2 = smov 256   ;;  %s4700_s22 = smov 16  }
  0x43   :  { %59 = dma.hbm_to_vmem [thread:$0]  %s6633_s4, 16384, %s4771_s28, [#allocation9], %s4699_s2, %s4699_s2, %s4700_s22  }
  0x44   :  { %4687 = dma.done.wait [#allocation3], 128  }
  0x45   :  { %4688 = vsyncadd [#allocation3], 4294967168 }
  0x46   :  { %4689 = dma.done.wait [#allocation6], 256  }
  0x47   :  { %4690 = vsyncadd [#allocation6], 4294967040 }
  0x48   :  { %4691 = dma.done.wait [#allocation9], 16384  }
  0x49   :  { %4692 = vsyncadd [#allocation9], 4294950912  ;;  %v6637_v0 = vmov 0.0   ;;  %v79_v1 = vld [vmem:[#allocation8 + $0x8] sm:$0xff]  ;;  %v81_v2 = vld [vmem:[#allocation8 + $0x18] sm:$0xff]  ;;  %s4706_s11 = smov [#allocation10]  }
  0x4a   :  { %206 = vmatprep.mubr.f32.mxu0 %v6637_v0  ;;  %1111 = vmatprep.mubr.f32.mxu1 %v6637_v0  ;;  %v984_v3 = vld [vmem:[#allocation8 + $0x108] sm:$0xff]  ;;  %v110_v4 = vand.u32 4294901760, %v79_v1  ;;  %v114_v5 = vand.u32 4294901760, %v81_v2  ;;  %v986_v6 = vld [vmem:[#allocation8 + $0x118] sm:$0xff]  ;;  %v78_v8 = vld [vmem:[#allocation8] sm:$0xff] }
  0x4b   :  { %v1015_v7 = vand.u32 4294901760, %v984_v3  ;;  %v80_v9 = vld [vmem:[#allocation8 + $0x10] sm:$0xff]  ;;  %v1019_v10 = vand.u32 4294901760, %v986_v6  ;;  %v112_v11 = vand.u32 4294901760, %v78_v8  ;;  %v983_v13 = vld [vmem:[#allocation8 + $0x100] sm:$0xff]  ;;  %v83_v15 = vld [vmem:[#allocation8 + $0x28] sm:$0xff] }
  0x4c   :  { %v116_v12 = vand.u32 4294901760, %v80_v9  ;;  %v985_v14 = vld [vmem:[#allocation8 + $0x110] sm:$0xff]  ;;  %v4804_v16 = vpack.c.bf16 %v114_v5, %v110_v4  ;;  %v4806_v17 = vsub.f32 %v79_v1, %v110_v4  ;;  %v4808_v18 = vsub.f32 %v81_v2, %v114_v5  ;;  %v85_v20 = vld [vmem:[#allocation8 + $0x38] sm:$0xff]  ;;  %v988_v21 = vld [vmem:[#allocation8 + $0x128] sm:$0xff] }
  0x4d   :  { %v4810_v19 = vsub.f32 %v984_v3, %v1015_v7  ;;  %v990_v22 = vld [vmem:[#allocation8 + $0x138] sm:$0xff]  ;;  %v4812_v23 = vpack.c.bf16 %v1019_v10, %v1015_v7  ;;  %v4814_v24 = vsub.f32 %v986_v6, %v1019_v10  ;;  %v4818_v26 = vsub.f32 %v78_v8, %v112_v11  ;;  %v82_v27 = vld [vmem:[#allocation8 + $0x20] sm:$0xff]  ;;  %v84_v32 = vld [vmem:[#allocation8 + $0x30] sm:$0xff] }
  0x4e   :  { %6965 = vst [vmem:[#allocation15_spill] sm:$0xff] %v4804_v16  ;;  %6966 = vst [vmem:[#allocation16_spill] sm:$0xff] %v4806_v17  ;;  %v4816_v25 = vpack.c.bf16 %v116_v12, %v112_v11  ;;  %3741 = vmatprep.subr.bf16.mxu0 %v4804_v16  ;;  %v4821_v28 = vsub.f32 %v80_v9, %v116_v12  ;;  %v1017_v29 = vand.u32 4294901760, %v983_v13  ;;  %v1021_v30 = vand.u32 4294901760, %v985_v14  ;;  %v987_v37 = vld [vmem:[#allocation8 + $0x120] sm:$0xff]  ;;  %v989_v38 = vld [vmem:[#allocation8 + $0x130] sm:$0xff] }
  0x4f   :  { %6967 = vst [vmem:[#allocation17_spill] sm:$0xff] %v4808_v18  ;;  %6968 = vst [vmem:[#allocation18_spill] sm:$0xff] %v4810_v19  ;;  %v118_v31 = vand.u32 4294901760, %v83_v15  ;;  %3933 = vmatprep.subr.bf16.mxu1 %v4812_v23  ;;  %v122_v33 = vand.u32 4294901760, %v85_v20  ;;  %v1023_v34 = vand.u32 4294901760, %v988_v21  ;;  %v1027_v35 = vand.u32 4294901760, %v990_v22 }
  0x50   :  { %6969 = vst [vmem:[#allocation19_spill] sm:$0xff] %v4812_v23  ;;  %6970 = vst [vmem:[#allocation20_spill] sm:$0xff] %v4814_v24  ;;  %3743 = vmatpush1.bf16.msra.mxu0 %v4816_v25  ;;  %v120_v36 = vand.u32 4294901760, %v82_v27  ;;  %v4825_v39 = vpack.c.bf16 %v1021_v30, %v1017_v29  ;;  %v4827_v40 = vsub.f32 %v983_v13, %v1017_v29  ;;  %v87_v43 = vld [vmem:[#allocation8 + $0x48] sm:$0xff]  ;;  %v89_v44 = vld [vmem:[#allocation8 + $0x58] sm:$0xff]  ;;  %v124_v52 = vand.u32 4294901760, %v84_v32 }
  0x51   :  { %6971 = vst [vmem:[#allocation21_spill] sm:$0xff] %v4816_v25  ;;  %v4829_v41 = vsub.f32 %v985_v14, %v1021_v30  ;;  %v4831_v42 = vsub.f32 %v83_v15, %v118_v31  ;;  %v992_v45 = vld [vmem:[#allocation8 + $0x148] sm:$0xff]  ;;  %v4833_v46 = vpack.c.bf16 %v122_v33, %v118_v31  ;;  %v4835_v47 = vsub.f32 %v85_v20, %v122_v33  ;;  %v994_v50 = vld [vmem:[#allocation8 + $0x158] sm:$0xff]  ;;  %v86_v59 = vld [vmem:[#allocation8 + $0x40] sm:$0xff] }
  0x52   :  { %6972 = vst [vmem:[#allocation22_spill] sm:$0xff] %v4825_v39  ;;  %v4837_v48 = vpack.c.bf16 %v1027_v35, %v1023_v34  ;;  %v4839_v49 = vsub.f32 %v988_v21, %v1023_v34  ;;  %3935 = vmatpush1.bf16.msra.mxu1 %v4825_v39  ;;  %v4842_v51 = vsub.f32 %v990_v22, %v1027_v35  ;;  %v1025_v54 = vand.u32 4294901760, %v987_v37  ;;  %v88_v60 = vld [vmem:[#allocation8 + $0x50] sm:$0xff]  ;;  %v991_v2 = vld [vmem:[#allocation8 + $0x140] sm:$0xff]  ;;  %v91_v4 = vld [vmem:[#allocation8 + $0x68] sm:$0xff] }
  0x53   :  { %6973 = vst [vmem:[#allocation23_spill] sm:$0xff] %v4833_v46  ;;  %v4844_v53 = vsub.f32 %v82_v27, %v120_v36  ;;  %3745 = vmatprep.subr.bf16.mxu0 %v4833_v46  ;;  %v1029_v55 = vand.u32 4294901760, %v989_v38  ;;  %v126_v56 = vand.u32 4294901760, %v87_v43  ;;  %v130_v57 = vand.u32 4294901760, %v89_v44  ;;  %v993_v3 = vld [vmem:[#allocation8 + $0x150] sm:$0xff]  ;;  %v93_v9 = vld [vmem:[#allocation8 + $0x78] sm:$0xff] }
  0x54   :  { %6974 = vst [vmem:[#allocation24_spill] sm:$0xff] %v4837_v48  ;;  %3937 = vmatprep.subr.bf16.mxu1 %v4837_v48  ;;  %v1031_v58 = vand.u32 4294901760, %v992_v45  ;;  %v4848_v61 = vpack.c.bf16 %v124_v52, %v120_v36  ;;  %v4850_v62 = vsub.f32 %v84_v32, %v124_v52  ;;  %v4852_v63 = vsub.f32 %v987_v37, %v1025_v54  ;;  %v996_v10 = vld [vmem:[#allocation8 + $0x168] sm:$0xff]  ;;  %v998_v11 = vld [vmem:[#allocation8 + $0x178] sm:$0xff]  ;;  %v90_v33 = vld [vmem:[#allocation8 + $0x60] sm:$0xff] }
  0x55   :  { %v1035_v1 = vand.u32 4294901760, %v994_v50  ;;  %v4854_v5 = vpack.c.bf16 %v1029_v55, %v1025_v54  ;;  %v4856_v6 = vsub.f32 %v989_v38, %v1029_v55  ;;  %v4858_v7 = vpack.c.bf16 %v130_v57, %v126_v56  ;;  %v92_v38 = vld [vmem:[#allocation8 + $0x70] sm:$0xff]  ;;  %v95_v55 = vld [vmem:[#allocation8 + $0x88] sm:$0xff]  ;;  %v1003_v46 = vld [vmem:[#allocation8 + $0x1a0] sm:$0xff] }
  0x56   :  { %6975 = vst [vmem:[#allocation25_spill] sm:$0xff] %v4848_v61  ;;  %v4860_v8 = vsub.f32 %v87_v43, %v126_v56  ;;  %3747 = vmatpush1.bf16.msra.mxu0 %v4848_v61  ;;  %v4863_v12 = vsub.f32 %v89_v44, %v130_v57  ;;  %v4867_v14 = vsub.f32 %v992_v45, %v1031_v58  ;;  %v128_v20 = vand.u32 4294901760, %v86_v59  ;;  %v995_v43 = vld [vmem:[#allocation8 + $0x160] sm:$0xff]  ;;  %v997_v44 = vld [vmem:[#allocation8 + $0x170] sm:$0xff]  ;;  %v97_v56 = vld [vmem:[#allocation8 + $0x98] sm:$0xff] }
  0x57   :  { %6976 = vst [vmem:[#allocation26_spill] sm:$0xff] %v4854_v5  ;;  %6977 = vst [vmem:[#allocation27_spill] sm:$0xff] %v4858_v7  ;;  %v4865_v13 = vpack.c.bf16 %v1035_v1, %v1031_v58  ;;  %v4869_v15 = vsub.f32 %v994_v50, %v1035_v1  ;;  %3939 = vmatpush1.bf16.msra.mxu1 %v4854_v5  ;;  %3749 = vmatprep.subr.bf16.mxu0 %v4858_v7  ;;  %v132_v21 = vand.u32 4294901760, %v88_v60  ;;  %v1000_v57 = vld [vmem:[#allocation8 + $0x188] sm:$0xff]  ;;  %v96_v0 = vld [vmem:[#allocation8 + $0x90] sm:$0xff] }
  0x58   :  { %v1033_v22 = vand.u32 4294901760, %v991_v2  ;;  %v1037_v27 = vand.u32 4294901760, %v993_v3  ;;  %v134_v29 = vand.u32 4294901760, %v91_v4  ;;  %v138_v30 = vand.u32 4294901760, %v93_v9  ;;  %v1004_v48 = vld [vmem:[#allocation8 + $0x1a8] sm:$0xff]  ;;  %v1005_v16 = vld [vmem:[#allocation8 + $0x1b0] sm:$0xff] }
  0x59   :  { %6978 = vst [vmem:[#allocation28_spill] sm:$0xff] %v4865_v13  ;;  %3941 = vmatprep.subr.bf16.mxu1 %v4865_v13  ;;  %v1039_v31 = vand.u32 4294901760, %v996_v10  ;;  %v1043_v32 = vand.u32 4294901760, %v998_v11  ;;  %v4874_v34 = vpack.c.bf16 %v132_v21, %v128_v20  ;;  %v4876_v35 = vsub.f32 %v86_v59, %v128_v20  ;;  %v101_v13 = vld [vmem:[#allocation8 + $0xb8] sm:$0xff] }
  0x5a   :  { %v4878_v36 = vsub.f32 %v88_v60, %v132_v21  ;;  %v4880_v37 = vpack.c.bf16 %v1037_v27, %v1033_v22  ;;  %v4882_v45 = vsub.f32 %v991_v2, %v1033_v22  ;;  %v4884_v50 = vsub.f32 %v993_v3, %v1037_v27  ;;  %v1002_v21 = vld [vmem:[#allocation8 + $0x198] sm:$0xff] }
  0x5b   :  { %6979 = vst [vmem:[#allocation29_spill] sm:$0xff] %v4874_v34  ;;  %v4886_v52 = vpack.c.bf16 %v138_v30, %v134_v29  ;;  %v4888_v54 = vsub.f32 %v91_v4, %v134_v29  ;;  %3751 = vmatpush1.bf16.msra.mxu0 %v4874_v34  ;;  %v4892_v58 = vsub.f32 %v93_v9, %v138_v30  ;;  %v136_v1 = vand.u32 4294901760, %v90_v33  ;;  %v94_v30 = vld [vmem:[#allocation8 + $0x80] sm:$0xff]  ;;  %v99_v34 = vld [vmem:[#allocation8 + $0xa8] sm:$0xff] }
  0x5c   :  { %6980 = vst [vmem:[#allocation30_spill] sm:$0xff] %v4880_v37  ;;  %3943 = vmatpush1.bf16.msra.mxu1 %v4880_v37  ;;  %v4894_v59 = vpack.c.bf16 %v1043_v32, %v1039_v31  ;;  %v4896_v60 = vsub.f32 %v996_v10, %v1039_v31  ;;  %v4899_v2 = vsub.f32 %v998_v11, %v1043_v32  ;;  %v140_v3 = vand.u32 4294901760, %v92_v38  ;;  %v999_v10 = vld [vmem:[#allocation8 + $0x180] sm:$0xff] }
  0x5d   :  { %6981 = vst [vmem:[#allocation31_spill] sm:$0xff] %v4886_v52  ;;  %3753 = vmatprep.subr.bf16.mxu0 %v4886_v52  ;;  %v1041_v4 = vand.u32 4294901760, %v995_v43  ;;  %v1045_v20 = vand.u32 4294901760, %v997_v44  ;;  %v4902_v22 = vsub.f32 %v90_v33, %v136_v1  ;;  %v142_v27 = vand.u32 4294901760, %v95_v55  ;;  %v1001_v52 = vld [vmem:[#allocation8 + $0x190] sm:$0xff] }
  0x5e   :  { %6982 = vst [vmem:[#allocation32_spill] sm:$0xff] %v4894_v59  ;;  %3945 = vmatprep.subr.bf16.mxu1 %v4894_v59  ;;  %v146_v9 = vand.u32 4294901760, %v97_v56  ;;  %v1047_v29 = vand.u32 4294901760, %v1000_v57  ;;  %v4904_v31 = vpack.c.bf16 %v140_v3, %v136_v1  ;;  %v4906_v37 = vsub.f32 %v92_v38, %v140_v3 }
  0x5f   :  { %v4908_v11 = vpack.c.bf16 %v1045_v20, %v1041_v4  ;;  %v4910_v32 = vsub.f32 %v995_v43, %v1041_v4  ;;  %v4912_v59 = vsub.f32 %v997_v44, %v1045_v20  ;;  %v4916_v7 = vsub.f32 %v95_v55, %v142_v27  ;;  %v1006_v55 = vld [vmem:[#allocation8 + $0x1b8] sm:$0xff] }
  0x60   :  { %6983 = vst [vmem:[#allocation33_spill] sm:$0xff] %v4904_v31  ;;  %6984 = vst [vmem:[#allocation34_spill] sm:$0xff] %v4906_v37  ;;  %v4914_v33 = vpack.c.bf16 %v146_v9, %v142_v27  ;;  %v4918_v5 = vsub.f32 %v97_v56, %v146_v9  ;;  %3755 = vmatpush1.bf16.msra.mxu0 %v4904_v31  ;;  %v1051_v38 = vand.u32 4294901760, %v1002_v21  ;;  %v144_v43 = vand.u32 4294901760, %v94_v30  ;;  %v100_v31 = vld [vmem:[#allocation8 + $0xb0] sm:$0xff] }
  0x61   :  { %6985 = vst [vmem:[#allocation35_spill] sm:$0xff] %v4908_v11  ;;  %6986 = vst [vmem:[#allocation36_spill] sm:$0xff] %v4910_v32  ;;  %3947 = vmatpush1.bf16.msra.mxu1 %v4908_v11  ;;  %v4922_v1 = vsub.f32 %v1000_v57, %v1047_v29  ;;  %v148_v3 = vand.u32 4294901760, %v96_v0  ;;  %v1049_v4 = vand.u32 4294901760, %v999_v10  ;;  %v1053_v44 = vand.u32 4294901760, %v1001_v52  ;;  %v98_v57 = vld [vmem:[#allocation8 + $0xa0] sm:$0xff] }
  0x62   :  { %6987 = vst [vmem:[#allocation37_spill] sm:$0xff] %v4912_v59  ;;  %6988 = vst [vmem:[#allocation38_spill] sm:$0xff] %v4914_v33  ;;  %3757 = vmatprep.subr.bf16.mxu0 %v4914_v33  ;;  %v150_v20 = vand.u32 4294901760, %v99_v34  ;;  %v154_v61 = vand.u32 4294901760, %v101_v13  ;;  %v4925_v27 = vpack.c.bf16 %v1051_v38, %v1047_v29  ;;  %v4927_v56 = vsub.f32 %v1002_v21, %v1051_v38  ;;  %v103_v29 = vld [vmem:[#allocation8 + $0xc8] sm:$0xff] }
  0x63   :  { %6989 = vst [vmem:[#allocation39_spill] sm:$0xff] %v4918_v5  ;;  %6990 = vst [vmem:[#allocation40_spill] sm:$0xff] %v4922_v1  ;;  %v4929_v9 = vpack.c.bf16 %v148_v3, %v144_v43  ;;  %v4931_v11 = vsub.f32 %v94_v30, %v144_v43  ;;  %v4933_v39 = vsub.f32 %v96_v0, %v148_v3  ;;  %v105_v1 = vld [vmem:[#allocation8 + $0xd8] sm:$0xff]  ;;  %v1055_v0 = vand.u32 4294901760, %v1004_v48 }
  0x64   :  { %6991 = vst [vmem:[#allocation41_spill] sm:$0xff] %v4925_v27  ;;  %6992 = vst [vmem:[#allocation42_spill] sm:$0xff] %v4927_v56  ;;  %v4935_v33 = vpack.c.bf16 %v1053_v44, %v1049_v4  ;;  %v4937_v25 = vsub.f32 %v999_v10, %v1049_v4  ;;  %v4939_v23 = vsub.f32 %v1001_v52, %v1053_v44  ;;  %3949 = vmatprep.subr.bf16.mxu1 %v4925_v27  ;;  %v109_v56 = vld [vmem:[#allocation8 + $0xf8] sm:$0xff] }
  0x65   :  { %6993 = vst [vmem:[#allocation43_spill] sm:$0xff] %v4929_v9  ;;  %6994 = vst [vmem:[#allocation44_spill] sm:$0xff] %v4931_v11  ;;  %3759 = vmatpush1.bf16.msra.mxu0 %v4929_v9  ;;  %v4943_v21 = vpack.c.bf16 %v154_v61, %v150_v20  ;;  %v4945_v30 = vsub.f32 %v99_v34, %v150_v20  ;;  %v4947_v38 = vsub.f32 %v101_v13, %v154_v61  ;;  %v1009_v11 = vld [vmem:[#allocation8 + $0x1d0] sm:$0xff] }
  0x66   :  { %6995 = vst [vmem:[#allocation45_spill] sm:$0xff] %v4933_v39  ;;  %6996 = vst [vmem:[#allocation46_spill] sm:$0xff] %v4935_v33  ;;  %3951 = vmatpush1.bf16.msra.mxu1 %v4935_v33  ;;  %v1059_v10 = vand.u32 4294901760, %v1006_v55  ;;  %v152_v43 = vand.u32 4294901760, %v98_v57  ;;  %v156_v52 = vand.u32 4294901760, %v100_v31  ;;  %v1057_v3 = vand.u32 4294901760, %v1003_v46 }
  0x67   :  { %6997 = vst [vmem:[#allocation47_spill] sm:$0xff] %v4937_v25  ;;  %6998 = vst [vmem:[#allocation48_spill] sm:$0xff] %v4939_v23  ;;  %3761 = vmatprep.subr.bf16.mxu0 %v4943_v21  ;;  %v4951_v4 = vsub.f32 %v1004_v48, %v1055_v0  ;;  %v1061_v44 = vand.u32 4294901760, %v1005_v16  ;;  %v158_v27 = vand.u32 4294901760, %v103_v29  ;;  %v162_v9 = vand.u32 4294901760, %v105_v1  ;;  %v1008_v23 = vld [vmem:[#allocation8 + $0x1c8] sm:$0xff] }
  0x68   :  { %6999 = vst [vmem:[#allocation49_spill] sm:$0xff] %v4943_v21  ;;  %7000 = vst [vmem:[#allocation50_spill] sm:$0xff] %v4945_v30  ;;  %v1010_v25 = vld [vmem:[#allocation8 + $0x1d8] sm:$0xff]  ;;  %v4953_v34 = vpack.c.bf16 %v1059_v10, %v1055_v0  ;;  %v4955_v61 = vsub.f32 %v1006_v55, %v1059_v10  ;;  %v4957_v13 = vpack.c.bf16 %v156_v52, %v152_v43  ;;  %v102_v33 = vld [vmem:[#allocation8 + $0xc0] sm:$0xff] }
  0x69   :  { %7001 = vst [vmem:[#allocation51_spill] sm:$0xff] %v4947_v38  ;;  %7002 = vst [vmem:[#allocation52_spill] sm:$0xff] %v4951_v4  ;;  %v4959_v20 = vsub.f32 %v98_v57, %v152_v43  ;;  %v104_v38 = vld [vmem:[#allocation8 + $0xd0] sm:$0xff]  ;;  %v1007_v30 = vld [vmem:[#allocation8 + $0x1c0] sm:$0xff]  ;;  %v4961_v39 = vsub.f32 %v100_v31, %v156_v52  ;;  %v4963_v48 = vpack.c.bf16 %v1061_v44, %v1057_v3  ;;  %v1063_v31 = vand.u32 4294901760, %v1008_v23 }
  0x6a   :  { %7003 = vst [vmem:[#allocation53_spill] sm:$0xff] %v4953_v34  ;;  %7004 = vst [vmem:[#allocation54_spill] sm:$0xff] %v4955_v61  ;;  %v4965_v21 = vsub.f32 %v1003_v46, %v1057_v3  ;;  %v4967_v4 = vsub.f32 %v1005_v16, %v1061_v44  ;;  %v107_v0 = vld [vmem:[#allocation8 + $0xe8] sm:$0xff]  ;;  %3953 = vmatprep.subr.bf16.mxu1 %v4953_v34  ;;  %3763 = vmatpush1.bf16.msra.mxu0 %v4957_v13  ;;  %v1067_v46 = vand.u32 4294901760, %v1010_v25 }
  0x6b   :  { %7005 = vst [vmem:[#allocation55_spill] sm:$0xff] %v4957_v13  ;;  %7006 = vst [vmem:[#allocation56_spill] sm:$0xff] %v4959_v20  ;;  %v4971_v55 = vpack.c.bf16 %v162_v9, %v158_v27  ;;  %v4973_v57 = vsub.f32 %v103_v29, %v158_v27  ;;  %v4975_v10 = vsub.f32 %v105_v1, %v162_v9  ;;  %3955 = vmatpush1.bf16.msra.mxu1 %v4963_v48  ;;  %v1013_v20 = vld [vmem:[#allocation8 + $0x1f0] sm:$0xff] }
  0x6c   :  { %7007 = vst [vmem:[#allocation57_spill] sm:$0xff] %v4961_v39  ;;  %7008 = vst [vmem:[#allocation58_spill] sm:$0xff] %v4963_v48  ;;  %v160_v43 = vand.u32 4294901760, %v102_v33  ;;  %v164_v16 = vand.u32 4294901760, %v104_v38  ;;  %v1065_v52 = vand.u32 4294901760, %v1007_v30  ;;  %v4979_v3 = vsub.f32 %v1008_v23, %v1063_v31  ;;  %v106_v48 = vld [vmem:[#allocation8 + $0xe0] sm:$0xff] }
  0x6d   :  { %7009 = vst [vmem:[#allocation59_spill] sm:$0xff] %v4965_v21  ;;  %7010 = vst [vmem:[#allocation60_spill] sm:$0xff] %v4967_v4  ;;  %3765 = vmatprep.subr.bf16.mxu0 %v4971_v55  ;;  %v1069_v44 = vand.u32 4294901760, %v1009_v11  ;;  %v166_v34 = vand.u32 4294901760, %v107_v0  ;;  %v170_v13 = vand.u32 4294901760, %v109_v56  ;;  %v1012_v4 = vld [vmem:[#allocation8 + $0x1e8] sm:$0xff]  ;;  %v4981_v27 = vpack.c.bf16 %v1067_v46, %v1063_v31 }
  0x6e   :  { %7011 = vst [vmem:[#allocation61_spill] sm:$0xff] %v4971_v55  ;;  %7012 = vst [vmem:[#allocation62_spill] sm:$0xff] %v4973_v57  ;;  %v1014_v21 = vld [vmem:[#allocation8 + $0x1f8] sm:$0xff]  ;;  %v4983_v1 = vsub.f32 %v1010_v25, %v1067_v46  ;;  %v4985_v9 = vpack.c.bf16 %v164_v16, %v160_v43  ;;  %v4987_v29 = vsub.f32 %v102_v33, %v160_v43  ;;  %v1011_v57 = vld [vmem:[#allocation8 + $0x1e0] sm:$0xff]  ;;  %v1071_v46 = vand.u32 4294901760, %v1012_v4 }
  0x6f   :  { %7013 = vst [vmem:[#allocation63_spill] sm:$0xff] %v4975_v10  ;;  %7014 = vst [vmem:[#allocation64_spill] sm:$0xff] %v4979_v3  ;;  %v108_v10 = vld [vmem:[#allocation8 + $0xf0] sm:$0xff]  ;;  %v4989_v39 = vsub.f32 %v104_v38, %v164_v16  ;;  %v4991_v23 = vpack.c.bf16 %v1069_v44, %v1065_v52  ;;  %v4993_v55 = vsub.f32 %v1007_v30, %v1065_v52  ;;  %3957 = vmatprep.subr.bf16.mxu1 %v4981_v27 }
  0x70   :  { %7015 = vst [vmem:[#allocation65_spill] sm:$0xff] %v4981_v27  ;;  %7016 = vst [vmem:[#allocation66_spill] sm:$0xff] %v4985_v9  ;;  %v4995_v3 = vsub.f32 %v1009_v11, %v1069_v44  ;;  %3767 = vmatpush1.bf16.msra.mxu0 %v4985_v9  ;;  %v4999_v25 = vpack.c.bf16 %v170_v13, %v166_v34  ;;  %v5001_v33 = vsub.f32 %v107_v0, %v166_v34  ;;  %v981_v27 = vld [vmem:[#allocation5] sm:$0xff] }
  0x71   :  { %7017 = vst [vmem:[#allocation67_spill] sm:$0xff] %v4987_v29  ;;  %7018 = vst [vmem:[#allocation68_spill] sm:$0xff] %v4991_v23  ;;  %v5003_v31 = vsub.f32 %v109_v56, %v170_v13  ;;  %3959 = vmatpush1.bf16.msra.mxu1 %v4991_v23  ;;  %v1075_v38 = vand.u32 4294901760, %v1014_v21  ;;  %v168_v43 = vand.u32 4294901760, %v106_v48  ;;  %v172_v30 = vand.u32 4294901760, %v108_v10  ;;  %v77_v23 = vld [vmem:[#allocation2] sm:$0xff] }
  0x72   :  { %7019 = vst [vmem:[#allocation69_spill] sm:$0xff] %v4999_v25  ;;  %v1073_v16 = vand.u32 4294901760, %v1011_v57  ;;  %3769 = vmatprep.subr.bf16.mxu0 %v4999_v25  ;;  %v5007_v11 = vsub.f32 %v1012_v4, %v1071_v46  ;;  %v1077_v52 = vand.u32 4294901760, %v1013_v20  ;;  %v6716_v44 = vand.u32 4294901760, %v4806_v17 }
  0x73   :  { %7020 = vst [vmem:[#allocation70_spill] sm:$0xff] %v5003_v31  ;;  %v6715_v9 = vand.u32 4294901760, %v4808_v18  ;;  %v5011_v34 = vpack.c.bf16 %v1075_v38, %v1071_v46  ;;  %v5013_v56 = vsub.f32 %v1014_v21, %v1075_v38  ;;  %v5015_v13 = vpack.c.bf16 %v172_v30, %v168_v43 }
  0x74   :  { %7021 = vst [vmem:[#allocation71_spill] sm:$0xff] %v5007_v11  ;;  %v5017_v0 = vsub.f32 %v106_v48, %v168_v43  ;;  %v5019_v31 = vsub.f32 %v108_v10, %v172_v30  ;;  %v5021_v25 = vpack.c.bf16 %v1077_v52, %v1073_v16  ;;  %v5023_v4 = vsub.f32 %v1011_v57, %v1073_v16 }
  0x75   :  { %7022 = vst [vmem:[#allocation72_spill] sm:$0xff] %v5011_v34  ;;  %7023 = vst [vmem:[#allocation73_spill] sm:$0xff] %v5015_v13  ;;  %v5025_v11 = vsub.f32 %v1013_v20, %v1077_v52  ;;  %3961 = vmatprep.subr.bf16.mxu1 %v5011_v34  ;;  %3771 = vmatpush1.bf16.msra.mxu0 %v5015_v13  ;;  %v221_v21 = vsub.f32 %v4806_v17, %v6716_v44  ;;  %v6721_v10 = vand.u32 4294901760, %v4810_v19 }
  0x76   :  { %7024 = vst [vmem:[#allocation74_spill] sm:$0xff] %v5017_v0  ;;  %7025 = vst [vmem:[#allocation75_spill] sm:$0xff] %v5019_v31  ;;  %v233_v48 = vsub.f32 %v4808_v18, %v6715_v9  ;;  %v6726_v46 = vand.u32 4294901760, %v4814_v24  ;;  %3963 = vmatpush1.bf16.msra.mxu1 %v5021_v25  ;;  %v5038_v20 = vand.u32 4294901760, %v77_v23  ;;  %v6731_v57 = vand.u32 4294901760, %v4818_v26 }
  0x77   :  { %7026 = vst [vmem:[#allocation76_spill] sm:$0xff] %v5021_v25  ;;  %7027 = vst [vmem:[#allocation77_spill] sm:$0xff] %v5023_v4  ;;  %v6732_v38 = vand.u32 4294901760, %v4821_v28  ;;  %v5042_v43 = vand.u32 4294901760, %v981_v27  ;;  %v222_v30 = vand.u32 4294901760, %v221_v21  ;;  %v1126_v52 = vsub.f32 %v4810_v19, %v6721_v10 }
  0x78   :  { %7028 = vst [vmem:[#allocation78_spill] sm:$0xff] %v5025_v11  ;;  %7029 = vst [vmem:[#allocation79_spill] sm:$0xff] %v5038_v20  ;;  %v234_v16 = vand.u32 4294901760, %v233_v48  ;;  %v1138_v9 = vsub.f32 %v4814_v24, %v6726_v46  ;;  %v5051_v44 = vsub.f32 %v77_v23, %v5038_v20  ;;  %v227_v25 = vsub.f32 %v4818_v26, %v6731_v57 }
  0x79   :  { %7030 = vst [vmem:[#allocation80_spill] sm:$0xff] %v5042_v43  ;;  %v239_v21 = vsub.f32 %v4821_v28, %v6732_v38  ;;  %v5060_v48 = vsub.f32 %v981_v27, %v5042_v43  ;;  %v1127_v10 = vand.u32 4294901760, %v1126_v52  ;;  %v6736_v19 = vand.u32 4294901760, %v4827_v40 }
  0x7a   :  { %7031 = vst [vmem:[#allocation81_spill] sm:$0xff] %v5051_v44  ;;  %v3772_v13 = vpack.c.bf16 %v234_v16, %v222_v30  ;;  %v1139_v34 = vand.u32 4294901760, %v1138_v9  ;;  %v6733_v46 = vand.u32 4294901760, %v5051_v44  ;;  %v228_v23 = vand.u32 4294901760, %v227_v25 }
  0x7b   :  { %7032 = vst [vmem:[#allocation82_spill] sm:$0xff] %v5060_v48  ;;  %v240_v20 = vand.u32 4294901760, %v239_v21  ;;  %v6734_v24 = vand.u32 4294901760, %v5060_v48  ;;  %v1132_v38 = vsub.f32 %v4827_v40, %v6736_v19  ;;  %v6735_v27 = vand.u32 4294901760, %v4829_v41 }
  0x7c   :  { %3773 = vmatprep.subr.bf16.mxu0 %v3772_v13  ;;  %v3964_v57 = vpack.c.bf16 %v1139_v34, %v1127_v10  ;;  %v6737_v30 = vand.u32 4294901760, %v4831_v42  ;;  %v210_v9 = vsub.f32 %v5051_v44, %v6733_v46  ;;  %v6738_v13 = vand.u32 4294901760, %v4835_v47 }
  0x7d   :  { %v3774_v16 = vpack.c.bf16 %v240_v20, %v228_v23  ;;  %v1115_v25 = vsub.f32 %v5060_v48, %v6734_v24  ;;  %v1133_v34 = vand.u32 4294901760, %v1132_v38  ;;  %v1144_v10 = vsub.f32 %v4829_v41, %v6735_v27 }
  0x7e   :  { %3965 = vmatprep.subr.bf16.mxu1 %v3964_v57  ;;  %v245_v52 = vsub.f32 %v4831_v42, %v6737_v30  ;;  %v6739_v21 = vand.u32 4294901760, %v4839_v49  ;;  %v211_v46 = vand.u32 4294901760, %v210_v9  ;;  %v257_v23 = vsub.f32 %v4835_v47, %v6738_v13 }
  0x7f   :  { %v1116_v20 = vand.u32 4294901760, %v1115_v25  ;;  %v6742_v24 = vand.u32 4294901760, %v4842_v51  ;;  %v1145_v57 = vand.u32 4294901760, %v1144_v10  ;;  %v6744_v19 = vand.u32 4294901760, %v4844_v53 }
  0x80   :  { %v246_v38 = vand.u32 4294901760, %v245_v52  ;;  %v1150_v27 = vsub.f32 %v4839_v49, %v6739_v21  ;;  %212 = vmatmul.mubr.f32.vlgmr.msra.gmra.mrb[0].mxu0 %v211_v46  ;;  %v258_v30 = vand.u32 4294901760, %v257_v23  ;;  %v6743_v25 = vand.u32 4294901760, %v4850_v62 }
  0x81   :  { %1117 = vmatmul.mubr.f32.vlgmr.msra.gmra.mrb[0].mxu1 %v1116_v20  ;;  %v1162_v9 = vsub.f32 %v4842_v51, %v6742_v24  ;;  %v6748_v13 = vand.u32 4294901760, %v4852_v63  ;;  %3775 = vmatpush1.bf16.msra.mxu0 %v3774_v16  ;;  %v3966_v10 = vpack.c.bf16 %v1145_v57, %v1133_v34  ;;  %v251_v21 = vsub.f32 %v4844_v53, %v6744_v19 }
  0x82   :  { %v1151_v52 = vand.u32 4294901760, %v1150_v27  ;;  %v6747_v48 = vand.u32 4294901760, %v4856_v6  ;;  %v7033_v46 = vmov 0.0   ;;  %v3776_v20 = vpack.c.bf16 %v258_v30, %v246_v38 }
  0x83   :  { %442 = vmatprep.mubr.f32.mxu0 %v7033_v46  ;;  %v1163_v23 = vand.u32 4294901760, %v1162_v9  ;;  %v263_v24 = vsub.f32 %v4850_v62, %v6743_v25  ;;  %v1156_v16 = vsub.f32 %v4852_v63, %v6748_v13  ;;  %1347 = vmatprep.mubr.f32.mxu1 %v7033_v46  ;;  %v252_v27 = vand.u32 4294901760, %v251_v21 }
  0x84   :  { %3967 = vmatpush1.bf16.msra.mxu1 %v3966_v10  ;;  %v1168_v34 = vsub.f32 %v4856_v6, %v6747_v48  ;;  %v6749_v57 = vand.u32 4294901760, %v4860_v8  ;;  %v6750_v30 = vand.u32 4294901760, %v4863_v12  ;;  %3777 = vmatprep.subr.bf16.mxu0 %v3776_v20  ;;  %v6753_v19 = vand.u32 4294901760, %v4867_v14 }
  0x85   :  { %v3968_v38 = vpack.c.bf16 %v1163_v23, %v1151_v52  ;;  %v264_v9 = vand.u32 4294901760, %v263_v24  ;;  %v1157_v25 = vand.u32 4294901760, %v1156_v16  ;;  %v6751_v48 = vand.u32 4294901760, %v4869_v15 }
  0x86   :  { %v1169_v44 = vand.u32 4294901760, %v1168_v34  ;;  %v269_v10 = vsub.f32 %v4860_v8, %v6749_v57  ;;  %v281_v21 = vsub.f32 %v4863_v12, %v6750_v30  ;;  %v1174_v24 = vsub.f32 %v4867_v14, %v6753_v19 }
  0x87   :  { %3969 = vmatprep.subr.bf16.mxu1 %v3968_v38  ;;  %v3778_v13 = vpack.c.bf16 %v264_v9, %v252_v27  ;;  %v6752_v52 = vand.u32 4294901760, %v4876_v35  ;;  %v6759_v20 = vand.u32 4294901760, %v4878_v36  ;;  %v1186_v57 = vsub.f32 %v4869_v15, %v6751_v48 }
  0x88   :  { %v3970_v23 = vpack.c.bf16 %v1169_v44, %v1157_v25  ;;  %v270_v16 = vand.u32 4294901760, %v269_v10  ;;  %v282_v34 = vand.u32 4294901760, %v281_v21  ;;  %v1175_v30 = vand.u32 4294901760, %v1174_v24 }
  0x89   :  { %3779 = vmatpush1.bf16.msra.mxu0 %v3778_v13  ;;  %v275_v27 = vsub.f32 %v4876_v35, %v6752_v52  ;;  %v287_v38 = vsub.f32 %v4878_v36, %v6759_v20  ;;  %v6754_v9 = vand.u32 4294901760, %v4882_v45  ;;  %v1187_v25 = vand.u32 4294901760, %v1186_v57 }
  0x8a   :  { %3971 = vmatpush1.bf16.msra.mxu1 %v3970_v23  ;;  %v3780_v44 = vpack.c.bf16 %v282_v34, %v270_v16  ;;  %v6755_v10 = vand.u32 4294901760, %v4884_v50  ;;  %v6756_v21 = vand.u32 4294901760, %v4888_v54  ;;  %v6757_v52 = vand.u32 4294901760, %v4892_v58 }
  0x8b   :  { %v276_v48 = vand.u32 4294901760, %v275_v27  ;;  %v288_v13 = vand.u32 4294901760, %v287_v38  ;;  %v1180_v24 = vsub.f32 %v4882_v45, %v6754_v9  ;;  %v3972_v19 = vpack.c.bf16 %v1187_v25, %v1175_v30 }
  0x8c   :  { %3781 = vmatprep.subr.bf16.mxu0 %v3780_v44  ;;  %v1192_v23 = vsub.f32 %v4884_v50, %v6755_v10  ;;  %v293_v57 = vsub.f32 %v4888_v54, %v6756_v21  ;;  %v6758_v16 = vand.u32 4294901760, %v4896_v60  ;;  %v305_v38 = vsub.f32 %v4892_v58, %v6757_v52 }
  0x8d   :  { %v3782_v34 = vpack.c.bf16 %v288_v13, %v276_v48  ;;  %v1181_v27 = vand.u32 4294901760, %v1180_v24  ;;  %v6760_v9 = vand.u32 4294901760, %v4899_v2  ;;  %3973 = vmatprep.subr.bf16.mxu1 %v3972_v19  ;;  %v6761_v10 = vand.u32 4294901760, %v4902_v22 }
  0x8e   :  { %v1193_v30 = vand.u32 4294901760, %v1192_v23  ;;  %v294_v44 = vand.u32 4294901760, %v293_v57  ;;  %v1198_v25 = vsub.f32 %v4896_v60, %v6758_v16  ;;  %v306_v21 = vand.u32 4294901760, %v305_v38 }
  0x8f   :  { %3783 = vmatpush1.bf16.msra.mxu0 %v3782_v34  ;;  %v1210_v48 = vsub.f32 %v4899_v2, %v6760_v9  ;;  %v6762_v13 = vand.u32 4294901760, %v4906_v37  ;;  %v6765_v24 = vand.u32 4294901760, %v4910_v32  ;;  %v299_v23 = vsub.f32 %v4902_v22, %v6761_v10  ;;  %v7034_v10 = vld [vmem:[#allocation40_spill] sm:$0xff] }
  0x90   :  { %v3974_v52 = vpack.c.bf16 %v1193_v30, %v1181_v27  ;;  %v1199_v19 = vand.u32 4294901760, %v1198_v25  ;;  %v6764_v57 = vand.u32 4294901760, %v4912_v59  ;;  %v3784_v16 = vpack.c.bf16 %v306_v21, %v294_v44 }
  0x91   :  { %v1211_v20 = vand.u32 4294901760, %v1210_v48  ;;  %v311_v34 = vsub.f32 %v4906_v37, %v6762_v13  ;;  %v1204_v38 = vsub.f32 %v4910_v32, %v6765_v24  ;;  %v300_v9 = vand.u32 4294901760, %v299_v23 }
  0x92   :  { %3975 = vmatpush1.bf16.msra.mxu1 %v3974_v52  ;;  %v1216_v27 = vsub.f32 %v4912_v59, %v6764_v57  ;;  %v6772_v30 = vand.u32 4294901760, %v4916_v7  ;;  %v6773_v25 = vand.u32 4294901760, %v4918_v5  ;;  %3785 = vmatprep.subr.bf16.mxu0 %v3784_v16  ;;  %v6774_v13 = vand.u32 4294901760, %v7034_v10  ;;  %v7035_v57 = vld [vmem:[#allocation42_spill] sm:$0xff]  ;;  %v7036_v16 = vld [vmem:[#allocation44_spill] sm:$0xff] }
  0x93   :  { %v3976_v21 = vpack.c.bf16 %v1211_v20, %v1199_v19  ;;  %v312_v44 = vand.u32 4294901760, %v311_v34  ;;  %v1205_v48 = vand.u32 4294901760, %v1204_v38  ;;  %v6778_v24 = vand.u32 4294901760, %v7035_v57  ;;  %v7037_v34 = vld [vmem:[#allocation45_spill] sm:$0xff] }
  0x94   :  { %v1217_v46 = vand.u32 4294901760, %v1216_v27  ;;  %v317_v52 = vsub.f32 %v4916_v7, %v6772_v30  ;;  %v329_v23 = vsub.f32 %v4918_v5, %v6773_v25  ;;  %v1222_v20 = vsub.f32 %v7034_v10, %v6774_v13  ;;  %v7040_v10 = vld [vmem:[#allocation50_spill] sm:$0xff] }
  0x95   :  { %3977 = vmatprep.subr.bf16.mxu1 %v3976_v21  ;;  %v3786_v59 = vpack.c.bf16 %v312_v44, %v300_v9  ;;  %v6779_v19 = vand.u32 4294901760, %v7036_v16  ;;  %v6783_v38 = vand.u32 4294901760, %v7037_v34  ;;  %v1234_v30 = vsub.f32 %v7035_v57, %v6778_v24  ;;  %v7038_v44 = vld [vmem:[#allocation47_spill] sm:$0xff] }
  0x96   :  { %v3978_v27 = vpack.c.bf16 %v1217_v46, %v1205_v48  ;;  %v318_v32 = vand.u32 4294901760, %v317_v52  ;;  %v330_v37 = vand.u32 4294901760, %v329_v23  ;;  %v1223_v25 = vand.u32 4294901760, %v1222_v20  ;;  %v7039_v52 = vld [vmem:[#allocation48_spill] sm:$0xff] }
  0x97   :  { %3787 = vmatpush1.bf16.msra.mxu0 %v3786_v59  ;;  %v323_v9 = vsub.f32 %v7036_v16, %v6779_v19  ;;  %v335_v21 = vsub.f32 %v7037_v34, %v6783_v38  ;;  %v6782_v13 = vand.u32 4294901760, %v7038_v44  ;;  %v1235_v48 = vand.u32 4294901760, %v1234_v30  ;;  %v7041_v19 = vld [vmem:[#allocation51_spill] sm:$0xff] }
  0x98   :  { %3979 = vmatpush1.bf16.msra.mxu1 %v3978_v27  ;;  %v3788_v46 = vpack.c.bf16 %v330_v37, %v318_v32  ;;  %v6784_v23 = vand.u32 4294901760, %v7039_v52  ;;  %v6786_v5 = vand.u32 4294901760, %v7040_v10  ;;  %v6787_v16 = vand.u32 4294901760, %v7041_v19  ;;  %v7042_v32 = vld [vmem:[#allocation52_spill] sm:$0xff] }
  0x99   :  { %v324_v24 = vand.u32 4294901760, %v323_v9  ;;  %v336_v59 = vand.u32 4294901760, %v335_v21  ;;  %v1228_v20 = vsub.f32 %v7038_v44, %v6782_v13  ;;  %v3980_v57 = vpack.c.bf16 %v1235_v48, %v1223_v25 }
  0x9a   :  { %3789 = vmatprep.subr.bf16.mxu0 %v3788_v46  ;;  %v1240_v27 = vsub.f32 %v7039_v52, %v6784_v23  ;;  %v341_v37 = vsub.f32 %v7040_v10, %v6786_v5  ;;  %v6790_v30 = vand.u32 4294901760, %v7042_v32  ;;  %v353_v13 = vsub.f32 %v7041_v19, %v6787_v16  ;;  %v7043_v23 = vld [vmem:[#allocation56_spill] sm:$0xff]  ;;  %v7045_v16 = vld [vmem:[#allocation59_spill] sm:$0xff] }
  0x9b   :  { %v3790_v9 = vpack.c.bf16 %v336_v59, %v324_v24  ;;  %v1229_v21 = vand.u32 4294901760, %v1228_v20  ;;  %v6793_v38 = vand.u32 4294901760, %v4955_v61  ;;  %3981 = vmatprep.subr.bf16.mxu1 %v3980_v57  ;;  %v6794_v52 = vand.u32 4294901760, %v7043_v23  ;;  %v7044_v59 = vld [vmem:[#allocation57_spill] sm:$0xff] }
  0x9c   :  { %v1241_v25 = vand.u32 4294901760, %v1240_v27  ;;  %v342_v46 = vand.u32 4294901760, %v341_v37  ;;  %v1246_v48 = vsub.f32 %v7042_v32, %v6790_v30  ;;  %v354_v5 = vand.u32 4294901760, %v353_v13  ;;  %v7046_v37 = vld [vmem:[#allocation60_spill] sm:$0xff] }
  0x9d   :  { %3791 = vmatpush1.bf16.msra.mxu0 %v3790_v9  ;;  %v1258_v24 = vsub.f32 %v4955_v61, %v6793_v38  ;;  %v6798_v20 = vand.u32 4294901760, %v7044_v59  ;;  %v6801_v19 = vand.u32 4294901760, %v7045_v16  ;;  %v347_v27 = vsub.f32 %v7043_v23, %v6794_v52  ;;  %v7048_v52 = vld [vmem:[#allocation63_spill] sm:$0xff]  ;;  %v7049_v61 = vld [vmem:[#allocation64_spill] sm:$0xff] }
  0x9e   :  { %v3982_v10 = vpack.c.bf16 %v1241_v25, %v1229_v21  ;;  %v1247_v57 = vand.u32 4294901760, %v1246_v48  ;;  %v6800_v30 = vand.u32 4294901760, %v7046_v37  ;;  %v3792_v32 = vpack.c.bf16 %v354_v5, %v342_v46  ;;  %v7047_v25 = vld [vmem:[#allocation62_spill] sm:$0xff] }
  0x9f   :  { %v1259_v44 = vand.u32 4294901760, %v1258_v24  ;;  %v359_v13 = vsub.f32 %v7044_v59, %v6798_v20  ;;  %v1252_v9 = vsub.f32 %v7045_v16, %v6801_v19  ;;  %v348_v38 = vand.u32 4294901760, %v347_v27 }
  0xa0   :  { %3983 = vmatpush1.bf16.msra.mxu1 %v3982_v10  ;;  %v1264_v21 = vsub.f32 %v7046_v37, %v6800_v30  ;;  %v6802_v48 = vand.u32 4294901760, %v7047_v25  ;;  %v6803_v23 = vand.u32 4294901760, %v7048_v52  ;;  %3793 = vmatprep.subr.bf16.mxu0 %v3792_v32  ;;  %v6806_v20 = vand.u32 4294901760, %v7049_v61 }
  0xa1   :  { %v3984_v5 = vpack.c.bf16 %v1259_v44, %v1247_v57  ;;  %v360_v46 = vand.u32 4294901760, %v359_v13  ;;  %v1253_v24 = vand.u32 4294901760, %v1252_v9  ;;  %v6804_v30 = vand.u32 4294901760, %v4983_v1 }
  0xa2   :  { %v1265_v59 = vand.u32 4294901760, %v1264_v21  ;;  %v365_v10 = vsub.f32 %v7047_v25, %v6802_v48  ;;  %v377_v27 = vsub.f32 %v7048_v52, %v6803_v23  ;;  %v1270_v44 = vsub.f32 %v7049_v61, %v6806_v20 }
  0xa3   :  { %3985 = vmatprep.subr.bf16.mxu1 %v3984_v5  ;;  %v3794_v19 = vpack.c.bf16 %v360_v46, %v348_v38  ;;  %v6805_v32 = vand.u32 4294901760, %v4987_v29  ;;  %v6810_v57 = vand.u32 4294901760, %v4989_v39  ;;  %v1282_v48 = vsub.f32 %v4983_v1, %v6804_v30 }
  0xa4   :  { %v3986_v13 = vpack.c.bf16 %v1265_v59, %v1253_v24  ;;  %v366_v9 = vand.u32 4294901760, %v365_v10  ;;  %v378_v21 = vand.u32 4294901760, %v377_v27  ;;  %v1271_v23 = vand.u32 4294901760, %v1270_v44 }
  0xa5   :  { %3795 = vmatpush1.bf16.msra.mxu0 %v3794_v19  ;;  %v371_v38 = vsub.f32 %v4987_v29, %v6805_v32  ;;  %v383_v5 = vsub.f32 %v4989_v39, %v6810_v57  ;;  %v6809_v46 = vand.u32 4294901760, %v4993_v55  ;;  %v1283_v24 = vand.u32 4294901760, %v1282_v48  ;;  %v7050_v32 = vld [vmem:[#allocation70_spill] sm:$0xff] }
  0xa6   :  { %3987 = vmatpush1.bf16.msra.mxu1 %v3986_v13  ;;  %v3796_v59 = vpack.c.bf16 %v378_v21, %v366_v9  ;;  %v6811_v10 = vand.u32 4294901760, %v4995_v3  ;;  %v6812_v27 = vand.u32 4294901760, %v5001_v33  ;;  %v6813_v20 = vand.u32 4294901760, %v7050_v32  ;;  %v7051_v9 = vld [vmem:[#allocation71_spill] sm:$0xff] }
  0xa7   :  { %v372_v30 = vand.u32 4294901760, %v371_v38  ;;  %v384_v19 = vand.u32 4294901760, %v383_v5  ;;  %v1276_v44 = vsub.f32 %v4993_v55, %v6809_v46  ;;  %v3988_v29 = vpack.c.bf16 %v1283_v24, %v1271_v23 }
  0xa8   :  { %3797 = vmatprep.subr.bf16.mxu0 %v3796_v59  ;;  %v1288_v13 = vsub.f32 %v4995_v3, %v6811_v10  ;;  %v389_v48 = vsub.f32 %v5001_v33, %v6812_v27  ;;  %v6814_v21 = vand.u32 4294901760, %v7051_v9  ;;  %v401_v46 = vsub.f32 %v7050_v32, %v6813_v20 }
  0xa9   :  { %v3798_v38 = vpack.c.bf16 %v384_v19, %v372_v30  ;;  %v1277_v5 = vand.u32 4294901760, %v1276_v44  ;;  %v6816_v57 = vand.u32 4294901760, %v5013_v56  ;;  %3989 = vmatprep.subr.bf16.mxu1 %v3988_v29  ;;  %v6817_v10 = vand.u32 4294901760, %v5017_v0 }
  0xaa   :  { %v1289_v23 = vand.u32 4294901760, %v1288_v13  ;;  %v390_v59 = vand.u32 4294901760, %v389_v48  ;;  %v1294_v24 = vsub.f32 %v7051_v9, %v6814_v21  ;;  %v402_v27 = vand.u32 4294901760, %v401_v46 }
  0xab   :  { %3799 = vmatpush1.bf16.msra.mxu0 %v3798_v38  ;;  %v1306_v30 = vsub.f32 %v5013_v56, %v6816_v57  ;;  %v6818_v19 = vand.u32 4294901760, %v5019_v31  ;;  %v6823_v44 = vand.u32 4294901760, %v5023_v4  ;;  %v395_v13 = vsub.f32 %v5017_v0, %v6817_v10 }
  0xac   :  { %v3990_v20 = vpack.c.bf16 %v1289_v23, %v1277_v5  ;;  %v1295_v29 = vand.u32 4294901760, %v1294_v24  ;;  %v6824_v48 = vand.u32 4294901760, %v5025_v11  ;;  %v3800_v21 = vpack.c.bf16 %v402_v27, %v390_v59 }
  0xad   :  { %v1307_v9 = vand.u32 4294901760, %v1306_v30  ;;  %v407_v46 = vsub.f32 %v5019_v31, %v6818_v19  ;;  %v1300_v38 = vsub.f32 %v5023_v4, %v6823_v44  ;;  %v396_v57 = vand.u32 4294901760, %v395_v13  ;;  %v7052_v19 = vld [vmem:[#allocation18_spill] sm:$0xff]  ;;  %v7053_v31 = vld [vmem:[#allocation20_spill] sm:$0xff] }
  0xae   :  { %3991 = vmatpush1.bf16.msra.mxu1 %v3990_v20  ;;  %v1312_v5 = vsub.f32 %v5025_v11, %v6824_v48  ;;  %3801 = vmatprep.subr.bf16.mxu0 %v3800_v21  ;;  %v3804_v59 = vpack.c.bf16 %v4808_v18, %v4806_v17  ;;  %v3996_v0 = vpack.c.bf16 %v7053_v31, %v7052_v19  ;;  %v7058_v48 = vld [vmem:[#allocation39_spill] sm:$0xff]  ;;  %v7060_v31 = vand.u32 4294901760, %v4818_v26 }
  0xaf   :  { %v3992_v23 = vpack.c.bf16 %v1307_v9, %v1295_v29  ;;  %v408_v24 = vand.u32 4294901760, %v407_v46  ;;  %v1301_v10 = vand.u32 4294901760, %v1300_v38  ;;  %v3806_v20 = vpack.c.bf16 %v4821_v28, %v4818_v26  ;;  %v7054_v29 = vld [vmem:[#allocation79_spill] sm:$0xff] }
  0xb0   :  { %v1313_v27 = vand.u32 4294901760, %v1312_v5  ;;  %v3998_v9 = vpack.c.bf16 %v4829_v41, %v4827_v40  ;;  %v3808_v21 = vpack.c.bf16 %v4835_v47, %v4831_v42  ;;  %v4002_v13 = vpack.c.bf16 %v4856_v6, %v4852_v63 }
  0xb1   :  { %3993 = vmatprep.subr.bf16.mxu1 %v3992_v23  ;;  %v3802_v30 = vpack.c.bf16 %v408_v24, %v396_v57  ;;  %v4000_v57 = vpack.c.bf16 %v4842_v51, %v4839_v49  ;;  %v4004_v46 = vpack.c.bf16 %v4869_v15, %v4867_v14  ;;  %v4006_v38 = vpack.c.bf16 %v4884_v50, %v4882_v45  ;;  %v7055_v24 = vld [vmem:[#allocation34_spill] sm:$0xff] }
  0xb2   :  { %v3994_v44 = vpack.c.bf16 %v1313_v27, %v1301_v10  ;;  %v3810_v10 = vpack.c.bf16 %v4850_v62, %v4844_v53  ;;  %v3816_v5 = vpack.c.bf16 %v4892_v58, %v4888_v54  ;;  %v4008_v23 = vpack.c.bf16 %v4899_v2, %v4896_v60 }
  0xb3   :  { %3803 = vmatpush1.bf16.msra.mxu0 %v3802_v30  ;;  %v3818_v27 = vpack.c.bf16 %v7055_v24, %v4902_v22  ;;  %v7057_v30 = vld [vmem:[#allocation37_spill] sm:$0xff]  ;;  %v7062_v19 = vand.u32 4294901760, %v4827_v40  ;;  %v7063_v18 = vand.u32 4294901760, %v4829_v41  ;;  %v7065_v11 = vand.u32 4294901760, %v4835_v47 }
  0xb4   :  { %3995 = vmatpush1.bf16.msra.mxu1 %v3994_v44  ;;  %3805 = vmatprep.subr.bf16.mxu0 %v3804_v59  ;;  %v3812_v44 = vpack.c.bf16 %v4863_v12, %v4860_v8  ;;  %v7056_v59 = vld [vmem:[#allocation36_spill] sm:$0xff]  ;;  %v7066_v26 = vand.u32 4294901760, %v4839_v49  ;;  %v7068_v40 = vand.u32 4294901760, %v4844_v53  ;;  %v7069_v41 = vand.u32 4294901760, %v4850_v62 }
  0xb5   :  { %3997 = vmatprep.subr.bf16.mxu1 %v3996_v0  ;;  %v3814_v0 = vpack.c.bf16 %v4878_v36, %v4876_v35  ;;  %v5351_v17 = vpack.c.bf16 %v7063_v18, %v7062_v19  ;;  %v7070_v19 = vand.u32 4294901760, %v4852_v63  ;;  %v7072_v47 = vand.u32 4294901760, %v4860_v8 }
  0xb6   :  { %444 = vmatmul.mubr.f32.vlgmr.msra.gmra.mrb[0].mxu0 %v7054_v29  ;;  %v7059_v29 = vmov 0.0   ;;  %v5370_v18 = vpack.c.bf16 %v7069_v41, %v7068_v40  ;;  %v7073_v49 = vand.u32 4294901760, %v4863_v12  ;;  %v7075_v53 = vand.u32 4294901760, %v4869_v15  ;;  %v7090_v41 = vld [vmem:[#allocation40_spill] sm:$0xff] }
  0xb7   :  { %3807 = vmatpush1.bf16.msra.mxu0 %v3806_v20  ;;  %1349 = vmatmul.mubr.f32.vlgmr.msra.gmra.mrb[0].mxu1 %v5042_v43  ;;  %v4010_v20 = vpack.c.bf16 %v7057_v30, %v7056_v59  ;;  %v3820_v43 = vpack.c.bf16 %v7058_v48, %v4916_v7  ;;  %v7077_v63 = vand.u32 4294901760, %v4878_v36  ;;  %v7079_v8 = vand.u32 4294901760, %v4884_v50 }
  0xb8   :  { %3999 = vmatpush1.bf16.msra.mxu1 %v3998_v9  ;;  %3809 = vmatprep.subr.bf16.mxu0 %v3808_v21  ;;  %v7061_v9 = vand.u32 4294901760, %v4821_v28  ;;  %v7067_v28 = vand.u32 4294901760, %v4842_v51  ;;  %v5382_v51 = vpack.c.bf16 %v7073_v49, %v7072_v47  ;;  %v7080_v12 = vand.u32 4294901760, %v4888_v54  ;;  %v7094_v47 = vld [vmem:[#allocation44_spill] sm:$0xff] }
  0xb9   :  { %4001 = vmatprep.subr.bf16.mxu1 %v4000_v57  ;;  %578 = vmatprep.mubr.f32.mxu0 %v7059_v29  ;;  %v7064_v57 = vand.u32 4294901760, %v4831_v42  ;;  %v7071_v42 = vand.u32 4294901760, %v4856_v6  ;;  %v7083_v36 = vand.u32 4294901760, %v4899_v2  ;;  %v7085_v50 = vand.u32 4294901760, %v7055_v24 }
  0xba   :  { %v5345_v21 = vpack.c.bf16 %v7061_v9, %v7060_v31  ;;  %1483 = vmatprep.mubr.f32.mxu1 %v7059_v29  ;;  %v5364_v31 = vpack.c.bf16 %v7067_v28, %v7066_v26  ;;  %v7087_v54 = vand.u32 4294901760, %v7057_v30  ;;  %v7097_v30 = vld [vmem:[#allocation47_spill] sm:$0xff] }
  0xbb   :  { %v5358_v4 = vpack.c.bf16 %v7065_v11, %v7064_v57  ;;  %v5376_v9 = vpack.c.bf16 %v7071_v42, %v7070_v19  ;;  %3811 = vmatpush1.bf16.msra.mxu0 %v3810_v10  ;;  %v7074_v11 = vand.u32 4294901760, %v4867_v14  ;;  %v7076_v57 = vand.u32 4294901760, %v4876_v35 }
  0xbc   :  { %v7078_v10 = vand.u32 4294901760, %v4882_v45  ;;  %4003 = vmatpush1.bf16.msra.mxu1 %v4002_v13  ;;  %3813 = vmatprep.subr.bf16.mxu0 %v3812_v44  ;;  %v7081_v14 = vand.u32 4294901760, %v4892_v58  ;;  %v7082_v35 = vand.u32 4294901760, %v4896_v60  ;;  %v7084_v45 = vand.u32 4294901760, %v4902_v22  ;;  %v7092_v22 = vld [vmem:[#allocation42_spill] sm:$0xff] }
  0xbd   :  { %v5388_v62 = vpack.c.bf16 %v7075_v53, %v7074_v11  ;;  %v5394_v6 = vpack.c.bf16 %v7077_v63, %v7076_v57  ;;  %4005 = vmatprep.subr.bf16.mxu1 %v4004_v46  ;;  %v7086_v13 = vand.u32 4294901760, %v7056_v59  ;;  %v7088_v44 = vand.u32 4294901760, %v4916_v7  ;;  %v7099_v53 = vld [vmem:[#allocation48_spill] sm:$0xff] }
  0xbe   :  { %v5400_v26 = vpack.c.bf16 %v7079_v8, %v7078_v10  ;;  %v5406_v15 = vpack.c.bf16 %v7081_v14, %v7080_v12  ;;  %v5412_v28 = vpack.c.bf16 %v7083_v36, %v7082_v35  ;;  %v5418_v40 = vpack.c.bf16 %v7085_v50, %v7084_v45  ;;  %v7103_v10 = vld [vmem:[#allocation51_spill] sm:$0xff]  ;;  %v7105_v14 = vld [vmem:[#allocation52_spill] sm:$0xff]  ;;  %v7107_v36 = vld [vmem:[#allocation54_spill] sm:$0xff] }
  0xbf   :  { %v5424_v58 = vpack.c.bf16 %v7087_v54, %v7086_v13  ;;  %v7089_v60 = vand.u32 4294901760, %v7058_v48  ;;  %v7091_v19 = vand.u32 4294901760, %v7090_v41  ;;  %v7093_v42 = vand.u32 4294901760, %v7092_v22  ;;  %v7101_v48 = vld [vmem:[#allocation50_spill] sm:$0xff]  ;;  %v7110_v13 = vld [vmem:[#allocation56_spill] sm:$0xff]  ;;  %3815 = vmatpush1.bf16.msra.mxu0 %v3814_v0 }
  0xc0   :  { %v7095_v46 = vand.u32 4294901760, %v7094_v47  ;;  %v7096_v59 = vand.u32 4294901760, %v7037_v34  ;;  %v7098_v11 = vand.u32 4294901760, %v7097_v30  ;;  %v7100_v7 = vand.u32 4294901760, %v7099_v53  ;;  %4007 = vmatpush1.bf16.msra.mxu1 %v4006_v38  ;;  %3817 = vmatprep.subr.bf16.mxu0 %v3816_v5  ;;  %v7137_v5 = vld [vmem:[#allocation74_spill] sm:$0xff] }
  0xc1   :  { %v5430_v2 = vpack.c.bf16 %v7089_v60, %v7088_v44  ;;  %v5436_v24 = vpack.c.bf16 %v7093_v42, %v7091_v19  ;;  %v7102_v63 = vand.u32 4294901760, %v7101_v48  ;;  %v7104_v8 = vand.u32 4294901760, %v7103_v10  ;;  %v7112_v44 = vld [vmem:[#allocation57_spill] sm:$0xff]  ;;  %4009 = vmatprep.subr.bf16.mxu1 %v4008_v23 }
  0xc2   :  { %v5442_v49 = vpack.c.bf16 %v7096_v59, %v7095_v46  ;;  %v5448_v57 = vpack.c.bf16 %v7100_v7, %v7098_v11  ;;  %v7106_v35 = vand.u32 4294901760, %v7105_v14  ;;  %v7108_v45 = vand.u32 4294901760, %v7107_v36 }
  0xc3   :  { %v5454_v12 = vpack.c.bf16 %v7104_v8, %v7102_v63  ;;  %v7111_v54 = vand.u32 4294901760, %v7110_v13  ;;  %v7113_v60 = vand.u32 4294901760, %v7112_v44  ;;  %v7115_v42 = vand.u32 4294901760, %v7045_v16  ;;  %3819 = vmatpush1.bf16.msra.mxu0 %v3818_v27 }
  0xc4   :  { %v5460_v50 = vpack.c.bf16 %v7108_v45, %v7106_v35  ;;  %v7116_v46 = vand.u32 4294901760, %v7046_v37  ;;  %v7118_v11 = vand.u32 4294901760, %v7047_v25  ;;  %v7119_v7 = vand.u32 4294901760, %v7048_v52  ;;  %4011 = vmatpush1.bf16.msra.mxu1 %v4010_v20  ;;  %3821 = vmatprep.subr.bf16.mxu0 %v3820_v43 }
  0xc5   :  { %v5466_v19 = vpack.c.bf16 %v7113_v60, %v7111_v54  ;;  %v7121_v8 = vand.u32 4294901760, %v7049_v61  ;;  %v7122_v35 = vand.u32 4294901760, %v4983_v1  ;;  %v7124_v54 = vld [vmem:[#allocation67_spill] sm:$0xff]  ;;  %v7126_v60 = vand.u32 4294901760, %v4989_v39 }
  0xc6   :  { %7109 = vst [vmem:[#allocation45_spill] sm:$0xff] %v5460_v50  ;;  %v5472_v59 = vpack.c.bf16 %v7116_v46, %v7115_v42  ;;  %v5478_v63 = vpack.c.bf16 %v7119_v7, %v7118_v11  ;;  %v7125_v0 = vand.u32 4294901760, %v7124_v54  ;;  %v7128_v42 = vand.u32 4294901760, %v4993_v55 }
  0xc7   :  { %7114 = vst [vmem:[#allocation59_spill] sm:$0xff] %v5466_v19  ;;  %v5484_v45 = vpack.c.bf16 %v7122_v35, %v7121_v8  ;;  %v7129_v46 = vand.u32 4294901760, %v4995_v3  ;;  %v7131_v7 = vand.u32 4294901760, %v5001_v33  ;;  %v7134_v35 = vld [vmem:[#allocation71_spill] sm:$0xff]  ;;  %v4012_v38 = vpack.c.bf16 %v7092_v22, %v7090_v41 }
  0xc8   :  { %7117 = vst [vmem:[#allocation60_spill] sm:$0xff] %v5472_v59  ;;  %7120 = vst [vmem:[#allocation62_spill] sm:$0xff] %v5478_v63  ;;  %v5490_v19 = vpack.c.bf16 %v7126_v60, %v7125_v0  ;;  %v7132_v63 = vand.u32 4294901760, %v7050_v32  ;;  %v7136_v59 = vand.u32 4294901760, %v5013_v56  ;;  %v7138_v60 = vand.u32 4294901760, %v7137_v5 }
  0xc9   :  { %7123 = vst [vmem:[#allocation63_spill] sm:$0xff] %v5484_v45  ;;  %v5496_v11 = vpack.c.bf16 %v7129_v46, %v7128_v42  ;;  %v7135_v45 = vand.u32 4294901760, %v7134_v35  ;;  %v7139_v42 = vld [vmem:[#allocation75_spill] sm:$0xff]  ;;  %v4014_v23 = vpack.c.bf16 %v7099_v53, %v7097_v30  ;;  %v3824_v41 = vpack.c.bf16 %v7103_v10, %v7101_v48  ;;  %4013 = vmatprep.subr.bf16.mxu1 %v4012_v38  ;;  %v7154_v53 = vld [vmem:[#allocation26_spill] sm:$0xff]  ;;  %v7156_v10 = vld [vmem:[#allocation28_spill] sm:$0xff] }
  0xca   :  { %7127 = vst [vmem:[#allocation64_spill] sm:$0xff] %v5490_v19  ;;  %v5502_v8 = vpack.c.bf16 %v7132_v63, %v7131_v7  ;;  %v7140_v46 = vand.u32 4294901760, %v7139_v42  ;;  %v7141_v19 = vld [vmem:[#allocation77_spill] sm:$0xff]  ;;  %v7143_v63 = vld [vmem:[#allocation78_spill] sm:$0xff]  ;;  %v4016_v22 = vpack.c.bf16 %v7107_v36, %v7105_v14  ;;  %v3828_v43 = vpack.c.bf16 %v7048_v52, %v7047_v25  ;;  %v7152_v25 = vld [vmem:[#allocation24_spill] sm:$0xff] }
  0xcb   :  { %7130 = vst [vmem:[#allocation70_spill] sm:$0xff] %v5496_v11  ;;  %v5508_v0 = vpack.c.bf16 %v7136_v59, %v7135_v45  ;;  %v7142_v50 = vand.u32 4294901760, %v7141_v19  ;;  %v7144_v7 = vand.u32 4294901760, %v7143_v63  ;;  %v3822_v59 = vpack.c.bf16 %v7037_v34, %v7094_v47  ;;  %4015 = vmatpush1.bf16.msra.mxu1 %v4014_v23  ;;  %v7150_v52 = vld [vmem:[#allocation22_spill] sm:$0xff]  ;;  %v7155_v48 = vld [vmem:[#allocation27_spill] sm:$0xff]  ;;  %v7157_v14 = vld [vmem:[#allocation29_spill] sm:$0xff] }
  0xcc   :  { %7133 = vst [vmem:[#allocation34_spill] sm:$0xff] %v5502_v8  ;;  %v5516_v11 = vpack.c.bf16 %v7140_v46, %v7138_v60  ;;  %v4018_v34 = vpack.c.bf16 %v7046_v37, %v7045_v16  ;;  %4017 = vmatprep.subr.bf16.mxu1 %v4016_v22  ;;  %v4020_v27 = vpack.c.bf16 %v4983_v1, %v7049_v61  ;;  %v7147_v1 = vld [vmem:[#allocation81_spill] sm:$0xff]  ;;  %v7151_v37 = vld [vmem:[#allocation23_spill] sm:$0xff]  ;;  %v7158_v36 = vld [vmem:[#allocation30_spill] sm:$0xff] }
  0xcd   :  { %v5522_v8 = vpack.c.bf16 %v7144_v7, %v7142_v50  ;;  %3823 = vmatpush1.bf16.msra.mxu0 %v3822_v59  ;;  %v3826_v50 = vpack.c.bf16 %v7112_v44, %v7110_v13  ;;  %v3830_v20 = vpack.c.bf16 %v4989_v39, %v7124_v54  ;;  %v4022_v47 = vpack.c.bf16 %v4995_v3, %v4993_v55  ;;  %v7145_v55 = vld [vmem:[#allocation15_spill] sm:$0xff]  ;;  %v7160_v44 = vld [vmem:[#allocation32_spill] sm:$0xff]  ;;  %v7163_v54 = vld [vmem:[#allocation38_spill] sm:$0xff] }
  0xce   :  { %3825 = vmatprep.subr.bf16.mxu0 %v3824_v41  ;;  %v3832_v30 = vpack.c.bf16 %v7050_v32, %v5001_v33  ;;  %v4024_v16 = vpack.c.bf16 %v5013_v56, %v7134_v35  ;;  %v3834_v61 = vpack.c.bf16 %v7139_v42, %v7137_v5  ;;  %v4026_v39 = vpack.c.bf16 %v7143_v63, %v7141_v19  ;;  %v7146_v3 = vld [vmem:[#allocation19_spill] sm:$0xff]  ;;  %v7148_v33 = vld [vmem:[#allocation21_spill] sm:$0xff]  ;;  %v7149_v56 = vld [vmem:[#allocation82_spill] sm:$0xff] }
  0xcf   :  { %4019 = vmatpush1.bf16.msra.mxu1 %v4018_v34  ;;  %v7153_v32 = vld [vmem:[#allocation25_spill] sm:$0xff]  ;;  %v7159_v13 = vld [vmem:[#allocation31_spill] sm:$0xff]  ;;  %v7166_v5 = vld [vmem:[#allocation46_spill] sm:$0xff] }
  0xd0   :  { %4021 = vmatprep.subr.bf16.mxu1 %v4020_v27  ;;  %v7161_v19 = vld [vmem:[#allocation33_spill] sm:$0xff]  ;;  %v7162_v45 = vld [vmem:[#allocation35_spill] sm:$0xff]  ;;  %v7170_v63 = vld [vmem:[#allocation58_spill] sm:$0xff] }
  0xd1   :  { %3827 = vmatpush1.bf16.msra.mxu0 %v3826_v50  ;;  %v7164_v35 = vld [vmem:[#allocation41_spill] sm:$0xff]  ;;  %v7165_v38 = vld [vmem:[#allocation43_spill] sm:$0xff]  ;;  %v7173_v23 = vld [vmem:[#allocation66_spill] sm:$0xff] }
  0xd2   :  { %3829 = vmatprep.subr.bf16.mxu0 %v3828_v43  ;;  %v7167_v60 = vld [vmem:[#allocation49_spill] sm:$0xff]  ;;  %v7169_v46 = vld [vmem:[#allocation55_spill] sm:$0xff]  ;;  %v7174_v41 = vld [vmem:[#allocation68_spill] sm:$0xff] }
  0xd3   :  { %4023 = vmatpush1.bf16.msra.mxu1 %v4022_v47  ;;  %v7168_v42 = vld [vmem:[#allocation53_spill] sm:$0xff]  ;;  %v7176_v50 = vld [vmem:[#allocation16_spill] sm:$0xff] }
  0xd4   :  { %4025 = vmatprep.subr.bf16.mxu1 %v4024_v16  ;;  %v7171_v7 = vld [vmem:[#allocation61_spill] sm:$0xff]  ;;  %v7177_v34 = vand.u32 4294901760, %v7176_v50  ;;  %v7180_v47 = vld [vmem:[#allocation72_spill] sm:$0xff]  ;;  %v7188_v50 = vand.u32 4294901760, %v7149_v56 }
  0xd5   :  { %3831 = vmatpush1.bf16.msra.mxu0 %v3830_v20  ;;  %v7172_v59 = vld [vmem:[#allocation65_spill] sm:$0xff] }
  0xd6   :  { %3833 = vmatprep.subr.bf16.mxu0 %v3832_v30  ;;  %v7175_v22 = vld [vmem:[#allocation69_spill] sm:$0xff]  ;;  %v7181_v30 = vld [vmem:[#allocation18_spill] sm:$0xff] }
  0xd7   :  { %4027 = vmatpush1.bf16.msra.mxu1 %v4026_v39  ;;  %v7178_v43 = vld [vmem:[#allocation17_spill] sm:$0xff]  ;;  %v7182_v16 = vand.u32 4294901760, %v7181_v30 }
  0xd8   :  { %4029 = vmatprep.subr.bf16.mxu1 %v7146_v3  ;;  %v7179_v27 = vand.u32 4294901760, %v7178_v43  ;;  %v1888_v43 = vld [vmem:[#allocation8 + $0x228] sm:$0xff]  ;;  %v2790_v30 = vld [vmem:[#allocation8 + $0x338] sm:$0xff] }
  0xd9   :  { %3835 = vmatpush1.bf16.msra.mxu0 %v3834_v61  ;;  %v7183_v61 = vld [vmem:[#allocation20_spill] sm:$0xff] }
  0xda   :  { %3837 = vmatprep.subr.bf16.mxu0 %v7145_v55  ;;  %1486 = vmatmul.mubr.f32.vlgmr.msra.gmra.mrb[0].mxu1 %v7149_v56  ;;  %v3868_v20 = vpack.c.bf16 %v7179_v27, %v7177_v34  ;;  %v7184_v39 = vand.u32 4294901760, %v7183_v61  ;;  %v1885_v56 = vld [vmem:[#allocation8 + $0x210] sm:$0xff]  ;;  %v1890_v27 = vld [vmem:[#allocation8 + $0x238] sm:$0xff]  ;;  %v1923_v61 = vand.u32 4294901760, %v1888_v43 }
  0xdb   :  { %4031 = vmatpush1.bf16.msra.mxu1 %v7150_v52  ;;  %1588 = vmatprep.mubr.f32.mxu1 %v7059_v29 }
  0xdc   :  { %581 = vmatmul.mubr.f32.vlgmr.msra.gmra.mrb[0].mxu0 %v7147_v1  ;;  %4033 = vmatprep.subr.bf16.mxu1 %v7152_v25 }
  0xdd   :  { %3839 = vmatpush1.bf16.msra.mxu0 %v7148_v33  ;;  %683 = vmatprep.mubr.f32.mxu0 %v7059_v29 }
  0xde   :  { %3841 = vmatprep.subr.bf16.mxu0 %v7151_v37 }
  0xdf   :  { %4035 = vmatpush1.bf16.msra.mxu1 %v7154_v53 }
  0xe0   :  { %4037 = vmatprep.subr.bf16.mxu1 %v7156_v10 }
  0xe1   :  { %3843 = vmatpush1.bf16.msra.mxu0 %v7153_v32 }
  0xe2   :  { %3845 = vmatprep.subr.bf16.mxu0 %v7155_v48 }
  0xe3   :  { %4039 = vmatpush1.bf16.msra.mxu1 %v7158_v36 }
  0xe4   :  { %4041 = vmatprep.subr.bf16.mxu1 %v7160_v44 }
  0xe5   :  { %3847 = vmatpush1.bf16.msra.mxu0 %v7157_v14 }
  0xe6   :  { %3849 = vmatprep.subr.bf16.mxu0 %v7159_v13 }
  0xe7   :  { %4043 = vmatpush1.bf16.msra.mxu1 %v7162_v45 }
  0xe8   :  { %4045 = vmatprep.subr.bf16.mxu1 %v7164_v35 }
  0xe9   :  { %3851 = vmatpush1.bf16.msra.mxu0 %v7161_v19 }
  0xea   :  { %3853 = vmatprep.subr.bf16.mxu0 %v7163_v54 }
  0xeb   :  { %4047 = vmatpush1.bf16.msra.mxu1 %v7166_v5 }
  0xec   :  { %4049 = vmatprep.subr.bf16.mxu1 %v7168_v42 }
  0xed   :  { %3855 = vmatpush1.bf16.msra.mxu0 %v7165_v38 }
  0xee   :  { %3857 = vmatprep.subr.bf16.mxu0 %v7167_v60 }
  0xef   :  { %4051 = vmatpush1.bf16.msra.mxu1 %v7170_v63  ;;  %v7185_v63 = vld [vmem:[#allocation73_spill] sm:$0xff] }
  0xf0   :  { %4053 = vmatprep.subr.bf16.mxu1 %v7172_v59  ;;  %v7186_v59 = vld [vmem:[#allocation76_spill] sm:$0xff] }
  0xf1   :  { %3859 = vmatpush1.bf16.msra.mxu0 %v7169_v46 }
  0xf2   :  { %3861 = vmatprep.subr.bf16.mxu0 %v7171_v7  ;;  %v4060_v7 = vpack.c.bf16 %v7184_v39, %v7182_v16  ;;  %v1927_v39 = vand.u32 4294901760, %v1890_v27 }
  0xf3   :  { %4055 = vmatpush1.bf16.msra.mxu1 %v7174_v41  ;;  %v7205_v41 = vld [vmem:[#allocation59_spill] sm:$0xff] }
  0xf4   :  { %4057 = vmatprep.subr.bf16.mxu1 %v7180_v47  ;;  %v1892_v47 = vld [vmem:[#allocation8 + $0x248] sm:$0xff] }
  0xf5   :  { %3863 = vmatpush1.bf16.msra.mxu0 %v7173_v23 }
  0xf6   :  { %3865 = vmatprep.subr.bf16.mxu0 %v7175_v22  ;;  %v7187_v22 = vand.u32 4294901760, %v7147_v1  ;;  %v1886_v1 = vld [vmem:[#allocation8 + $0x218] sm:$0xff] }
  0xf7   :  { %4059 = vmatpush1.bf16.msra.mxu1 %v7186_v59  ;;  %v1889_v59 = vld [vmem:[#allocation8 + $0x230] sm:$0xff] }
  0xf8   :  { %4061 = vmatprep.subr.bf16.mxu1 %v4060_v7  ;;  %v2783_v7 = vld [vmem:[#allocation8 + $0x300] sm:$0xff] }
  0xf9   :  { %3867 = vmatpush1.bf16.msra.mxu0 %v7185_v63  ;;  %v2787_v63 = vld [vmem:[#allocation8 + $0x320] sm:$0xff] }
  0xfa   :  { %3869 = vmatprep.subr.bf16.mxu0 %v3868_v20  ;;  %1592 = vmatmul.mubr.f32.vlgmr.msra.gmra.mrb[0].mxu1 %v7188_v50  ;;  %v2788_v20 = vld [vmem:[#allocation8 + $0x328] sm:$0xff]  ;;  %v1887_v50 = vld [vmem:[#allocation8 + $0x220] sm:$0xff]  ;;  %v2825_v23 = vand.u32 4294901760, %v2787_v63 }
  0xfb   :  { %4063 = vmatpush1.bf16.msra.mxu1 %v5351_v17  ;;  %1758 = vmatprep.mubr.f32.mxu1 %v7059_v29  ;;  %v2784_v17 = vld [vmem:[#allocation8 + $0x308] sm:$0xff] }
  0xfc   :  { %687 = vmatmul.mubr.f32.vlgmr.msra.gmra.mrb[0].mxu0 %v7187_v22  ;;  %4065 = vmatprep.subr.bf16.mxu1 %v5364_v31  ;;  %v1883_v31 = vld [vmem:[#allocation8 + $0x200] sm:$0xff] }
  0xfd   :  { %3871 = vmatpush1.bf16.msra.mxu0 %v5345_v21  ;;  %853 = vmatprep.mubr.f32.mxu0 %v7059_v29  ;;  %v1884_v21 = vld [vmem:[#allocation8 + $0x208] sm:$0xff]  ;;  %v1917_v34 = vand.u32 4294901760, %v1883_v31 }
  0xfe   :  { %3873 = vmatprep.subr.bf16.mxu0 %v5358_v4  ;;  %v2786_v4 = vld [vmem:[#allocation8 + $0x318] sm:$0xff] }
  0xff   :  { %4067 = vmatpush1.bf16.msra.mxu1 %v5376_v9  ;;  %v1919_v9 = vand.u32 4294901760, %v1886_v1  ;;  %v2819_v22 = vand.u32 4294901760, %v2786_v4 }
 0x100   :  { %4069 = vmatprep.subr.bf16.mxu1 %v5388_v62  ;;  %v2815_v62 = vand.u32 4294901760, %v2784_v17 }
 0x101   :  { %3875 = vmatpush1.bf16.msra.mxu0 %v5370_v18  ;;  %v1915_v18 = vand.u32 4294901760, %v1884_v21 }
 0x102   :  { %3877 = vmatprep.subr.bf16.mxu0 %v5382_v51  ;;  %v2785_v51 = vld [vmem:[#allocation8 + $0x310] sm:$0xff] }
 0x103   :  { %4071 = vmatpush1.bf16.msra.mxu1 %v5400_v26  ;;  %v5618_v26 = vpack.c.bf16 %v1919_v9, %v1915_v18  ;;  %v5620_v16 = vsub.f32 %v1884_v21, %v1915_v18  ;;  %v5635_v21 = vsub.f32 %v1883_v31, %v1917_v34  ;;  %v2823_v18 = vand.u32 4294901760, %v2788_v20 }
 0x104   :  { %4073 = vmatprep.subr.bf16.mxu1 %v5412_v28  ;;  %v2821_v28 = vand.u32 4294901760, %v2785_v51  ;;  %v5648_v31 = vsub.f32 %v1888_v43, %v1923_v61 }
 0x105   :  { %3879 = vmatpush1.bf16.msra.mxu0 %v5394_v6  ;;  %v1921_v6 = vand.u32 4294901760, %v1885_v56  ;;  %7189 = vst [vmem:[#allocation36_spill] sm:$0xff] %v5618_v26  ;;  %7190 = vst [vmem:[#allocation37_spill] sm:$0xff] %v5620_v16  ;;  %v5657_v43 = vsub.f32 %v2788_v20, %v2823_v18 }
 0x106   :  { %3881 = vmatprep.subr.bf16.mxu0 %v5406_v15  ;;  %v2817_v15 = vand.u32 4294901760, %v2783_v7  ;;  %7196 = vst [vmem:[#allocation48_spill] sm:$0xff] %v5635_v21  ;;  %7203 = vst [vmem:[#allocation57_spill] sm:$0xff] %v5648_v31  ;;  %v1896_v21 = vld [vmem:[#allocation8 + $0x268] sm:$0xff] }
 0x107   :  { %4075 = vmatpush1.bf16.msra.mxu1 %v5424_v58  ;;  %v5625_v58 = vpack.c.bf16 %v2819_v22, %v2815_v62  ;;  %v5631_v26 = vpack.c.bf16 %v1921_v6, %v1917_v34  ;;  %v2792_v34 = vld [vmem:[#allocation8 + $0x348] sm:$0xff]  ;;  %7209 = vst [vmem:[#allocation74_spill] sm:$0xff] %v5657_v43 }
 0x108   :  { %4077 = vmatprep.subr.bf16.mxu1 %v5436_v24  ;;  %v5629_v24 = vsub.f32 %v2786_v4, %v2819_v22  ;;  %v5640_v4 = vpack.c.bf16 %v2821_v28, %v2817_v15  ;;  %v1925_v22 = vand.u32 4294901760, %v1887_v50 }
 0x109   :  { %3883 = vmatpush1.bf16.msra.mxu0 %v5418_v40  ;;  %v5622_v40 = vsub.f32 %v1886_v1, %v1919_v9  ;;  %7192 = vst [vmem:[#allocation40_spill] sm:$0xff] %v5625_v58  ;;  %7195 = vst [vmem:[#allocation47_spill] sm:$0xff] %v5631_v26  ;;  %v5637_v1 = vsub.f32 %v1885_v56, %v1921_v6  ;;  %v2827_v9 = vand.u32 4294901760, %v2790_v30  ;;  %v1894_v58 = vld [vmem:[#allocation8 + $0x258] sm:$0xff]  ;;  %v1929_v26 = vand.u32 4294901760, %v1889_v59 }
 0x10a   :  { %3885 = vmatprep.subr.bf16.mxu0 %v5430_v2  ;;  %v5627_v2 = vsub.f32 %v2784_v17, %v2815_v62  ;;  %7194 = vst [vmem:[#allocation44_spill] sm:$0xff] %v5629_v24  ;;  %v7198_v17 = vld [vmem:[#allocation45_spill] sm:$0xff]  ;;  %7199 = vst [vmem:[#allocation51_spill] sm:$0xff] %v5640_v4  ;;  %v5642_v62 = vsub.f32 %v2783_v7, %v2817_v15  ;;  %v5650_v56 = vsub.f32 %v1890_v27, %v1927_v39  ;;  %v1891_v7 = vld [vmem:[#allocation8 + $0x240] sm:$0xff] }
 0x10b   :  { %7191 = vst [vmem:[#allocation39_spill] sm:$0xff] %v5622_v40  ;;  %4079 = vmatpush1.bf16.msra.mxu1 %v5448_v57  ;;  %7197 = vst [vmem:[#allocation50_spill] sm:$0xff] %v5637_v1  ;;  %v5644_v57 = vsub.f32 %v2785_v51, %v2821_v28  ;;  %v2794_v6 = vld [vmem:[#allocation8 + $0x358] sm:$0xff]  ;;  %v1931_v1 = vand.u32 4294901760, %v1892_v47  ;;  %v1935_v4 = vand.u32 4294901760, %v1894_v58  ;;  %v1893_v15 = vld [vmem:[#allocation8 + $0x250] sm:$0xff]  ;;  %v5655_v28 = vpack.c.bf16 %v2827_v9, %v2823_v18 }
 0x10c   :  { %7193 = vst [vmem:[#allocation42_spill] sm:$0xff] %v5627_v2  ;;  %4081 = vmatprep.subr.bf16.mxu1 %v7198_v17  ;;  %7200 = vst [vmem:[#allocation52_spill] sm:$0xff] %v5642_v62  ;;  %v7206_v62 = vld [vmem:[#allocation60_spill] sm:$0xff]  ;;  %v7207_v51 = vld [vmem:[#allocation62_spill] sm:$0xff]  ;;  %v5659_v27 = vsub.f32 %v2790_v30, %v2827_v9  ;;  %v2835_v31 = vand.u32 4294901760, %v2794_v6  ;;  %v5666_v24 = vsub.f32 %v1889_v59, %v1929_v26  ;;  %v1933_v20 = vand.u32 4294901760, %v1891_v7 }
 0x10d   :  { %3887 = vmatpush1.bf16.msra.mxu0 %v5442_v49  ;;  %v2789_v49 = vld [vmem:[#allocation8 + $0x330] sm:$0xff]  ;;  %7201 = vst [vmem:[#allocation54_spill] sm:$0xff] %v5644_v57  ;;  %7204 = vst [vmem:[#allocation67_spill] sm:$0xff] %v5650_v56  ;;  %v2831_v56 = vand.u32 4294901760, %v2792_v34  ;;  %v1937_v18 = vand.u32 4294901760, %v1893_v15  ;;  %v7222_v59 = vld [vmem:[#allocation34_spill] sm:$0xff] }
 0x10e   :  { %3889 = vmatprep.subr.bf16.mxu0 %v5454_v12  ;;  %v5646_v12 = vpack.c.bf16 %v1927_v39, %v1923_v61  ;;  %v2829_v17 = vand.u32 4294901760, %v2789_v49  ;;  %7208 = vst [vmem:[#allocation71_spill] sm:$0xff] %v5655_v28  ;;  %7210 = vst [vmem:[#allocation75_spill] sm:$0xff] %v5659_v27  ;;  %v2791_v61 = vld [vmem:[#allocation8 + $0x340] sm:$0xff]  ;;  %v7211_v39 = vld [vmem:[#allocation63_spill] sm:$0xff] }
 0x10f   :  { %4083 = vmatpush1.bf16.msra.mxu1 %v7206_v62  ;;  %v2793_v57 = vld [vmem:[#allocation8 + $0x350] sm:$0xff]  ;;  %v1898_v62 = vld [vmem:[#allocation8 + $0x278] sm:$0xff]  ;;  %7214 = vst [vmem:[#allocation15_spill] sm:$0xff] %v5666_v24  ;;  %v1895_v27 = vld [vmem:[#allocation8 + $0x260] sm:$0xff] }
 0x110   :  { %7202 = vst [vmem:[#allocation56_spill] sm:$0xff] %v5646_v12  ;;  %4085 = vmatprep.subr.bf16.mxu1 %v7211_v39  ;;  %v5664_v12 = vsub.f32 %v1887_v50, %v1925_v22  ;;  %v7216_v30 = vld [vmem:[#allocation64_spill] sm:$0xff]  ;;  %v5671_v9 = vpack.c.bf16 %v2829_v17, %v2825_v23  ;;  %v5673_v39 = vsub.f32 %v2789_v49, %v2829_v17  ;;  %v2798_v28 = vld [vmem:[#allocation8 + $0x378] sm:$0xff]  ;;  %v1943_v24 = vand.u32 4294901760, %v1898_v62 }
 0x111   :  { %3891 = vmatpush1.bf16.msra.mxu0 %v7205_v41  ;;  %v5662_v41 = vpack.c.bf16 %v1929_v26, %v1925_v22  ;;  %v5677_v50 = vsub.f32 %v1892_v47, %v1931_v1  ;;  %v2796_v22 = vld [vmem:[#allocation8 + $0x368] sm:$0xff]  ;;  %v2837_v26 = vand.u32 4294901760, %v2793_v57  ;;  %v5684_v49 = vpack.c.bf16 %v2835_v31, %v2831_v56 }
 0x112   :  { %3893 = vmatprep.subr.bf16.mxu0 %v7207_v51  ;;  %7213 = vst [vmem:[#allocation78_spill] sm:$0xff] %v5664_v12  ;;  %v5668_v51 = vsub.f32 %v2787_v63, %v2825_v23  ;;  %7217 = vst [vmem:[#allocation81_spill] sm:$0xff] %v5671_v9  ;;  %v7221_v12 = vld [vmem:[#allocation70_spill] sm:$0xff]  ;;  %v2833_v63 = vand.u32 4294901760, %v2791_v61  ;;  %v5682_v23 = vsub.f32 %v1894_v58, %v1935_v4  ;;  %v1941_v58 = vand.u32 4294901760, %v1895_v27 }
 0x113   :  { %7212 = vst [vmem:[#allocation77_spill] sm:$0xff] %v5662_v41  ;;  %7218 = vst [vmem:[#allocation21_spill] sm:$0xff] %v5673_v39  ;;  %v5675_v41 = vpack.c.bf16 %v1935_v4, %v1931_v1  ;;  %4087 = vmatpush1.bf16.msra.mxu1 %v7221_v12  ;;  %v5686_v47 = vsub.f32 %v2792_v34, %v2831_v56  ;;  %v5688_v1 = vsub.f32 %v2794_v6, %v2835_v31  ;;  %v2795_v9 = vld [vmem:[#allocation8 + $0x360] sm:$0xff]  ;;  %v1900_v56 = vld [vmem:[#allocation8 + $0x288] sm:$0xff] }
 0x114   :  { %7215 = vst [vmem:[#allocation19_spill] sm:$0xff] %v5668_v51  ;;  %7220 = vst [vmem:[#allocation22_spill] sm:$0xff] %v5677_v50  ;;  %v1939_v51 = vand.u32 4294901760, %v1896_v21  ;;  %4089 = vmatprep.subr.bf16.mxu1 %v5508_v0  ;;  %v5690_v17 = vpack.c.bf16 %v1937_v18, %v1933_v20  ;;  %v5692_v12 = vsub.f32 %v1891_v7, %v1933_v20  ;;  %v2797_v50 = vld [vmem:[#allocation8 + $0x370] sm:$0xff]  ;;  %v1902_v34 = vld [vmem:[#allocation8 + $0x298] sm:$0xff] }
 0x115   :  { %3895 = vmatpush1.bf16.msra.mxu0 %v7216_v30  ;;  %7219 = vst [vmem:[#allocation82_spill] sm:$0xff] %v5675_v41  ;;  %v1897_v30 = vld [vmem:[#allocation8 + $0x270] sm:$0xff]  ;;  %7223 = vst [vmem:[#allocation23_spill] sm:$0xff] %v5682_v23  ;;  %v2843_v41 = vand.u32 4294901760, %v2798_v28  ;;  %v5695_v39 = vsub.f32 %v1893_v15, %v1937_v18  ;;  %v5697_v0 = vsub.f32 %v2791_v61, %v2833_v63  ;;  %v2800_v20 = vld [vmem:[#allocation8 + $0x388] sm:$0xff]  ;;  %v2841_v18 = vand.u32 4294901760, %v2795_v9 }
 0x116   :  { %3897 = vmatprep.subr.bf16.mxu0 %v7222_v59  ;;  %7224 = vst [vmem:[#allocation24_spill] sm:$0xff] %v5684_v49  ;;  %7225 = vst [vmem:[#allocation25_spill] sm:$0xff] %v5686_v47  ;;  %v2839_v59 = vand.u32 4294901760, %v2796_v22  ;;  %v1945_v4 = vand.u32 4294901760, %v1897_v30  ;;  %v5701_v31 = vpack.c.bf16 %v2837_v26, %v2833_v63  ;;  %v5703_v6 = vsub.f32 %v2793_v57, %v2837_v26 }
 0x117   :  { %7226 = vst [vmem:[#allocation26_spill] sm:$0xff] %v5688_v1  ;;  %7227 = vst [vmem:[#allocation27_spill] sm:$0xff] %v5690_v17  ;;  %4091 = vmatpush1.bf16.msra.mxu1 %v5522_v8  ;;  %v5705_v7 = vpack.c.bf16 %v1943_v24, %v1939_v51  ;;  %v5708_v15 = vsub.f32 %v1896_v21, %v1939_v51  ;;  %v5710_v61 = vsub.f32 %v1898_v62, %v1943_v24  ;;  %v1901_v8 = vld [vmem:[#allocation8 + $0x290] sm:$0xff]  ;;  %v2799_v51 = vld [vmem:[#allocation8 + $0x380] sm:$0xff] }
 0x118   :  { %7228 = vst [vmem:[#allocation28_spill] sm:$0xff] %v5692_v12  ;;  %7229 = vst [vmem:[#allocation29_spill] sm:$0xff] %v5695_v39  ;;  %4093 = vmatprep.subr.bf16.mxu1 %v7146_v3  ;;  %v1899_v39 = vld [vmem:[#allocation8 + $0x280] sm:$0xff]  ;;  %v7236_v12 = vld [vmem:[#allocation79_spill] sm:$0xff]  ;;  %v5715_v57 = vsub.f32 %v2796_v22, %v2839_v59  ;;  %v1947_v63 = vand.u32 4294901760, %v1900_v56  ;;  %v1951_v26 = vand.u32 4294901760, %v1902_v34  ;;  %v5719_v3 = vsub.f32 %v2798_v28, %v2843_v41 }
 0x119   :  { %3899 = vmatpush1.bf16.msra.mxu0 %v5516_v11  ;;  %7230 = vst [vmem:[#allocation30_spill] sm:$0xff] %v5697_v0  ;;  %7231 = vst [vmem:[#allocation31_spill] sm:$0xff] %v5701_v31  ;;  %v2802_v11 = vld [vmem:[#allocation8 + $0x398] sm:$0xff]  ;;  %v2845_v0 = vand.u32 4294901760, %v2797_v50  ;;  %v5721_v24 = vpack.c.bf16 %v1945_v4, %v1941_v58  ;;  %v2847_v21 = vand.u32 4294901760, %v2800_v20  ;;  %v5725_v22 = vsub.f32 %v1895_v27, %v1941_v58  ;;  %v1903_v31 = vld [vmem:[#allocation8 + $0x2a0] sm:$0xff] }
 0x11a   :  { %3901 = vmatprep.subr.bf16.mxu0 %v7145_v55  ;;  %7232 = vst [vmem:[#allocation32_spill] sm:$0xff] %v5703_v6  ;;  %7233 = vst [vmem:[#allocation33_spill] sm:$0xff] %v5705_v7  ;;  %v5713_v55 = vpack.c.bf16 %v2843_v41, %v2839_v59  ;;  %v7239_v6 = vld [vmem:[#allocation80_spill] sm:$0xff]  ;;  %v2851_v62 = vand.u32 4294901760, %v2802_v11  ;;  %v5727_v59 = vsub.f32 %v1897_v30, %v1945_v4  ;;  %v1906_v7 = vld [vmem:[#allocation8 + $0x2b8] sm:$0xff]  ;;  %v2849_v30 = vand.u32 4294901760, %v2799_v51 }
 0x11b   :  { %7234 = vst [vmem:[#allocation35_spill] sm:$0xff] %v5708_v15  ;;  %7235 = vst [vmem:[#allocation38_spill] sm:$0xff] %v5710_v61  ;;  %1760 = vmatmul.mubr.f32.vlgmr.msra.gmra.mrb[0].mxu1 %v7239_v6  ;;  %v2801_v61 = vld [vmem:[#allocation8 + $0x390] sm:$0xff]  ;;  %v1949_v15 = vand.u32 4294901760, %v1899_v39  ;;  %v5731_v28 = vpack.c.bf16 %v2845_v0, %v2841_v18  ;;  %v5733_v41 = vsub.f32 %v2795_v9, %v2841_v18  ;;  %v2806_v4 = vld [vmem:[#allocation8 + $0x3b8] sm:$0xff] }
 0x11c   :  { %855 = vmatmul.mubr.f32.vlgmr.msra.gmra.mrb[0].mxu0 %v7236_v12  ;;  %7237 = vst [vmem:[#allocation41_spill] sm:$0xff] %v5713_v55  ;;  %7238 = vst [vmem:[#allocation43_spill] sm:$0xff] %v5715_v57  ;;  %4095 = vmatpush1.bf16.msra.mxu1 %v7150_v52  ;;  %v1904_v55 = vld [vmem:[#allocation8 + $0x2a8] sm:$0xff]  ;;  %v5740_v27 = vsub.f32 %v1900_v56, %v1947_v63  ;;  %v2853_v58 = vand.u32 4294901760, %v2801_v61  ;;  %v5745_v9 = vpack.c.bf16 %v2851_v62, %v2847_v21 }
 0x11d   :  { %3903 = vmatpush1.bf16.msra.mxu0 %v7148_v33  ;;  %7240 = vst [vmem:[#allocation46_spill] sm:$0xff] %v5719_v3  ;;  %7241 = vst [vmem:[#allocation49_spill] sm:$0xff] %v5721_v24  ;;  %v1953_v33 = vand.u32 4294901760, %v1901_v8  ;;  %4097 = vmatprep.subr.bf16.mxu1 %v7152_v25  ;;  %v5735_v24 = vsub.f32 %v2797_v50, %v2845_v0  ;;  %v2804_v52 = vld [vmem:[#allocation8 + $0x3a8] sm:$0xff]  ;;  %v1905_v25 = vld [vmem:[#allocation8 + $0x2b0] sm:$0xff]  ;;  %v1955_v50 = vand.u32 4294901760, %v1904_v55 }
 0x11e   :  { %3905 = vmatprep.subr.bf16.mxu0 %v7151_v37  ;;  %7242 = vst [vmem:[#allocation53_spill] sm:$0xff] %v5727_v59  ;;  %957 = vmatprep.mubr.f32.mxu0 %v7059_v29  ;;  %7243 = vst [vmem:[#allocation55_spill] sm:$0xff] %v5731_v28  ;;  %v5738_v37 = vpack.c.bf16 %v1951_v26, %v1947_v63  ;;  %v5743_v59 = vsub.f32 %v1902_v34, %v1951_v26  ;;  %v1959_v0 = vand.u32 4294901760, %v1906_v7  ;;  %v2805_v28 = vld [vmem:[#allocation8 + $0x3b0] sm:$0xff] }
 0x11f   :  { %7244 = vst [vmem:[#allocation16_spill] sm:$0xff] %v5733_v41  ;;  %7245 = vst [vmem:[#allocation17_spill] sm:$0xff] %v5735_v24  ;;  %1862 = vmatprep.mubr.f32.mxu1 %v7059_v29  ;;  %v5749_v18 = vsub.f32 %v2800_v20, %v2847_v21  ;;  %v5751_v56 = vsub.f32 %v2802_v11, %v2851_v62  ;;  %v5753_v63 = vpack.c.bf16 %v1953_v33, %v1949_v15  ;;  %v2808_v11 = vld [vmem:[#allocation8 + $0x3c8] sm:$0xff]  ;;  %v1909_v41 = vld [vmem:[#allocation8 + $0x2d0] sm:$0xff] }
 0x120   :  { %7246 = vst [vmem:[#allocation18_spill] sm:$0xff] %v5738_v37  ;;  %7247 = vst [vmem:[#allocation20_spill] sm:$0xff] %v5740_v27  ;;  %4099 = vmatpush1.bf16.msra.mxu1 %v7154_v53  ;;  %v2803_v37 = vld [vmem:[#allocation8 + $0x3a0] sm:$0xff]  ;;  %v2859_v34 = vand.u32 4294901760, %v2806_v4  ;;  %v1957_v26 = vand.u32 4294901760, %v1903_v31  ;;  %v1910_v27 = vld [vmem:[#allocation8 + $0x2d8] sm:$0xff]  ;;  %v5756_v24 = vsub.f32 %v1899_v39, %v1949_v15  ;;  %v5758_v53 = vsub.f32 %v1901_v8, %v1953_v33 }
 0x121   :  { %3907 = vmatpush1.bf16.msra.mxu0 %v7153_v32  ;;  %7248 = vst [vmem:[#allocation45_spill] sm:$0xff] %v5743_v59  ;;  %7249 = vst [vmem:[#allocation59_spill] sm:$0xff] %v5745_v9  ;;  %4101 = vmatprep.subr.bf16.mxu1 %v7156_v10  ;;  %v2855_v32 = vand.u32 4294901760, %v2804_v52  ;;  %v1961_v9 = vand.u32 4294901760, %v1905_v25  ;;  %v1908_v59 = vld [vmem:[#allocation8 + $0x2c8] sm:$0xff]  ;;  %v5762_v20 = vsub.f32 %v2799_v51, %v2849_v30  ;;  %v2857_v62 = vand.u32 4294901760, %v2803_v37 }
 0x122   :  { %3909 = vmatprep.subr.bf16.mxu0 %v7155_v48  ;;  %7250 = vst [vmem:[#allocation60_spill] sm:$0xff] %v5749_v18  ;;  %7251 = vst [vmem:[#allocation62_spill] sm:$0xff] %v5751_v56  ;;  %v5760_v48 = vpack.c.bf16 %v2853_v58, %v2849_v30  ;;  %v5765_v21 = vsub.f32 %v2801_v61, %v2853_v58  ;;  %v5767_v10 = vpack.c.bf16 %v1959_v0, %v1955_v50  ;;  %v2810_v56 = vld [vmem:[#allocation8 + $0x3d8] sm:$0xff]  ;;  %v1907_v18 = vld [vmem:[#allocation8 + $0x2c0] sm:$0xff] }
 0x123   :  { %7252 = vst [vmem:[#allocation63_spill] sm:$0xff] %v5753_v63  ;;  %7253 = vst [vmem:[#allocation64_spill] sm:$0xff] %v5756_v24  ;;  %v2861_v63 = vand.u32 4294901760, %v2805_v28  ;;  %v5771_v39 = vsub.f32 %v1904_v55, %v1955_v50  ;;  %v5773_v15 = vsub.f32 %v1906_v7, %v1959_v0  ;;  %v1963_v8 = vand.u32 4294901760, %v1908_v59  ;;  %v2807_v58 = vld [vmem:[#allocation8 + $0x3c0] sm:$0xff]  ;;  %v1912_v7 = vld [vmem:[#allocation8 + $0x2e8] sm:$0xff] }
 0x124   :  { %7254 = vst [vmem:[#allocation70_spill] sm:$0xff] %v5760_v48  ;;  %7255 = vst [vmem:[#allocation34_spill] sm:$0xff] %v5767_v10  ;;  %4103 = vmatpush1.bf16.msra.mxu1 %v7158_v36  ;;  %v1967_v51 = vand.u32 4294901760, %v1910_v27  ;;  %v5778_v61 = vsub.f32 %v2804_v52, %v2855_v32  ;;  %v5780_v33 = vsub.f32 %v2806_v4, %v2859_v34  ;;  %v2809_v36 = vld [vmem:[#allocation8 + $0x3d0] sm:$0xff]  ;;  %v2863_v10 = vand.u32 4294901760, %v2808_v11  ;;  %v1914_v0 = vld [vmem:[#allocation8 + $0x2f8] sm:$0xff] }
 0x125   :  { %3911 = vmatpush1.bf16.msra.mxu0 %v7157_v14  ;;  %7256 = vst [vmem:[#allocation79_spill] sm:$0xff] %v5771_v39  ;;  %7257 = vst [vmem:[#allocation80_spill] sm:$0xff] %v5773_v15  ;;  %4105 = vmatprep.subr.bf16.mxu1 %v7160_v44  ;;  %v5776_v14 = vpack.c.bf16 %v2859_v34, %v2855_v32  ;;  %v5782_v30 = vpack.c.bf16 %v1961_v9, %v1957_v26  ;;  %v1965_v55 = vand.u32 4294901760, %v1907_v18 }
 0x126   :  { %3913 = vmatprep.subr.bf16.mxu0 %v7159_v13  ;;  %7259 = vst [vmem:[#allocation84_spill] sm:$0xff] %v5778_v61  ;;  %7260 = vst [vmem:[#allocation85_spill] sm:$0xff] %v5780_v33  ;;  %v2867_v13 = vand.u32 4294901760, %v2810_v56  ;;  %v1969_v50 = vand.u32 4294901760, %v1909_v41  ;;  %v5785_v48 = vsub.f32 %v1903_v31, %v1957_v26  ;;  %v5787_v44 = vsub.f32 %v1905_v25, %v1961_v9  ;;  %v2812_v33 = vld [vmem:[#allocation8 + $0x3e8] sm:$0xff]  ;;  %v1911_v26 = vld [vmem:[#allocation8 + $0x2e0] sm:$0xff] }
 0x127   :  { %7258 = vst [vmem:[#allocation83_spill] sm:$0xff] %v5776_v14  ;;  %7261 = vst [vmem:[#allocation86_spill] sm:$0xff] %v5782_v30  ;;  %v5789_v52 = vpack.c.bf16 %v2861_v63, %v2857_v62  ;;  %v5791_v4 = vsub.f32 %v2803_v37, %v2857_v62  ;;  %v5795_v32 = vsub.f32 %v2805_v28, %v2861_v63  ;;  %v2865_v30 = vand.u32 4294901760, %v2807_v58 }
 0x128   :  { %7262 = vst [vmem:[#allocation87_spill] sm:$0xff] %v5785_v48  ;;  %4107 = vmatpush1.bf16.msra.mxu1 %v7162_v45  ;;  %v5797_v34 = vpack.c.bf16 %v1967_v51, %v1963_v8  ;;  %v2869_v14 = vand.u32 4294901760, %v2809_v36  ;;  %v5800_v31 = vsub.f32 %v1908_v59, %v1963_v8  ;;  %v5802_v25 = vsub.f32 %v1910_v27, %v1967_v51  ;;  %v1913_v45 = vld [vmem:[#allocation8 + $0x2f0] sm:$0xff]  ;;  %v1881_v8 = vld [vmem:[#allocation7] sm:$0xff]  ;;  %v2781_v51 = vld [vmem:[%s6632_s3] sm:$0xff] }
 0x129   :  { %3915 = vmatpush1.bf16.msra.mxu0 %v7161_v19  ;;  %7263 = vst [vmem:[#allocation88_spill] sm:$0xff] %v5789_v52  ;;  %v2814_v19 = vld [vmem:[#allocation8 + $0x3f8] sm:$0xff]  ;;  %4109 = vmatprep.subr.bf16.mxu1 %v7164_v35  ;;  %v1971_v37 = vand.u32 4294901760, %v1912_v7  ;;  %v1975_v9 = vand.u32 4294901760, %v1914_v0  ;;  %v5804_v62 = vpack.c.bf16 %v2867_v13, %v2863_v10  ;;  %v5808_v28 = vsub.f32 %v2810_v56, %v2867_v13 }
 0x12a   :  { %3917 = vmatprep.subr.bf16.mxu0 %v7163_v54  ;;  %7264 = vst [vmem:[#allocation89_spill] sm:$0xff] %v5797_v34  ;;  %7265 = vst [vmem:[#allocation90_spill] sm:$0xff] %v5800_v31  ;;  %v5806_v54 = vsub.f32 %v2808_v11, %v2863_v10  ;;  %v5810_v63 = vpack.c.bf16 %v1969_v50, %v1965_v55  ;;  %v5813_v34 = vsub.f32 %v1907_v18, %v1965_v55  ;;  %v2811_v55 = vld [vmem:[#allocation8 + $0x3e0] sm:$0xff] }
 0x12b   :  { %7266 = vst [vmem:[#allocation91_spill] sm:$0xff] %v5804_v62  ;;  %7267 = vst [vmem:[#allocation92_spill] sm:$0xff] %v5808_v28  ;;  %v5815_v35 = vsub.f32 %v1909_v41, %v1969_v50  ;;  %v2871_v59 = vand.u32 4294901760, %v2812_v33  ;;  %v2875_v27 = vand.u32 4294901760, %v2814_v19  ;;  %v5822_v56 = vpack.c.bf16 %v2869_v14, %v2865_v30 }
 0x12c   :  { %7268 = vst [vmem:[#allocation93_spill] sm:$0xff] %v5810_v63  ;;  %4111 = vmatpush1.bf16.msra.mxu1 %v7166_v5  ;;  %v5824_v11 = vsub.f32 %v2807_v58, %v2865_v30  ;;  %v1977_v18 = vand.u32 4294901760, %v1913_v45  ;;  %v5827_v41 = vsub.f32 %v2809_v36, %v2869_v14  ;;  %v5829_v10 = vpack.c.bf16 %v1975_v9, %v1971_v37 }
 0x12d   :  { %3919 = vmatpush1.bf16.msra.mxu0 %v7165_v38  ;;  %7269 = vst [vmem:[#allocation94_spill] sm:$0xff] %v5815_v35  ;;  %7270 = vst [vmem:[#allocation95_spill] sm:$0xff] %v5822_v56  ;;  %v1973_v38 = vand.u32 4294901760, %v1911_v26  ;;  %4113 = vmatprep.subr.bf16.mxu1 %v7168_v42  ;;  %v5831_v13 = vsub.f32 %v1912_v7, %v1971_v37  ;;  %v5834_v5 = vsub.f32 %v1914_v0, %v1975_v9  ;;  %v7279_v7 = vld [vmem:[#allocation44_spill] sm:$0xff]  ;;  %v7280_v0 = vld [vmem:[#allocation58_spill] sm:$0xff] }
 0x12e   :  { %3921 = vmatprep.subr.bf16.mxu0 %v7167_v60  ;;  %7271 = vst [vmem:[#allocation96_spill] sm:$0xff] %v5824_v11  ;;  %7272 = vst [vmem:[#allocation97_spill] sm:$0xff] %v5829_v10  ;;  %v5836_v60 = vld [vmem:[#allocation8 + $0x3f0] sm:$0xff]  ;;  %v5839_v58 = vand.u32 4294901760, %v1881_v8  ;;  %v5841_v56 = vand.u32 4294901760, %v2781_v51  ;;  %v5844_v42 = vpack.c.bf16 %v2875_v27, %v2871_v59  ;;  %v5846_v14 = vsub.f32 %v2812_v33, %v2871_v59  ;;  %v7281_v9 = vld [vmem:[#allocation61_spill] sm:$0xff] }
 0x12f   :  { %7273 = vst [vmem:[#allocation98_spill] sm:$0xff] %v5831_v13  ;;  %7274 = vst [vmem:[#allocation99_spill] sm:$0xff] %v5834_v5  ;;  %v6896_v36 = vand.u32 4294901760, %v5627_v2  ;;  %v5852_v50 = vsub.f32 %v2814_v19, %v2875_v27  ;;  %v5854_v30 = vpack.c.bf16 %v1977_v18, %v1973_v38  ;;  %v5856_v10 = vsub.f32 %v1911_v26, %v1973_v38  ;;  %v7291_v38 = vld [vmem:[#allocation50_spill] sm:$0xff] }
 0x130   :  { %7275 = vst [vmem:[#allocation100_spill] sm:$0xff] %v5839_v58  ;;  %7276 = vst [vmem:[#allocation101_spill] sm:$0xff] %v5841_v56  ;;  %4115 = vmatpush1.bf16.msra.mxu1 %v7280_v0  ;;  %v2873_v63 = vand.u32 4294901760, %v2811_v55  ;;  %v7287_v59 = vand.u32 4294901760, %v5620_v16  ;;  %v7288_v0 = vld [vmem:[#allocation48_spill] sm:$0xff]  ;;  %v7289_v19 = vand.u32 4294901760, %v5622_v40  ;;  %v5874_v26 = vsub.f32 %v1881_v8, %v5839_v58 }
 0x131   :  { %3923 = vmatpush1.bf16.msra.mxu0 %v7169_v46  ;;  %7277 = vst [vmem:[#allocation102_spill] sm:$0xff] %v5844_v42  ;;  %7278 = vst [vmem:[#allocation103_spill] sm:$0xff] %v5846_v14  ;;  %v7285_v46 = vld [vmem:[#allocation65_spill] sm:$0xff]  ;;  %v5859_v42 = vsub.f32 %v1913_v45, %v1977_v18  ;;  %v5878_v18 = vsub.f32 %v2781_v51, %v5841_v56  ;;  %v7297_v58 = vld [vmem:[#allocation68_spill] sm:$0xff] }
 0x132   :  { %3925 = vmatprep.subr.bf16.mxu0 %v7281_v9  ;;  %7282 = vst [vmem:[#allocation58_spill] sm:$0xff] %v5852_v50  ;;  %7283 = vst [vmem:[#allocation61_spill] sm:$0xff] %v5854_v30  ;;  %4117 = vmatprep.subr.bf16.mxu1 %v7285_v46  ;;  %v5865_v37 = vsub.f32 %v5620_v16, %v7287_v59  ;;  %v5871_v27 = vsub.f32 %v5622_v40, %v7289_v19  ;;  %v7293_v46 = vld [vmem:[#allocation66_spill] sm:$0xff]  ;;  %v7294_v9 = vand.u32 4294901760, %v7279_v7  ;;  %v7295_v19 = vld [vmem:[#allocation52_spill] sm:$0xff] }
 0x133   :  { %7284 = vst [vmem:[#allocation104_spill] sm:$0xff] %v5856_v10  ;;  %7286 = vst [vmem:[#allocation65_spill] sm:$0xff] %v5859_v42  ;;  %v2926_v59 = vsub.f32 %v5627_v2, %v6896_v36  ;;  %v7296_v16 = vld [vmem:[#allocation54_spill] sm:$0xff]  ;;  %v7298_v45 = vld [vmem:[#allocation69_spill] sm:$0xff]  ;;  %v5891_v51 = vsub.f32 %v2811_v55, %v2873_v63  ;;  %v7307_v36 = vand.u32 4294901760, %v7291_v38 }
 0x134   :  { %7290 = vst [vmem:[#allocation105_spill] sm:$0xff] %v5874_v26  ;;  %7292 = vst [vmem:[#allocation106_spill] sm:$0xff] %v5878_v18  ;;  %v2938_v33 = vsub.f32 %v7279_v7, %v7294_v9  ;;  %4119 = vmatpush1.bf16.msra.mxu1 %v7297_v58  ;;  %v7300_v56 = vld [vmem:[#allocation57_spill] sm:$0xff]  ;;  %v7301_v30 = vld [vmem:[#allocation67_spill] sm:$0xff]  ;;  %v7303_v9 = vand.u32 4294901760, %v5836_v60  ;;  %v2027_v8 = vand.u32 4294901760, %v5865_v37 }
 0x135   :  { %3927 = vmatpush1.bf16.msra.mxu0 %v7293_v46  ;;  %7299 = vst [vmem:[#allocation66_spill] sm:$0xff] %v5891_v51  ;;  %v7302_v2 = vld [vmem:[#allocation72_spill] sm:$0xff]  ;;  %v7305_v58 = vand.u32 4294901760, %v7288_v0  ;;  %v7306_v55 = vld [vmem:[#allocation75_spill] sm:$0xff]  ;;  %v2039_v46 = vand.u32 4294901760, %v5871_v27  ;;  %v7310_v40 = vand.u32 4294901760, %v7296_v16 }
 0x136   :  { %3929 = vmatprep.subr.bf16.mxu0 %v7298_v45  ;;  %4121 = vmatprep.subr.bf16.mxu1 %v7302_v2  ;;  %v5899_v7 = vpack.c.bf16 %v7303_v9, %v2873_v63  ;;  %v2044_v2 = vsub.f32 %v7291_v38, %v7307_v36  ;;  %v7308_v63 = vld [vmem:[#allocation73_spill] sm:$0xff]  ;;  %v2927_v9 = vand.u32 4294901760, %v2926_v59  ;;  %v2939_v37 = vand.u32 4294901760, %v2938_v33  ;;  %v7312_v42 = vld [vmem:[#allocation36_spill] sm:$0xff] }
 0x137   :  { %v2032_v45 = vsub.f32 %v7288_v0, %v7305_v58  ;;  %v2944_v27 = vsub.f32 %v7296_v16, %v7310_v40  ;;  %v7311_v0 = vld [vmem:[#allocation76_spill] sm:$0xff]  ;;  %v7313_v36 = vand.u32 4294901760, %v7300_v56  ;;  %v7315_v59 = vand.u32 4294901760, %v5657_v43  ;;  %v7319_v16 = vld [vmem:[#allocation15_spill] sm:$0xff] }
 0x138   :  { %7304 = vst [vmem:[#allocation68_spill] sm:$0xff] %v5899_v7  ;;  %v7309_v7 = vand.u32 4294901760, %v7295_v19  ;;  %4123 = vmatpush1.bf16.msra.mxu1 %v7311_v0  ;;  %v7317_v10 = vld [vmem:[#allocation40_spill] sm:$0xff]  ;;  %v7318_v0 = vand.u32 4294901760, %v7306_v55  ;;  %v7322_v38 = vand.u32 4294901760, %v5878_v18 }
 0x139   :  { %3931 = vmatpush1.bf16.msra.mxu0 %v7308_v63  ;;  %v2050_v51 = vsub.f32 %v7300_v56, %v7313_v36  ;;  %v7314_v63 = vand.u32 4294901760, %v7301_v30  ;;  %4317 = vmatprep.subr.bf16.mxu1 %v7317_v10  ;;  %v2033_v40 = vand.u32 4294901760, %v2032_v45  ;;  %v7320_v36 = vld [vmem:[#allocation19_spill] sm:$0xff]  ;;  %v7323_v10 = vld [vmem:[#allocation21_spill] sm:$0xff]  ;;  %v2945_v50 = vand.u32 4294901760, %v2944_v27 }
 0x13a   :  { %v2932_v58 = vsub.f32 %v7295_v19, %v7309_v7  ;;  %4125 = vmatprep.subr.bf16.mxu0 %v7312_v42  ;;  %v2950_v7 = vsub.f32 %v5657_v43, %v7315_v59  ;;  %v7316_v19 = vld [vmem:[#allocation78_spill] sm:$0xff]  ;;  %v2962_v42 = vsub.f32 %v7306_v55, %v7318_v0  ;;  %v2045_v59 = vand.u32 4294901760, %v2044_v2  ;;  %v7324_v0 = vld [vmem:[#allocation47_spill] sm:$0xff]  ;;  %v7327_v2 = vld [vmem:[#allocation56_spill] sm:$0xff] }
 0x13b   :  { %v2062_v33 = vsub.f32 %v7301_v30, %v7314_v63  ;;  %v7321_v63 = vand.u32 4294901760, %v5874_v26  ;;  %v5946_v45 = vsub.f32 %v5878_v18, %v7322_v38  ;;  %1864 = vmatmul.mubr.f32.vlgmr.msra.gmra.mrb[0].mxu1 %v7239_v6  ;;  %v7328_v18 = vand.u32 4294901760, %v7316_v19  ;;  %v7329_v6 = vld [vmem:[#allocation71_spill] sm:$0xff] }
 0x13c   :  { %959 = vmatmul.mubr.f32.vlgmr.msra.gmra.mrb[0].mxu0 %v7236_v12  ;;  %v2933_v56 = vand.u32 4294901760, %v2932_v58  ;;  %v7325_v12 = vld [vmem:[#allocation22_spill] sm:$0xff]  ;;  %v2951_v38 = vand.u32 4294901760, %v2950_v7  ;;  %v2963_v58 = vand.u32 4294901760, %v2962_v42  ;;  %v7330_v27 = vand.u32 4294901760, %v7319_v16  ;;  %2911 = vmatprep.mubr.f32.mxu1 %v7059_v29 }
 0x13d   :  { %v5941_v30 = vsub.f32 %v5874_v26, %v7321_v63  ;;  %4127 = vmatpush1.bf16.msra.mxu0 %v7324_v0  ;;  %v7326_v63 = vld [vmem:[#allocation51_spill] sm:$0xff]  ;;  %v2051_v26 = vand.u32 4294901760, %v2050_v51  ;;  %v2063_v5 = vand.u32 4294901760, %v2062_v33  ;;  %v5958_v43 = vsub.f32 %v7316_v19, %v7328_v18  ;;  %2011 = vmatprep.mubr.f32.mxu0 %v7059_v29  ;;  %v7347_v0 = vld [vmem:[#allocation17_spill] sm:$0xff] }
 0x13e   :  { %4319 = vmatpush1.bf16.msra.mxu1 %v7326_v63  ;;  %4129 = vmatprep.subr.bf16.mxu0 %v7327_v2  ;;  %v5965_v14 = vsub.f32 %v7319_v16, %v7330_v27  ;;  %v7331_v55 = vand.u32 4294901760, %v7320_v36  ;;  %v7332_v18 = vand.u32 4294901760, %v5836_v60  ;;  %v5981_v42 = vpack.c.bf16 %v2939_v37, %v2927_v9  ;;  %v7337_v37 = vld [vmem:[#allocation81_spill] sm:$0xff]  ;;  %v7374_v16 = vld [vmem:[#allocation59_spill] sm:$0xff] }
 0x13f   :  { %4321 = vmatprep.subr.bf16.mxu1 %v7329_v6  ;;  %v5978_v6 = vpack.c.bf16 %v2039_v46, %v2027_v8  ;;  %v7333_v27 = vand.u32 4294901760, %v7323_v10  ;;  %v5990_v63 = vpack.c.bf16 %v2045_v59, %v2033_v40  ;;  %v7336_v46 = vand.u32 4294901760, %v5682_v23  ;;  %v7344_v59 = vld [vmem:[#allocation33_spill] sm:$0xff] }
 0x140   :  { %v5970_v51 = vsub.f32 %v7320_v36, %v7331_v55  ;;  %v5976_v7 = vsub.f32 %v5836_v60, %v7332_v18  ;;  %v7334_v55 = vld [vmem:[#allocation77_spill] sm:$0xff]  ;;  %v7335_v60 = vand.u32 4294901760, %v7325_v12  ;;  %v7338_v18 = vld [vmem:[#allocation82_spill] sm:$0xff]  ;;  %v6007_v40 = vpack.c.bf16 %v2063_v5, %v2051_v26  ;;  %v7358_v36 = vld [vmem:[#allocation60_spill] sm:$0xff] }
 0x141   :  { %v5986_v2 = vsub.f32 %v7323_v10, %v7333_v27  ;;  %4131 = vmatpush1.bf16.msra.mxu0 %v7334_v55  ;;  %v6000_v9 = vsub.f32 %v5682_v23, %v7336_v46  ;;  %v6005_v55 = vpack.c.bf16 %v2945_v50, %v2933_v56  ;;  %v7342_v46 = vld [vmem:[#allocation53_spill] sm:$0xff]  ;;  %v7345_v56 = vld [vmem:[#allocation28_spill] sm:$0xff]  ;;  %v7354_v50 = vand.u32 4294901760, %v5725_v22 }
 0x142   :  { %v5995_v8 = vsub.f32 %v7325_v12, %v7335_v60  ;;  %4323 = vmatpush1.bf16.msra.mxu1 %v7337_v37  ;;  %4133 = vmatprep.subr.bf16.mxu0 %v7338_v18  ;;  %7339 = vst [vmem:[#allocation69_spill] sm:$0xff] %v6007_v40  ;;  %v6011_v60 = vpack.c.bf16 %v2963_v58, %v2951_v38  ;;  %v7341_v37 = vand.u32 4294901760, %v5686_v47  ;;  %v7349_v38 = vand.u32 4294901760, %v5719_v3  ;;  %v7351_v58 = vld [vmem:[#allocation41_spill] sm:$0xff]  ;;  %v7353_v23 = vld [vmem:[#allocation20_spill] sm:$0xff] }
 0x143   :  { %4325 = vmatprep.subr.bf16.mxu1 %v5684_v49  ;;  %v7346_v49 = vld [vmem:[#allocation16_spill] sm:$0xff]  ;;  %v7352_v27 = vld [vmem:[#allocation29_spill] sm:$0xff]  ;;  %v7355_v5 = vand.u32 4294901760, %v7342_v46  ;;  %v7361_v33 = vand.u32 4294901760, %v7347_v0  ;;  %v7382_v29 = vand.u32 4294901760, %v5765_v21 }
 0x144   :  { %7340 = vst [vmem:[#allocation72_spill] sm:$0xff] %v6011_v60  ;;  %v6018_v18 = vsub.f32 %v5686_v47, %v7341_v37  ;;  %v7343_v37 = vld [vmem:[#allocation31_spill] sm:$0xff]  ;;  %v7357_v26 = vld [vmem:[#allocation45_spill] sm:$0xff]  ;;  %v7385_v60 = vld [vmem:[#allocation32_spill] sm:$0xff] }
 0x145   :  { %4135 = vmatpush1.bf16.msra.mxu0 %v5690_v17  ;;  %v7348_v17 = vand.u32 4294901760, %v5715_v57  ;;  %v6048_v12 = vpack.c.bf16 %v7355_v5, %v7354_v50  ;;  %v7365_v50 = vld [vmem:[#allocation30_spill] sm:$0xff]  ;;  %v7371_v5 = vand.u32 4294901760, %v7358_v36 }
 0x146   :  { %4327 = vmatpush1.bf16.msra.mxu1 %v7343_v37  ;;  %4137 = vmatprep.subr.bf16.mxu0 %v7344_v59  ;;  %v7363_v37 = vld [vmem:[#allocation49_spill] sm:$0xff]  ;;  %v7364_v59 = vand.u32 4294901760, %v5688_v1 }
 0x147   :  { %v6038_v47 = vpack.c.bf16 %v7349_v38, %v7348_v17  ;;  %4329 = vmatprep.subr.bf16.mxu1 %v7351_v58  ;;  %7356 = vst [vmem:[#allocation76_spill] sm:$0xff] %v6048_v12  ;;  %v7359_v17 = vld [vmem:[#allocation62_spill] sm:$0xff]  ;;  %v7366_v38 = vld [vmem:[#allocation55_spill] sm:$0xff] }
 0x148   :  { %v6063_v19 = vsub.f32 %v5688_v1, %v7364_v59  ;;  %v7367_v12 = vld [vmem:[#allocation18_spill] sm:$0xff]  ;;  %v7372_v10 = vand.u32 4294901760, %v7359_v17 }
 0x149   :  { %7350 = vst [vmem:[#allocation73_spill] sm:$0xff] %v6038_v47  ;;  %v7360_v47 = vand.u32 4294901760, %v7346_v49  ;;  %4139 = vmatpush1.bf16.msra.mxu0 %v7363_v37  ;;  %v7369_v37 = vand.u32 4294901760, %v7357_v26 }
 0x14a   :  { %4331 = vmatpush1.bf16.msra.mxu1 %v7366_v38  ;;  %4141 = vmatprep.subr.bf16.mxu0 %v7367_v12  ;;  %v6082_v1 = vpack.c.bf16 %v7372_v10, %v7371_v5  ;;  %v7375_v12 = vand.u32 4294901760, %v7345_v56  ;;  %v7386_v5 = vld [vmem:[#allocation70_spill] sm:$0xff] }
 0x14b   :  { %v6057_v58 = vpack.c.bf16 %v7361_v33, %v7360_v47  ;;  %4333 = vmatprep.subr.bf16.mxu1 %v7374_v16  ;;  %v7376_v33 = vand.u32 4294901760, %v7352_v27  ;;  %v7380_v16 = vld [vmem:[#allocation85_spill] sm:$0xff] }
 0x14c   :  { %7373 = vst [vmem:[#allocation17_spill] sm:$0xff] %v6082_v1  ;;  %v6088_v47 = vsub.f32 %v7345_v56, %v7375_v12  ;;  %v7381_v56 = vand.u32 4294901760, %v5762_v20  ;;  %v7387_v1 = vld [vmem:[#allocation34_spill] sm:$0xff]  ;;  %v7392_v40 = vand.u32 4294901760, %v7380_v16 }
 0x14d   :  { %7362 = vst [vmem:[#allocation53_spill] sm:$0xff] %v6057_v58  ;;  %v7368_v58 = vand.u32 4294901760, %v7353_v23  ;;  %v6093_v38 = vsub.f32 %v7352_v27, %v7376_v33  ;;  %v7384_v27 = vld [vmem:[#allocation63_spill] sm:$0xff]  ;;  %v7403_v12 = vld [vmem:[#allocation86_spill] sm:$0xff] }
 0x14e   :  { %v6109_v33 = vpack.c.bf16 %v7382_v29, %v7381_v56  ;;  %4143 = vmatpush1.bf16.msra.mxu0 %v7384_v27  ;;  %4335 = vmatpush1.bf16.msra.mxu1 %v7386_v5  ;;  %v7388_v29 = vand.u32 4294901760, %v5771_v39  ;;  %v7389_v56 = vand.u32 4294901760, %v5773_v15  ;;  %v7395_v5 = vld [vmem:[#allocation35_spill] sm:$0xff]  ;;  %v7396_v27 = vld [vmem:[#allocation38_spill] sm:$0xff]  ;;  %v7397_v39 = vand.u32 4294901760, %v5785_v48 }
 0x14f   :  { %v6076_v59 = vpack.c.bf16 %v7369_v37, %v7368_v58  ;;  %v7377_v37 = vand.u32 4294901760, %v5756_v24  ;;  %4145 = vmatprep.subr.bf16.mxu0 %v7387_v1  ;;  %v7391_v58 = vand.u32 4294901760, %v5778_v61  ;;  %v7398_v15 = vand.u32 4294901760, %v5787_v44 }
 0x150   :  { %7383 = vst [vmem:[#allocation45_spill] sm:$0xff] %v6109_v33  ;;  %v6124_v33 = vpack.c.bf16 %v7389_v56, %v7388_v29  ;;  %v7401_v1 = vand.u32 4294901760, %v5795_v32  ;;  %v7414_v56 = vand.u32 4294901760, %v7396_v27 }
 0x151   :  { %7370 = vst [vmem:[#allocation16_spill] sm:$0xff] %v6076_v59  ;;  %v7378_v59 = vand.u32 4294901760, %v5758_v53  ;;  %v6140_v29 = vpack.c.bf16 %v7398_v15, %v7397_v39  ;;  %v7405_v39 = vand.u32 4294901760, %v7385_v60 }
 0x152   :  { %7390 = vst [vmem:[#allocation60_spill] sm:$0xff] %v6124_v33  ;;  %4147 = vmatpush1.bf16.msra.mxu0 %v7403_v12  ;;  %v7413_v33 = vand.u32 4294901760, %v7395_v5 }
 0x153   :  { %v6100_v10 = vpack.c.bf16 %v7378_v59, %v7377_v37  ;;  %v6130_v59 = vpack.c.bf16 %v7392_v40, %v7391_v58  ;;  %v7394_v37 = vld [vmem:[#allocation83_spill] sm:$0xff]  ;;  %7399 = vst [vmem:[#allocation85_spill] sm:$0xff] %v6140_v29  ;;  %v7400_v58 = vand.u32 4294901760, %v5791_v4  ;;  %v6160_v15 = vsub.f32 %v7385_v60, %v7405_v39  ;;  %v7420_v60 = vld [vmem:[#allocation58_spill] sm:$0xff] }
 0x154   :  { %4337 = vmatprep.subr.bf16.mxu1 %v7394_v37  ;;  %v7410_v39 = vand.u32 4294901760, %v5806_v54  ;;  %v7411_v40 = vand.u32 4294901760, %v5808_v28 }
 0x155   :  { %7379 = vst [vmem:[#allocation20_spill] sm:$0xff] %v6100_v10  ;;  %7393 = vst [vmem:[#allocation62_spill] sm:$0xff] %v6130_v59  ;;  %v6149_v59 = vpack.c.bf16 %v7401_v1, %v7400_v58  ;;  %v7404_v10 = vand.u32 4294901760, %v7365_v50  ;;  %4339 = vmatpush1.bf16.msra.mxu1 %v5789_v52  ;;  %v7406_v1 = vld [vmem:[#allocation89_spill] sm:$0xff]  ;;  %v2098_v58 = vsub.f32 %v7395_v5, %v7413_v33  ;;  %v7421_v33 = vand.u32 4294901760, %v5824_v11 }
 0x156   :  { %4149 = vmatprep.subr.bf16.mxu0 %v7406_v1  ;;  %v6178_v12 = vpack.c.bf16 %v7411_v40, %v7410_v39  ;;  %4341 = vmatprep.subr.bf16.mxu1 %v5804_v62  ;;  %v2110_v1 = vsub.f32 %v7396_v27, %v7414_v56  ;;  %v7418_v40 = vld [vmem:[#allocation99_spill] sm:$0xff]  ;;  %v7422_v5 = vand.u32 4294901760, %v5827_v41  ;;  %v7424_v56 = vld [vmem:[#allocation93_spill] sm:$0xff]  ;;  %v7425_v52 = vand.u32 4294901760, %v5715_v57  ;;  %v7427_v39 = vld [vmem:[#allocation104_spill] sm:$0xff] }
 0x157   :  { %7402 = vst [vmem:[#allocation107_spill] sm:$0xff] %v6149_v59  ;;  %v6155_v37 = vsub.f32 %v7365_v50, %v7404_v10  ;;  %v7407_v10 = vand.u32 4294901760, %v5800_v31  ;;  %v7408_v59 = vand.u32 4294901760, %v5802_v25  ;;  %4151 = vmatpush1.bf16.msra.mxu0 %v7424_v56  ;;  %v7430_v11 = vld [vmem:[#allocation97_spill] sm:$0xff]  ;;  %v7432_v56 = vand.u32 4294901760, %v5831_v13  ;;  %v7438_v50 = vld [vmem:[#allocation102_spill] sm:$0xff] }
 0x158   :  { %7412 = vst [vmem:[#allocation109_spill] sm:$0xff] %v6178_v12  ;;  %v7419_v12 = vld [vmem:[#allocation103_spill] sm:$0xff]  ;;  %v6201_v28 = vpack.c.bf16 %v7422_v5, %v7421_v33  ;;  %v2998_v27 = vsub.f32 %v5715_v57, %v7425_v52  ;;  %4153 = vmatprep.subr.bf16.mxu0 %v7430_v11  ;;  %v7431_v5 = vld [vmem:[#allocation66_spill] sm:$0xff]  ;;  %v7433_v52 = vand.u32 4294901760, %v7418_v40  ;;  %v7436_v62 = vand.u32 4294901760, %v7420_v60 }
 0x159   :  { %v6172_v29 = vpack.c.bf16 %v7408_v59, %v7407_v10  ;;  %v7415_v59 = vand.u32 4294901760, %v5813_v34  ;;  %v7416_v10 = vand.u32 4294901760, %v5815_v35  ;;  %v7429_v35 = vld [vmem:[#allocation95_spill] sm:$0xff]  ;;  %v7439_v11 = vand.u32 4294901760, %v5958_v43 }
 0x15a   :  { %7423 = vst [vmem:[#allocation58_spill] sm:$0xff] %v6201_v28  ;;  %4343 = vmatpush1.bf16.msra.mxu1 %v7429_v35  ;;  %v6220_v57 = vpack.c.bf16 %v7433_v52, %v7432_v56  ;;  %v7440_v33 = vand.u32 4294901760, %v5965_v14  ;;  %v7441_v28 = vand.u32 4294901760, %v5970_v51  ;;  %v7442_v13 = vand.u32 4294901760, %v5986_v2  ;;  %v7451_v51 = vld [vmem:[#allocation61_spill] sm:$0xff] }
 0x15b   :  { %7409 = vst [vmem:[#allocation108_spill] sm:$0xff] %v6172_v29  ;;  %v6192_v29 = vpack.c.bf16 %v7416_v10, %v7415_v59  ;;  %v7426_v59 = vand.u32 4294901760, %v5719_v3  ;;  %4345 = vmatprep.subr.bf16.mxu1 %v7438_v50  ;;  %v7443_v56 = vand.u32 4294901760, %v5995_v8  ;;  %v7444_v52 = vand.u32 4294901760, %v6000_v9  ;;  %4155 = vmatpush1.bf16.msra.mxu0 %v7451_v51 }
 0x15c   :  { %7434 = vst [vmem:[#allocation104_spill] sm:$0xff] %v6220_v57  ;;  %v4162_v35 = vpack.c.bf16 %v7440_v33, %v7439_v11  ;;  %v4354_v40 = vpack.c.bf16 %v7442_v13, %v7441_v28  ;;  %v2081_v43 = vand.u32 4294901760, %v6088_v47  ;;  %v2093_v11 = vand.u32 4294901760, %v6093_v38  ;;  %4157 = vmatprep.subr.bf16.mxu0 %v5978_v6 }
 0x15d   :  { %7417 = vst [vmem:[#allocation110_spill] sm:$0xff] %v6192_v29  ;;  %v3010_v10 = vsub.f32 %v5719_v3, %v7426_v59  ;;  %v7428_v29 = vld [vmem:[#allocation65_spill] sm:$0xff]  ;;  %v7435_v59 = vand.u32 4294901760, %v7419_v12  ;;  %v4164_v57 = vpack.c.bf16 %v7444_v52, %v7443_v56  ;;  %v2981_v14 = vand.u32 4294901760, %v6155_v37  ;;  %v7453_v52 = vld [vmem:[#allocation68_spill] sm:$0xff] }
 0x15e   :  { %v7448_v2 = vand.u32 4294901760, %v7431_v5  ;;  %v7449_v28 = vand.u32 4294901760, %v5976_v7  ;;  %v2993_v8 = vand.u32 4294901760, %v6160_v15  ;;  %v2099_v9 = vand.u32 4294901760, %v2098_v58  ;;  %4347 = vmatpush1.bf16.msra.mxu1 %v7453_v52 }
 0x15f   :  { %v6226_v3 = vpack.c.bf16 %v7436_v62, %v7435_v59  ;;  %v7445_v62 = vand.u32 4294901760, %v7427_v39  ;;  %v7446_v59 = vand.u32 4294901760, %v7428_v29  ;;  %v2111_v33 = vand.u32 4294901760, %v2110_v1  ;;  %4349 = vmatprep.subr.bf16.mxu1 %v5981_v42 }
 0x160   :  { %v6254_v13 = vpack.c.bf16 %v7449_v28, %v7448_v2  ;;  %v7452_v56 = vand.u32 4294901760, %v5725_v22  ;;  %v7454_v38 = vand.u32 4294901760, %v6018_v18  ;;  %v7455_v37 = vand.u32 4294901760, %v6063_v19 }
 0x161   :  { %7437 = vst [vmem:[#allocation65_spill] sm:$0xff] %v6226_v3  ;;  %v6245_v3 = vpack.c.bf16 %v7446_v59, %v7445_v62  ;;  %v2999_v59 = vand.u32 4294901760, %v2998_v27  ;;  %v3011_v2 = vand.u32 4294901760, %v3010_v10  ;;  %v7456_v28 = vand.u32 4294901760, %v7342_v46 }
 0x162   :  { %7450 = vst [vmem:[#allocation111_spill] sm:$0xff] %v6254_v13  ;;  %v2104_v47 = vsub.f32 %v5725_v22, %v7452_v56  ;;  %v4356_v62 = vpack.c.bf16 %v7455_v37, %v7454_v38  ;;  %v7457_v1 = vand.u32 4294901760, %v7346_v49  ;;  %v7458_v56 = vand.u32 4294901760, %v7347_v0 }
 0x163   :  { %7447 = vst [vmem:[#allocation66_spill] sm:$0xff] %v6245_v3  ;;  %v2116_v15 = vsub.f32 %v7342_v46, %v7456_v28  ;;  %v7459_v18 = vand.u32 4294901760, %v7353_v23  ;;  %v7460_v27 = vand.u32 4294901760, %v7357_v26  ;;  %v7461_v38 = vand.u32 4294901760, %v5941_v30 }
 0x164   :  { %v3004_v58 = vsub.f32 %v7346_v49, %v7457_v1  ;;  %v3016_v6 = vsub.f32 %v7347_v0, %v7458_v56  ;;  %v7462_v42 = vand.u32 4294901760, %v7358_v36  ;;  %v7463_v28 = vand.u32 4294901760, %v7359_v17 }
 0x165   :  { %v2122_v19 = vsub.f32 %v7353_v23, %v7459_v18  ;;  %v2134_v10 = vsub.f32 %v7357_v26, %v7460_v27  ;;  %2017 = vmatmul.mubr.f32.vlgmr.msra.gmra.mrb[2].mxu0 %v7461_v38  ;;  %v7464_v56 = vand.u32 4294901760, %v5756_v24  ;;  %v7465_v18 = vand.u32 4294901760, %v5758_v53 }
 0x166   :  { %v3022_v37 = vsub.f32 %v7358_v36, %v7462_v42  ;;  %v3034_v1 = vsub.f32 %v7359_v17, %v7463_v28  ;;  %4159 = vmatpush1.bf16.msra.mxu0 %v5990_v63  ;;  %v7466_v30 = vand.u32 4294901760, %v5946_v45  ;;  %v4166_v27 = vpack.c.bf16 %v2093_v11, %v2081_v43  ;;  %v7467_v28 = vld [vmem:[#allocation69_spill] sm:$0xff]  ;;  %v7470_v45 = vld [vmem:[#allocation72_spill] sm:$0xff] }
 0x167   :  { %v2128_v13 = vsub.f32 %v5756_v24, %v7464_v56  ;;  %v2140_v3 = vsub.f32 %v5758_v53, %v7465_v18  ;;  %v4358_v38 = vpack.c.bf16 %v2993_v8, %v2981_v14  ;;  %v4168_v42 = vpack.c.bf16 %v2111_v33, %v2099_v9  ;;  %4161 = vmatprep.subr.bf16.mxu0 %v7467_v28  ;;  %v7474_v28 = vld [vmem:[#allocation80_spill] sm:$0xff] }
 0x168   :  { %2917 = vmatmul.mubr.f32.vlgmr.msra.gmra.mrb[2].mxu1 %v7466_v30  ;;  %v2105_v52 = vand.u32 4294901760, %v2104_v47  ;;  %v4360_v51 = vpack.c.bf16 %v3011_v2, %v2999_v59  ;;  %v2117_v50 = vand.u32 4294901760, %v2116_v15  ;;  %v7468_v56 = vand.u32 4294901760, %v5762_v20  ;;  %v7472_v2 = vld [vmem:[#allocation79_spill] sm:$0xff] }
 0x169   :  { %4351 = vmatpush1.bf16.msra.mxu1 %v6005_v55  ;;  %v7469_v18 = vand.u32 4294901760, %v5765_v21  ;;  %v3005_v43 = vand.u32 4294901760, %v3004_v58  ;;  %v3017_v11 = vand.u32 4294901760, %v3016_v6  ;;  %v2123_v14 = vand.u32 4294901760, %v2122_v19 }
 0x16a   :  { %v3028_v24 = vsub.f32 %v5762_v20, %v7468_v56  ;;  %4353 = vmatprep.subr.bf16.mxu1 %v7470_v45  ;;  %v2135_v8 = vand.u32 4294901760, %v2134_v10  ;;  %v7471_v9 = vmov 0.0   ;;  %v3023_v55 = vand.u32 4294901760, %v3022_v37  ;;  %4163 = vmatpush1.bf16.msra.mxu0 %v4162_v35 }
 0x16b   :  { %v3040_v63 = vsub.f32 %v5765_v21, %v7469_v18  ;;  %2247 = vmatprep.mubr.f32.mxu0 %v7471_v9  ;;  %v3035_v33 = vand.u32 4294901760, %v3034_v1  ;;  %v2129_v47 = vand.u32 4294901760, %v2128_v13  ;;  %v2141_v59 = vand.u32 4294901760, %v2140_v3  ;;  %3147 = vmatprep.mubr.f32.mxu1 %v7471_v9 }
 0x16c   :  { %v7473_v15 = vand.u32 4294901760, %v7472_v2  ;;  %v7475_v56 = vand.u32 4294901760, %v7474_v28  ;;  %v7476_v6 = vand.u32 4294901760, %v5778_v61  ;;  %v7477_v10 = vand.u32 4294901760, %v7380_v16  ;;  %4165 = vmatprep.subr.bf16.mxu0 %v4164_v57 }
 0x16d   :  { %4355 = vmatpush1.bf16.msra.mxu1 %v4354_v40  ;;  %v3029_v3 = vand.u32 4294901760, %v3028_v24  ;;  %v3041_v35 = vand.u32 4294901760, %v3040_v63  ;;  %v7478_v37 = vand.u32 4294901760, %v5785_v48  ;;  %v7479_v18 = vand.u32 4294901760, %v5787_v44 }
 0x16e   :  { %v2146_v30 = vsub.f32 %v7472_v2, %v7473_v15  ;;  %v2158_v58 = vsub.f32 %v7474_v28, %v7475_v56  ;;  %v3046_v19 = vsub.f32 %v5778_v61, %v7476_v6  ;;  %v3058_v13 = vsub.f32 %v7380_v16, %v7477_v10  ;;  %4357 = vmatprep.subr.bf16.mxu1 %v4356_v62 }
 0x16f   :  { %v2152_v1 = vsub.f32 %v5785_v48, %v7478_v37  ;;  %v2164_v45 = vsub.f32 %v5787_v44, %v7479_v18  ;;  %v4170_v15 = vpack.c.bf16 %v2117_v50, %v2105_v52  ;;  %v4362_v56 = vpack.c.bf16 %v3017_v11, %v3005_v43  ;;  %4167 = vmatpush1.bf16.msra.mxu0 %v4166_v27 }
 0x170   :  { %v7480_v6 = vand.u32 4294901760, %v5791_v4  ;;  %v7481_v40 = vand.u32 4294901760, %v5795_v32  ;;  %v4172_v24 = vpack.c.bf16 %v2135_v8, %v2123_v14  ;;  %v4364_v63 = vpack.c.bf16 %v3035_v33, %v3023_v55  ;;  %4169 = vmatprep.subr.bf16.mxu0 %v4168_v42 }
 0x171   :  { %v7482_v10 = vand.u32 4294901760, %v5800_v31  ;;  %v7483_v48 = vand.u32 4294901760, %v5802_v25  ;;  %v2147_v50 = vand.u32 4294901760, %v2146_v30  ;;  %v2159_v52 = vand.u32 4294901760, %v2158_v58  ;;  %4359 = vmatpush1.bf16.msra.mxu1 %v4358_v38 }
 0x172   :  { %v3052_v61 = vsub.f32 %v5791_v4, %v7480_v6  ;;  %v3064_v57 = vsub.f32 %v5795_v32, %v7481_v40  ;;  %v3047_v43 = vand.u32 4294901760, %v3046_v19  ;;  %v3059_v11 = vand.u32 4294901760, %v3058_v13  ;;  %4361 = vmatprep.subr.bf16.mxu1 %v4360_v51  ;;  %v7490_v13 = vld [vmem:[#allocation96_spill] sm:$0xff] }
 0x173   :  { %v2170_v37 = vsub.f32 %v5800_v31, %v7482_v10  ;;  %v2182_v62 = vsub.f32 %v5802_v25, %v7483_v48  ;;  %v4174_v18 = vpack.c.bf16 %v2141_v59, %v2129_v47  ;;  %v4366_v6 = vpack.c.bf16 %v3041_v35, %v3029_v3  ;;  %v7485_v31 = vld [vmem:[#allocation92_spill] sm:$0xff]  ;;  %v7488_v47 = vld [vmem:[#allocation94_spill] sm:$0xff]  ;;  %4171 = vmatpush1.bf16.msra.mxu0 %v4170_v15 }
 0x174   :  { %v2153_v40 = vand.u32 4294901760, %v2152_v1  ;;  %v2165_v14 = vand.u32 4294901760, %v2164_v45  ;;  %v3053_v8 = vand.u32 4294901760, %v3052_v61  ;;  %v3065_v55 = vand.u32 4294901760, %v3064_v57  ;;  %4173 = vmatprep.subr.bf16.mxu0 %v4172_v24 }
 0x175   :  { %v7484_v33 = vand.u32 4294901760, %v5806_v54  ;;  %v7486_v48 = vand.u32 4294901760, %v7485_v31  ;;  %v2171_v30 = vand.u32 4294901760, %v2170_v37  ;;  %v2183_v58 = vand.u32 4294901760, %v2182_v62  ;;  %4363 = vmatpush1.bf16.msra.mxu1 %v4362_v56  ;;  %v7493_v37 = vld [vmem:[#allocation98_spill] sm:$0xff] }
 0x176   :  { %v7487_v38 = vand.u32 4294901760, %v5813_v34  ;;  %v7489_v59 = vand.u32 4294901760, %v7488_v47  ;;  %v4176_v61 = vpack.c.bf16 %v2159_v52, %v2147_v50  ;;  %v4368_v19 = vpack.c.bf16 %v3059_v11, %v3047_v43  ;;  %4365 = vmatprep.subr.bf16.mxu1 %v4364_v63 }
 0x177   :  { %v3070_v10 = vsub.f32 %v5806_v54, %v7484_v33  ;;  %v3082_v27 = vsub.f32 %v7485_v31, %v7486_v48  ;;  %v7491_v3 = vand.u32 4294901760, %v7490_v13  ;;  %v7492_v1 = vand.u32 4294901760, %v5827_v41  ;;  %v7495_v48 = vld [vmem:[#allocation99_spill] sm:$0xff]  ;;  %4175 = vmatpush1.bf16.msra.mxu0 %v4174_v18 }
 0x178   :  { %v2176_v42 = vsub.f32 %v5813_v34, %v7487_v38  ;;  %v2188_v51 = vsub.f32 %v7488_v47, %v7489_v59  ;;  %v4178_v57 = vpack.c.bf16 %v2165_v14, %v2153_v40  ;;  %v7494_v62 = vand.u32 4294901760, %v7493_v37  ;;  %4177 = vmatprep.subr.bf16.mxu0 %v4176_v61 }
 0x179   :  { %v3076_v35 = vsub.f32 %v7490_v13, %v7491_v3  ;;  %v3088_v45 = vsub.f32 %v5827_v41, %v7492_v1  ;;  %v7496_v38 = vand.u32 4294901760, %v7495_v48  ;;  %v3071_v50 = vand.u32 4294901760, %v3070_v10  ;;  %4367 = vmatpush1.bf16.msra.mxu1 %v4366_v6 }
 0x17a   :  { %v2194_v33 = vsub.f32 %v7493_v37, %v7494_v62  ;;  %v3083_v52 = vand.u32 4294901760, %v3082_v27  ;;  %v7497_v43 = vand.u32 4294901760, %v7419_v12  ;;  %v7498_v59 = vand.u32 4294901760, %v7420_v60  ;;  %4369 = vmatprep.subr.bf16.mxu1 %v4368_v19 }
 0x17b   :  { %v2206_v15 = vsub.f32 %v7495_v48, %v7496_v38  ;;  %v4370_v24 = vpack.c.bf16 %v3065_v55, %v3053_v8  ;;  %v4180_v40 = vpack.c.bf16 %v2183_v58, %v2171_v30  ;;  %v2177_v14 = vand.u32 4294901760, %v2176_v42  ;;  %4179 = vmatpush1.bf16.msra.mxu0 %v4178_v57  ;;  %v7505_v57 = vld [vmem:[#allocation42_spill] sm:$0xff] }
 0x17c   :  { %v3094_v11 = vsub.f32 %v7419_v12, %v7497_v43  ;;  %v3106_v56 = vsub.f32 %v7420_v60, %v7498_v59  ;;  %v2189_v3 = vand.u32 4294901760, %v2188_v51  ;;  %v3077_v1 = vand.u32 4294901760, %v3076_v35 }
 0x17d   :  { %v3089_v62 = vand.u32 4294901760, %v3088_v45  ;;  %v7499_v38 = vand.u32 4294901760, %v7427_v39  ;;  %v7500_v10 = vand.u32 4294901760, %v7428_v29  ;;  %v2195_v43 = vand.u32 4294901760, %v2194_v33  ;;  %4371 = vmatpush1.bf16.msra.mxu1 %v4370_v24  ;;  %4181 = vmatprep.subr.bf16.mxu0 %v4180_v40  ;;  %v7507_v24 = vld [vmem:[#allocation48_spill] sm:$0xff]  ;;  %v7508_v40 = vld [vmem:[#allocation50_spill] sm:$0xff] }
 0x17e   :  { %v2207_v12 = vand.u32 4294901760, %v2206_v15  ;;  %v7501_v8 = vand.u32 4294901760, %v7431_v5  ;;  %v7502_v18 = vand.u32 4294901760, %v5976_v7  ;;  %v4372_v58 = vpack.c.bf16 %v3083_v52, %v3071_v50  ;;  %v7503_v50 = vld [vmem:[#allocation37_spill] sm:$0xff]  ;;  %v7504_v52 = vld [vmem:[#allocation39_spill] sm:$0xff] }
 0x17f   :  { %v2200_v63 = vsub.f32 %v7427_v39, %v7499_v38  ;;  %v2212_v27 = vsub.f32 %v7428_v29, %v7500_v10  ;;  %v3095_v42 = vand.u32 4294901760, %v3094_v11  ;;  %v3107_v51 = vand.u32 4294901760, %v3106_v56  ;;  %v7506_v56 = vld [vmem:[#allocation44_spill] sm:$0xff] }
 0x180   :  { %v3100_v55 = vsub.f32 %v7431_v5, %v7501_v8  ;;  %v3112_v30 = vsub.f32 %v5976_v7, %v7502_v18  ;;  %v4182_v35 = vpack.c.bf16 %v2189_v3, %v2177_v14  ;;  %v4374_v6 = vpack.c.bf16 %v3089_v62, %v3077_v1  ;;  %4373 = vmatprep.subr.bf16.mxu1 %v4372_v58  ;;  %v7509_v3 = vld [vmem:[#allocation52_spill] sm:$0xff]  ;;  %v7510_v1 = vld [vmem:[#allocation54_spill] sm:$0xff]  ;;  %v7516_v58 = vld [vmem:[#allocation101_spill] sm:$0xff] }
 0x181   :  { %v2201_v45 = vand.u32 4294901760, %v2200_v63  ;;  %v2213_v59 = vand.u32 4294901760, %v2212_v27  ;;  %v4184_v61 = vpack.c.bf16 %v2207_v12, %v2195_v43  ;;  %v4376_v38 = vpack.c.bf16 %v3107_v51, %v3095_v42  ;;  %v7511_v63 = vld [vmem:[#allocation57_spill] sm:$0xff]  ;;  %v7512_v27 = vld [vmem:[#allocation67_spill] sm:$0xff]  ;;  %v7513_v8 = vld [vmem:[#allocation74_spill] sm:$0xff] }
 0x182   :  { %v3101_v33 = vand.u32 4294901760, %v3100_v55  ;;  %v3113_v15 = vand.u32 4294901760, %v3112_v30  ;;  %4183 = vmatpush1.bf16.msra.mxu0 %v4182_v35  ;;  %4375 = vmatpush1.bf16.msra.mxu1 %v4374_v6  ;;  %v4188_v11 = vpack.c.bf16 %v7504_v52, %v7503_v50  ;;  %v4380_v14 = vpack.c.bf16 %v7506_v56, %v7505_v57  ;;  %v7514_v55 = vld [vmem:[#allocation75_spill] sm:$0xff]  ;;  %v7515_v30 = vld [vmem:[#allocation100_spill] sm:$0xff]  ;;  %v7517_v42 = vld [vmem:[#allocation78_spill] sm:$0xff] }
 0x183   :  { %v4186_v10 = vpack.c.bf16 %v2213_v59, %v2201_v45  ;;  %4185 = vmatprep.subr.bf16.mxu0 %v4184_v61  ;;  %4377 = vmatprep.subr.bf16.mxu1 %v4376_v38  ;;  %v4190_v12 = vpack.c.bf16 %v7508_v40, %v7507_v24  ;;  %v4382_v62 = vpack.c.bf16 %v7510_v1, %v7509_v3  ;;  %v7518_v51 = vld [vmem:[#allocation15_spill] sm:$0xff]  ;;  %v7520_v59 = vld [vmem:[#allocation21_spill] sm:$0xff]  ;;  %v7521_v61 = vld [vmem:[#allocation22_spill] sm:$0xff] }
 0x184   :  { %v4378_v19 = vpack.c.bf16 %v3113_v15, %v3101_v33  ;;  %v4192_v43 = vpack.c.bf16 %v7512_v27, %v7511_v63  ;;  %v4384_v18 = vpack.c.bf16 %v7514_v55, %v7513_v8  ;;  %v4194_v35 = vpack.c.bf16 %v7518_v51, %v7517_v42  ;;  %v7519_v45 = vld [vmem:[#allocation19_spill] sm:$0xff]  ;;  %v7523_v38 = vld [vmem:[#allocation25_spill] sm:$0xff] }
 0x185   :  { %v4386_v6 = vpack.c.bf16 %v7520_v59, %v7519_v45  ;;  %v7522_v33 = vld [vmem:[#allocation23_spill] sm:$0xff]  ;;  %v7530_v59 = vld [vmem:[#allocation38_spill] sm:$0xff] }
 0x186   :  { %4187 = vmatpush1.bf16.msra.mxu0 %v4186_v10  ;;  %4379 = vmatpush1.bf16.msra.mxu1 %v4378_v19  ;;  %v4196_v15 = vpack.c.bf16 %v7522_v33, %v7521_v61  ;;  %v7524_v10 = vld [vmem:[#allocation26_spill] sm:$0xff] }
 0x187   :  { %4189 = vmatprep.subr.bf16.mxu0 %v4188_v11  ;;  %4381 = vmatprep.subr.bf16.mxu1 %v4380_v14  ;;  %v4388_v19 = vpack.c.bf16 %v7524_v10, %v7523_v38  ;;  %v7525_v11 = vld [vmem:[#allocation28_spill] sm:$0xff]  ;;  %v7526_v14 = vld [vmem:[#allocation29_spill] sm:$0xff]  ;;  %v7532_v61 = vld [vmem:[#allocation46_spill] sm:$0xff]  ;;  %v4202_v38 = vpack.c.bf16 %v7342_v46, %v5725_v22  ;;  %v4398_v22 = vpack.c.bf16 %v5765_v21, %v5762_v20 }
 0x188   :  { %v4208_v46 = vpack.c.bf16 %v7474_v28, %v7472_v2  ;;  %v4404_v20 = vpack.c.bf16 %v7485_v31, %v5806_v54  ;;  %v4406_v21 = vpack.c.bf16 %v5827_v41, %v7490_v13  ;;  %v4218_v31 = vpack.c.bf16 %v7428_v29, %v7427_v39  ;;  %v7539_v54 = vld [vmem:[#allocation40_spill] sm:$0xff]  ;;  %v7540_v41 = vld [vmem:[#allocation105_spill] sm:$0xff]  ;;  %v7541_v2 = vld [vmem:[#allocation47_spill] sm:$0xff] }
 0x189   :  { %2249 = vmatmul.mubr.f32.vlgmr.msra.gmra.mrb[2].mxu0 %v7515_v30  ;;  %3149 = vmatmul.mubr.f32.vlgmr.msra.gmra.mrb[2].mxu1 %v7516_v58  ;;  %v7529_v30 = vld [vmem:[#allocation35_spill] sm:$0xff]  ;;  %v7544_v29 = vld [vmem:[#allocation56_spill] sm:$0xff] }
 0x18a   :  { %4191 = vmatpush1.bf16.msra.mxu0 %v4190_v12  ;;  %4383 = vmatpush1.bf16.msra.mxu1 %v4382_v62  ;;  %v4198_v12 = vpack.c.bf16 %v7526_v14, %v7525_v11  ;;  %v7527_v62 = vld [vmem:[#allocation30_spill] sm:$0xff]  ;;  %v4200_v33 = vpack.c.bf16 %v7530_v59, %v7529_v30  ;;  %v7543_v28 = vld [vmem:[#allocation51_spill] sm:$0xff]  ;;  %v7549_v13 = vld [vmem:[#allocation24_spill] sm:$0xff] }
 0x18b   :  { %4193 = vmatprep.subr.bf16.mxu0 %v4192_v43  ;;  %4385 = vmatprep.subr.bf16.mxu1 %v4384_v18  ;;  %v7528_v43 = vld [vmem:[#allocation32_spill] sm:$0xff]  ;;  %v7531_v18 = vld [vmem:[#allocation43_spill] sm:$0xff] }
 0x18c   :  { %2383 = vmatprep.mubr.f32.mxu0 %v7471_v9  ;;  %3283 = vmatprep.mubr.f32.mxu1 %v7471_v9  ;;  %v4390_v58 = vpack.c.bf16 %v7528_v43, %v7527_v62  ;;  %v4392_v10 = vpack.c.bf16 %v7532_v61, %v7531_v18  ;;  %v7545_v39 = vld [vmem:[#allocation71_spill] sm:$0xff] }
 0x18d   :  { %v7557_v18 = vld [vmem:[#allocation59_spill] sm:$0xff] }
 0x18e   :  { %4195 = vmatpush1.bf16.msra.mxu0 %v4194_v35  ;;  %4387 = vmatpush1.bf16.msra.mxu1 %v4386_v6  ;;  %v4394_v35 = vpack.c.bf16 %v7347_v0, %v7346_v49  ;;  %v4204_v6 = vpack.c.bf16 %v7357_v26, %v7353_v23  ;;  %v7534_v49 = vld [vmem:[#allocation84_spill] sm:$0xff]  ;;  %v7535_v0 = vld [vmem:[#allocation87_spill] sm:$0xff]  ;;  %v7536_v26 = vld [vmem:[#allocation90_spill] sm:$0xff] }
 0x18f   :  { %4197 = vmatprep.subr.bf16.mxu0 %v4196_v15  ;;  %4389 = vmatprep.subr.bf16.mxu1 %v4388_v19  ;;  %v4396_v15 = vpack.c.bf16 %v7359_v17, %v7358_v36  ;;  %v7533_v19 = vld [vmem:[#allocation64_spill] sm:$0xff]  ;;  %v4400_v23 = vpack.c.bf16 %v7380_v16, %v7534_v49  ;;  %v4210_v36 = vpack.c.bf16 %v5787_v44, %v7535_v0  ;;  %v7565_v49 = vld [vmem:[#allocation91_spill] sm:$0xff] }
 0x190   :  { %v4206_v61 = vpack.c.bf16 %v5758_v53, %v7533_v19  ;;  %v4402_v53 = vpack.c.bf16 %v5795_v32, %v5791_v4  ;;  %v4212_v17 = vpack.c.bf16 %v5802_v25, %v7536_v26  ;;  %v4214_v16 = vpack.c.bf16 %v7488_v47, %v5813_v34  ;;  %v7537_v4 = vld [vmem:[#allocation103_spill] sm:$0xff]  ;;  %v7538_v25 = vld [vmem:[#allocation36_spill] sm:$0xff]  ;;  %v7548_v47 = vld [vmem:[#allocation82_spill] sm:$0xff] }
 0x191   :  { %v4216_v44 = vpack.c.bf16 %v7495_v48, %v7493_v37  ;;  %v4408_v32 = vpack.c.bf16 %v7420_v60, %v7537_v4  ;;  %v4410_v34 = vpack.c.bf16 %v5976_v7, %v7431_v5  ;;  %v7542_v60 = vld [vmem:[#allocation106_spill] sm:$0xff]  ;;  %v7546_v7 = vld [vmem:[#allocation77_spill] sm:$0xff]  ;;  %v7550_v37 = vld [vmem:[#allocation27_spill] sm:$0xff]  ;;  %v7570_v26 = vand.u32 4294901760, %v7504_v52 }
 0x192   :  { %4199 = vmatpush1.bf16.msra.mxu0 %v4198_v12  ;;  %4391 = vmatpush1.bf16.msra.mxu1 %v4390_v58  ;;  %v7547_v5 = vld [vmem:[#allocation81_spill] sm:$0xff]  ;;  %v7551_v48 = vld [vmem:[#allocation31_spill] sm:$0xff]  ;;  %v7556_v12 = vld [vmem:[#allocation18_spill] sm:$0xff]  ;;  %v7579_v52 = vand.u32 4294901760, %v7510_v1  ;;  %v7586_v1 = vand.u32 4294901760, %v7517_v42 }
 0x193   :  { %4201 = vmatprep.subr.bf16.mxu0 %v4200_v33  ;;  %4393 = vmatprep.subr.bf16.mxu1 %v4392_v10  ;;  %v7552_v58 = vld [vmem:[#allocation33_spill] sm:$0xff]  ;;  %v7555_v10 = vld [vmem:[#allocation55_spill] sm:$0xff] }
 0x194   :  { %v7553_v33 = vld [vmem:[#allocation41_spill] sm:$0xff]  ;;  %v7561_v19 = vld [vmem:[#allocation83_spill] sm:$0xff] }
 0x195   :  { %v7567_v0 = vld [vmem:[#allocation95_spill] sm:$0xff]  ;;  %v7574_v4 = vld [vmem:[#allocation61_spill] sm:$0xff] }
 0x196   :  { %4203 = vmatpush1.bf16.msra.mxu0 %v4202_v38  ;;  %4395 = vmatpush1.bf16.msra.mxu1 %v4394_v35  ;;  %v7554_v38 = vld [vmem:[#allocation49_spill] sm:$0xff]  ;;  %v7558_v35 = vld [vmem:[#allocation63_spill] sm:$0xff] }
 0x197   :  { %4205 = vmatprep.subr.bf16.mxu0 %v4204_v6  ;;  %4397 = vmatprep.subr.bf16.mxu1 %v4396_v15  ;;  %v7559_v6 = vld [vmem:[#allocation70_spill] sm:$0xff] }
 0x198   :  { %v7560_v15 = vld [vmem:[#allocation34_spill] sm:$0xff] }
 0x19a   :  { %4207 = vmatpush1.bf16.msra.mxu0 %v4206_v61  ;;  %4399 = vmatpush1.bf16.msra.mxu1 %v4398_v22  ;;  %v7562_v61 = vld [vmem:[#allocation86_spill] sm:$0xff]  ;;  %v7563_v22 = vld [vmem:[#allocation88_spill] sm:$0xff] }
 0x19b   :  { %4209 = vmatprep.subr.bf16.mxu0 %v4208_v46  ;;  %4401 = vmatprep.subr.bf16.mxu1 %v4400_v23  ;;  %v7564_v46 = vld [vmem:[#allocation89_spill] sm:$0xff] }
 0x19c   :  { %v7566_v23 = vld [vmem:[#allocation93_spill] sm:$0xff] }
 0x19e   :  { %4211 = vmatpush1.bf16.msra.mxu0 %v4210_v36  ;;  %4403 = vmatpush1.bf16.msra.mxu1 %v4402_v53  ;;  %v7568_v36 = vld [vmem:[#allocation97_spill] sm:$0xff]  ;;  %v7569_v53 = vand.u32 4294901760, %v7503_v50  ;;  %v7578_v50 = vand.u32 4294901760, %v7509_v3  ;;  %v7585_v3 = vand.u32 4294901760, %v7542_v60 }
 0x19f   :  { %4213 = vmatprep.subr.bf16.mxu0 %v4212_v17  ;;  %4405 = vmatprep.subr.bf16.mxu1 %v4404_v20  ;;  %v7571_v20 = vld [vmem:[#allocation102_spill] sm:$0xff] }
 0x1a0   :  { %v4252_v17 = vpack.c.bf16 %v7570_v26, %v7569_v53  ;;  %v4446_v53 = vpack.c.bf16 %v7579_v52, %v7578_v50 }
 0x1a2   :  { %4215 = vmatpush1.bf16.msra.mxu0 %v4214_v16  ;;  %4407 = vmatpush1.bf16.msra.mxu1 %v4406_v21  ;;  %v7572_v16 = vand.u32 4294901760, %v7505_v57  ;;  %v7573_v21 = vand.u32 4294901760, %v7506_v56  ;;  %v7580_v57 = vand.u32 4294901760, %v7511_v63  ;;  %v7581_v56 = vand.u32 4294901760, %v7512_v27 }
 0x1a3   :  { %4217 = vmatprep.subr.bf16.mxu0 %v4216_v44  ;;  %4409 = vmatprep.subr.bf16.mxu1 %v4408_v32  ;;  %v7575_v32 = vand.u32 4294901760, %v7507_v24  ;;  %v7583_v24 = vand.u32 4294901760, %v7514_v55  ;;  %v7587_v63 = vand.u32 4294901760, %v7518_v51  ;;  %v7588_v27 = vand.u32 4294901760, %v7519_v45 }
 0x1a4   :  { %v4444_v44 = vpack.c.bf16 %v7573_v21, %v7572_v16  ;;  %v4256_v26 = vpack.c.bf16 %v7581_v56, %v7580_v57  ;;  %v7582_v16 = vand.u32 4294901760, %v7513_v8  ;;  %v7584_v21 = vand.u32 4294901760, %v7540_v41  ;;  %v7589_v8 = vld [vmem:[#allocation21_spill] sm:$0xff]  ;;  %v7597_v57 = vld [vmem:[#allocation26_spill] sm:$0xff] }
 0x1a5   :  { %v7598_v42 = vand.u32 4294901760, %v7597_v57  ;;  %v7599_v51 = vand.u32 4294901760, %v7525_v11  ;;  %v7600_v45 = vand.u32 4294901760, %v7526_v14  ;;  %v7605_v11 = vld [vmem:[#allocation73_spill] sm:$0xff]  ;;  %v7606_v14 = vld [vmem:[#allocation76_spill] sm:$0xff] }
 0x1a6   :  { %4219 = vmatpush1.bf16.msra.mxu0 %v4218_v31  ;;  %4411 = vmatpush1.bf16.msra.mxu1 %v4410_v34  ;;  %v7576_v31 = vand.u32 4294901760, %v7508_v40  ;;  %v4448_v40 = vpack.c.bf16 %v7583_v24, %v7582_v16  ;;  %v7602_v16 = vand.u32 4294901760, %v7528_v43  ;;  %v7610_v43 = vld [vmem:[#allocation20_spill] sm:$0xff]  ;;  %v7625_v57 = vld [vmem:[#allocation101_spill] sm:$0xff] }
 0x1a7   :  { %4221 = vmatprep.subr.bf16.mxu0 %v7538_v25  ;;  %4413 = vmatprep.subr.bf16.mxu1 %v7539_v54 }
 0x1a8   :  { %v4254_v34 = vpack.c.bf16 %v7576_v31, %v7575_v32  ;;  %v7591_v32 = vld [vmem:[#allocation22_spill] sm:$0xff] }
 0x1a9   :  { %2386 = vmatmul.mubr.f32.vlgmr.msra.gmra.mrb[2].mxu0 %v7540_v41  ;;  %3286 = vmatmul.mubr.f32.vlgmr.msra.gmra.mrb[2].mxu1 %v7542_v60  ;;  %v7592_v31 = vand.u32 4294901760, %v7591_v32  ;;  %v7593_v41 = vld [vmem:[#allocation23_spill] sm:$0xff]  ;;  %v7595_v60 = vld [vmem:[#allocation25_spill] sm:$0xff]  ;;  %v7618_v32 = vld [vmem:[#allocation110_spill] sm:$0xff] }
 0x1aa   :  { %4223 = vmatpush1.bf16.msra.mxu0 %v7541_v2  ;;  %4415 = vmatpush1.bf16.msra.mxu1 %v7543_v28  ;;  %v7594_v50 = vand.u32 4294901760, %v7593_v41  ;;  %v7596_v52 = vand.u32 4294901760, %v7595_v60  ;;  %v7620_v41 = vld [vmem:[#allocation104_spill] sm:$0xff]  ;;  %v7623_v60 = vld [vmem:[#allocation111_spill] sm:$0xff] }
 0x1ab   :  { %4225 = vmatprep.subr.bf16.mxu0 %v7544_v29  ;;  %4417 = vmatprep.subr.bf16.mxu1 %v7545_v39 }
 0x1ac   :  { %2488 = vmatprep.mubr.f32.mxu0 %v7471_v9  ;;  %3388 = vmatprep.mubr.f32.mxu1 %v7471_v9  ;;  %v4452_v56 = vpack.c.bf16 %v7598_v42, %v7596_v52  ;;  %v7624_v52 = vld [vmem:[#allocation100_spill] sm:$0xff] }
 0x1ae   :  { %4227 = vmatpush1.bf16.msra.mxu0 %v7546_v7  ;;  %4419 = vmatpush1.bf16.msra.mxu1 %v7547_v5 }
 0x1af   :  { %4229 = vmatprep.subr.bf16.mxu0 %v7548_v47  ;;  %4421 = vmatprep.subr.bf16.mxu1 %v7549_v13 }
 0x1b2   :  { %4231 = vmatpush1.bf16.msra.mxu0 %v7550_v37  ;;  %4423 = vmatpush1.bf16.msra.mxu1 %v7551_v48 }
 0x1b3   :  { %4233 = vmatprep.subr.bf16.mxu0 %v7552_v58  ;;  %4425 = vmatprep.subr.bf16.mxu1 %v7553_v33 }
 0x1b6   :  { %4235 = vmatpush1.bf16.msra.mxu0 %v7554_v38  ;;  %4427 = vmatpush1.bf16.msra.mxu1 %v7555_v10 }
 0x1b7   :  { %4237 = vmatprep.subr.bf16.mxu0 %v7556_v12  ;;  %4429 = vmatprep.subr.bf16.mxu1 %v7557_v18 }
 0x1ba   :  { %4239 = vmatpush1.bf16.msra.mxu0 %v7558_v35  ;;  %4431 = vmatpush1.bf16.msra.mxu1 %v7559_v6 }
 0x1bb   :  { %4241 = vmatprep.subr.bf16.mxu0 %v7560_v15  ;;  %4433 = vmatprep.subr.bf16.mxu1 %v7561_v19 }
 0x1be   :  { %4243 = vmatpush1.bf16.msra.mxu0 %v7562_v61  ;;  %4435 = vmatpush1.bf16.msra.mxu1 %v7563_v22 }
 0x1bf   :  { %4245 = vmatprep.subr.bf16.mxu0 %v7564_v46  ;;  %4437 = vmatprep.subr.bf16.mxu1 %v7565_v49 }
 0x1c2   :  { %4247 = vmatpush1.bf16.msra.mxu0 %v7566_v23  ;;  %4439 = vmatpush1.bf16.msra.mxu1 %v7567_v0 }
 0x1c3   :  { %4249 = vmatprep.subr.bf16.mxu0 %v7568_v36  ;;  %4441 = vmatprep.subr.bf16.mxu1 %v7571_v20  ;;  %v7577_v36 = vld [vmem:[#allocation68_spill] sm:$0xff] }
 0x1c6   :  { %4251 = vmatpush1.bf16.msra.mxu0 %v7574_v4  ;;  %4443 = vmatpush1.bf16.msra.mxu1 %v7577_v36 }
 0x1c7   :  { %4253 = vmatprep.subr.bf16.mxu0 %v4252_v17  ;;  %4445 = vmatprep.subr.bf16.mxu1 %v4444_v44  ;;  %v4258_v17 = vpack.c.bf16 %v7587_v63, %v7586_v1  ;;  %v7590_v44 = vand.u32 4294901760, %v7589_v8  ;;  %v7607_v1 = vld [vmem:[#allocation53_spill] sm:$0xff]  ;;  %v7608_v63 = vld [vmem:[#allocation16_spill] sm:$0xff]  ;;  %v7615_v8 = vld [vmem:[#allocation107_spill] sm:$0xff] }
 0x1c9   :  { %2492 = vmatmul.mubr.f32.vlgmr.msra.gmra.mrb[2].mxu0 %v7584_v21  ;;  %3392 = vmatmul.mubr.f32.vlgmr.msra.gmra.mrb[2].mxu1 %v7585_v3  ;;  %v4450_v55 = vpack.c.bf16 %v7590_v44, %v7588_v27  ;;  %v7604_v21 = vand.u32 4294901760, %v7530_v59  ;;  %v7612_v59 = vld [vmem:[#allocation60_spill] sm:$0xff]  ;;  %v7614_v27 = vld [vmem:[#allocation85_spill] sm:$0xff] }
 0x1ca   :  { %4255 = vmatpush1.bf16.msra.mxu0 %v4254_v34  ;;  %4447 = vmatpush1.bf16.msra.mxu1 %v4446_v53  ;;  %v4260_v34 = vpack.c.bf16 %v7594_v50, %v7592_v31  ;;  %v4262_v53 = vpack.c.bf16 %v7600_v45, %v7599_v51  ;;  %v7616_v44 = vld [vmem:[#allocation108_spill] sm:$0xff]  ;;  %v7619_v31 = vld [vmem:[#allocation58_spill] sm:$0xff]  ;;  %v7621_v50 = vld [vmem:[#allocation65_spill] sm:$0xff] }
 0x1cb   :  { %4257 = vmatprep.subr.bf16.mxu0 %v4256_v26  ;;  %4449 = vmatprep.subr.bf16.mxu1 %v4448_v40  ;;  %v7601_v26 = vand.u32 4294901760, %v7527_v62  ;;  %v7603_v40 = vand.u32 4294901760, %v7529_v30  ;;  %v7609_v62 = vld [vmem:[#allocation17_spill] sm:$0xff] }
 0x1cc   :  { %2658 = vmatprep.mubr.f32.mxu0 %v7471_v9  ;;  %3558 = vmatprep.mubr.f32.mxu1 %v7471_v9  ;;  %v7611_v30 = vld [vmem:[#allocation45_spill] sm:$0xff] }
 0x1cd   :  { %v4454_v24 = vpack.c.bf16 %v7602_v16, %v7601_v26  ;;  %v4264_v3 = vpack.c.bf16 %v7604_v21, %v7603_v40 }
 0x1ce   :  { %4259 = vmatpush1.bf16.msra.mxu0 %v4258_v17  ;;  %4451 = vmatpush1.bf16.msra.mxu1 %v4450_v55  ;;  %v7613_v17 = vld [vmem:[#allocation62_spill] sm:$0xff]  ;;  %v7617_v55 = vld [vmem:[#allocation109_spill] sm:$0xff] }
 0x1cf   :  { %4261 = vmatprep.subr.bf16.mxu0 %v4260_v34  ;;  %4453 = vmatprep.subr.bf16.mxu1 %v4452_v56  ;;  %v7622_v34 = vld [vmem:[#allocation66_spill] sm:$0xff] }
 0x1d2   :  { %4263 = vmatpush1.bf16.msra.mxu0 %v4262_v53  ;;  %4455 = vmatpush1.bf16.msra.mxu1 %v4454_v24 }
 0x1d3   :  { %4265 = vmatprep.subr.bf16.mxu0 %v4264_v3  ;;  %4457 = vmatprep.subr.bf16.mxu1 %v7605_v11 }
 0x1d6   :  { %4267 = vmatpush1.bf16.msra.mxu0 %v7606_v14  ;;  %4459 = vmatpush1.bf16.msra.mxu1 %v7607_v1 }
 0x1d7   :  { %4269 = vmatprep.subr.bf16.mxu0 %v7608_v63  ;;  %4461 = vmatprep.subr.bf16.mxu1 %v7609_v62 }
 0x1da   :  { %4271 = vmatpush1.bf16.msra.mxu0 %v7610_v43  ;;  %4463 = vmatpush1.bf16.msra.mxu1 %v7611_v30 }
 0x1db   :  { %4273 = vmatprep.subr.bf16.mxu0 %v7612_v59  ;;  %4465 = vmatprep.subr.bf16.mxu1 %v7613_v17 }
 0x1de   :  { %4275 = vmatpush1.bf16.msra.mxu0 %v7614_v27  ;;  %4467 = vmatpush1.bf16.msra.mxu1 %v7615_v8 }
 0x1df   :  { %4277 = vmatprep.subr.bf16.mxu0 %v7616_v44  ;;  %4469 = vmatprep.subr.bf16.mxu1 %v7617_v55 }
 0x1e2   :  { %4279 = vmatpush1.bf16.msra.mxu0 %v7618_v32  ;;  %4471 = vmatpush1.bf16.msra.mxu1 %v7619_v31 }
 0x1e3   :  { %4281 = vmatprep.subr.bf16.mxu0 %v7620_v41  ;;  %4473 = vmatprep.subr.bf16.mxu1 %v7621_v50 }
 0x1e6   :  { %4283 = vmatpush1.bf16.msra.mxu0 %v7622_v34  ;;  %4475 = vmatpush1.bf16.msra.mxu1 %v7623_v60 }
 0x1e7   :  { %4285 = vmatprep.subr.bf16.mxu0 %v7538_v25  ;;  %4477 = vmatprep.subr.bf16.mxu1 %v7539_v54  ;;  %v3733_v25 = vld [vmem:[%s6635_s6] ss:$0 sm:$0xff] }
 0x1e9   :  { %2660 = vmatmul.mubr.f32.vlgmr.msra.gmra.mrb[2].mxu0 %v7624_v52  ;;  %3560 = vmatmul.mubr.f32.vlgmr.msra.gmra.mrb[2].mxu1 %v7625_v57 }
 0x1ea   :  { %4287 = vmatpush1.bf16.msra.mxu0 %v7541_v2  ;;  %4479 = vmatpush1.bf16.msra.mxu1 %v7543_v28 }
 0x1eb   :  { %4289 = vmatprep.subr.bf16.mxu0 %v7544_v29  ;;  %4481 = vmatprep.subr.bf16.mxu1 %v7545_v39 }
 0x1ec   :  { %2762 = vmatprep.mubr.f32.mxu0 %v7471_v9  ;;  %3662 = vmatprep.mubr.f32.mxu1 %v7471_v9  ;;  %v7626_v9 = vld [vmem:[#allocation97_spill] sm:$0xff] }
 0x1ee   :  { %4291 = vmatpush1.bf16.msra.mxu0 %v7546_v7  ;;  %4483 = vmatpush1.bf16.msra.mxu1 %v7547_v5 }
 0x1ef   :  { %4293 = vmatprep.subr.bf16.mxu0 %v7548_v47  ;;  %4485 = vmatprep.subr.bf16.mxu1 %v7549_v13 }
 0x1f2   :  { %4295 = vmatpush1.bf16.msra.mxu0 %v7550_v37  ;;  %4487 = vmatpush1.bf16.msra.mxu1 %v7551_v48 }
 0x1f3   :  { %4297 = vmatprep.subr.bf16.mxu0 %v7552_v58  ;;  %4489 = vmatprep.subr.bf16.mxu1 %v7553_v33 }
 0x1f6   :  { %4299 = vmatpush1.bf16.msra.mxu0 %v7554_v38  ;;  %4491 = vmatpush1.bf16.msra.mxu1 %v7555_v10 }
 0x1f7   :  { %4301 = vmatprep.subr.bf16.mxu0 %v7556_v12  ;;  %4493 = vmatprep.subr.bf16.mxu1 %v7557_v18  ;;  %v4702_v18 = vmov 2  }
 0x1f8   :  { %4562 = vset.pattern.permute.xlu0 %v4702_v18 }
 0x1fa   :  { %4303 = vmatpush1.bf16.msra.mxu0 %v7558_v35  ;;  %4495 = vmatpush1.bf16.msra.mxu1 %v7559_v6  ;;  %v4703_v35 = vmov 0  }
 0x1fb   :  { %4305 = vmatprep.subr.bf16.mxu0 %v7560_v15  ;;  %4497 = vmatprep.subr.bf16.mxu1 %v7561_v19 }
 0x1fc   :  { %4560 = vset.pattern.permute.xlu1 %v4703_v35 }
 0x1fe   :  { %4307 = vmatpush1.bf16.msra.mxu0 %v7562_v61  ;;  %4499 = vmatpush1.bf16.msra.mxu1 %v7563_v22  ;;  %v4704_v61 = vmov 1   ;;  %v4705_v22 = vmov 3  }
 0x1ff   :  { %4309 = vmatprep.subr.bf16.mxu0 %v7564_v46  ;;  %4501 = vmatprep.subr.bf16.mxu1 %v7565_v49  ;;  %v3732_v46 = vld [vmem:[%s6634_s5] ss:$0 sm:$0xff]  ;;  %v3735_v49 = vld [vmem:[%s6634_s5 + $0x1] ss:$0 sm:$0xff] }
 0x202   :  { %4311 = vmatpush1.bf16.msra.mxu0 %v7566_v23  ;;  %4503 = vmatpush1.bf16.msra.mxu1 %v7567_v0  ;;  %v3737_v0 = vld [vmem:[%s6634_s5 + $0x2] ss:$0 sm:$0xff] }
 0x203   :  { %4313 = vmatprep.subr.bf16.mxu0 %v7626_v9  ;;  %4505 = vmatprep.subr.bf16.mxu1 %v7571_v20 }
 0x206   :  { %4315 = vmatpush1.bf16.msra.mxu0 %v7574_v4  ;;  %4507 = vmatpush1.bf16.msra.mxu1 %v7577_v36  ;;  %v3739_v4 = vld [vmem:[%s6634_s5 + $0x3] ss:$0 sm:$0xff]  ;;  %s3721_s5 = sshll.u32 %s4706_s11, 4  ;;  %s3722_s5 = int_to_ptr.vmem [resolvable:$true] %s3721_s5 }
 0x207   :  { %s4665_s12 = scalar_lea.vmem %s3722_s5, 128  ;;  %p4670_p5 = scmp.lt.s32.totalorder %s3722_s5, %s3722_s5 }
 0x208   :  { %p4666_p4 = scmp.ne.s32.totalorder %s3722_s5, %s4665_s12  ;;  %p4671_p6 = scmp.lt.s32.totalorder %s4665_s12, %s4665_s12 }
 0x209   :  { %2764 = vmatmul.mubr.f32.vlgmr.msra.gmra.mrb[2].mxu0 %v7624_v52  ;;  %3664 = vmatmul.mubr.f32.vlgmr.msra.gmra.mrb[2].mxu1 %v7625_v57 }
 0x20a   :  { %p4672_p7 = por %p4671_p6, %p4670_p5 }
 0x20c   :  { %p4673_p8 = pnand %p4672_p7, %p4666_p4 }
 0x20e   :  { %v1865_v2 = vpop.f32.mrb[0].mxu1 }
 0x20f   :  { %v960_v54 = vpop.f32.mrb[0].mxu0  ;;  %v1867_v39 = vpop.f32.mrb[1].mxu1  ;;  %v1878_v36 = vadd.f32 %v3735_v49, %v1865_v2 }
 0x210   :  { %v962_v28 = vpop.f32.mrb[1].mxu0  ;;  %v972_v23 = vadd.f32 %v3732_v46, %v960_v54 }
 0x211   :  { %v980_v29 = vadd.f32 %v3733_v25, %v962_v28 }
 0x213   :  { %v1880_v7 = vadd.f32 %v1867_v39, %v980_v29 }
 0x2dc   :  { %v2765_v5 = vpop.f32.mrb[2].mxu0  ;;  %v3665_v47 = vpop.f32.mrb[2].mxu1 }
 0x2dd   :  { %v2767_v13 = vpop.f32.mrb[3].mxu0  ;;  %v3667_v48 = vpop.f32.mrb[3].mxu1  ;;  %v2778_v20 = vadd.f32 %v3737_v0, %v2765_v5  ;;  %v3678_v42 = vadd.f32 %v3739_v4, %v3665_v47 }
 0x2de   :  { %v2780_v37 = vadd.f32 %v2767_v13, %v1880_v7 }
 0x2e0   :  { %v3680_v58 = vadd.f32 %v3667_v48, %v2780_v37 }
 0x2e2   :  { %3681 = vmax.xlane.f32.xlu0 %v3680_v58 }
 0x36f   :  { %v3682_v33 = vpop.xlane.xlu0 %3681 }
 0x370   :  { %v3683_v38 = vsub.f32 %v3680_v58, %v3682_v33 }
 0x372   :  { %v3684_v10 = vmul.f32 1.442695, %v3683_v38 }
 0x374   :  { %4565 = vpow2.f32 %v3684_v10 }
 0x37e   :  { %v4566_v12 = vpop.eup %4565 }
 0x37f   :  { %3686 = vadd.xlane.f32.xlu0 %v4566_v12 }
 0x40c   :  { %v3687_v6 = vpop.xlane.xlu0 %3686 }
 0x40d   :  { %4567 = vrcp.f32 %v3687_v6 }
 0x40e   :  { %4569 = vtanh.f32 %v972_v23 }
 0x40f   :  { %4571 = vtanh.f32 %v1878_v36 }
 0x410   :  { %4573 = vtanh.f32 %v2778_v20 }
 0x411   :  { %4575 = vtanh.f32 %v3678_v42 }
 0x417   :  { %v4568_v15 = vpop.eup %4567 }
 0x418   :  { %v3689_v19 = vmul.f32 %v4568_v15, %v4566_v12  ;;  %v4570_v51 = vpop.eup %4569 }
 0x419   :  { %v4572_v45 = vpop.eup %4571 }
 0x41a   :  { %3703 = vperm.xlu0 %4562, %v3689_v19   ;;  %3692 = vperm.xlu1 %4560, %v3689_v19   ;;  %v4574_v40 = vpop.eup %4573 }
 0x41b   :  { %v4576_v11 = vpop.eup %4575 }
 0x41e   :  { %4561 = vset.pattern.permute.xlu1 %v4704_v61  ;;  %4564 = vset.pattern.permute.xlu0 %v4705_v22 }
 0x41f   :  { %3697 = vperm.xlu1 %4561, %v3689_v19  }
 0x423   :  { %4563 = vset.pattern.permute.xlu1 %v4705_v22 }
 0x424   :  { %3709 = vperm.xlu1 %4563, %v3689_v19  }
 0x499   :  { %v3693_v56 = vpop.permute.xlu1 %3692  ;;  %v3704_v53 = vpop.permute.xlu0 %3703 }
 0x49a   :  { %v3695_v16 = vmul.f32 %v4570_v51, %v3693_v56  ;;  %v3706_v21 = vmul.f32 %v4574_v40, %v3704_v53 }
 0x49e   :  { %v3698_v26 = vpop.permute.xlu1 %3697 }
 0x49f   :  { %v3700_v24 = vmul.f32 %v4572_v45, %v3698_v26 }
 0x4a1   :  { %v3701_v3 = vadd.f32 %v3700_v24, %v3695_v16 }
 0x4a3   :  { %v3707_v14 = vadd.f32 %v3706_v21, %v3701_v3  ;;  %v3710_v1 = vpop.permute.xlu1 %3709 }
 0x4a4   :  { %v3712_v63 = vmul.f32 %v4576_v11, %v3710_v1 }
 0x4a6   :  { %v3713_v62 = vadd.f32 %v3712_v63, %v3707_v14 }
 0x4a8   :  { %3714 = vst [vmem:[#allocation10] sm:$0xff] %v3713_v62 }
 0x4a9   :  { %4676 = shalt.err (!%p4673_p8)
}
 0x4aa   :  { %s4677_s13 = scalar_lea.hbm %s6636_s7, 128 }
 0x4ab   :  { %p4678_p9 = scmp.ne.s32.totalorder %s6636_s7, %s4677_s13  ;;  %p4681_p10 = scmp.lt.u32.totalorder %s4677_s13, %s6636_s7 }
 0x4ad   :  { %p4683_p11 = pnand %p4681_p10, %p4678_p9 }
 0x4af   :  { %4686 = shalt.err (!%p4683_p11)
}
 0x4b0   :  { %3724 = dma.vmem_to_hbm [thread:$0]  %s3722_s5, 128, %s6636_s7, [#allocation4]  }
 0x4b1   :  { %4693 = dma.done.wait [#allocation4], 128  }
 0x4b2   :  { %4694 = vsyncadd [#allocation4], 4294967168 }
 0x4b3   :  { %3728 = vsyncpa [#allocation3], 1 }
 0x4b4   :  { %3729 = vsyncpa [#allocation6], 1 }
 0x4b5   :  { %3730 = vsyncpa [#allocation9], 1 }
 0x4b6   :  { %3731 = vsyncpa [#allocation4], 1 }

</bundles_post_ra>
